<compile_context>
chip_gen: v5e
topology: v5e:2x2
jax: 0.10.0
libtpu: 0.0.40
codegen_flags: <defaults>
</compile_context>

<pallas_src>
import jax
import jax.numpy as jnp
from jax import lax
from jax.experimental import pallas as pl
from jax.experimental.pallas import tpu as pltpu

N, CIN, H, W_SP = 1, 64, 28, 28
COUT = 256
L = N * H * W_SP          # 784
EPS = 1e-3


def _fused_kernel(w_ref, a_ref, b_ref, gamma_ref, beta_ref, o_ref):
    # residual add (VPU), channel-major (CIN, L)
    x = a_ref[...] + b_ref[...]

    # 1x1 conv as a single MXU matmul oriented (L, CIN) @ (CIN, Cblk):
    # contract dim 0 of both operands (transposed-lhs matmul), so the output
    # last dim (Cblk, multiple of 128) is lane-dense.
    y = lax.dot_general(
        x, w_ref[...],
        dimension_numbers=(((0,), (0,)), ((), ())),
        preferred_element_type=jnp.float32)            # (L, Cblk) f32

    # one-pass batch statistics (training-mode BN, biased variance),
    # reduced over the sublane axis (axis 0) -> mostly element-wise VPU adds.
    inv_l = 1.0 / L
    s1 = jnp.sum(y, axis=0, keepdims=True)             # (1, Cblk)
    s2 = jnp.sum(y * y, axis=0, keepdims=True)         # (1, Cblk)
    mean = s1 * inv_l
    var = s2 * inv_l - mean * mean

    # fold BN into a single fused scale/shift pass over y
    scale = gamma_ref[...] * lax.rsqrt(var + EPS)      # (1, Cblk), rsqrt -> EUP
    shift = beta_ref[...] - mean * scale
    o_ref[...] = (y * scale + shift).astype(o_ref.dtype)


def _cout_blocks() -> int:
    """2 output-channel blocks on chips with 2 TensorCores (v7x, v4 megacore),
    otherwise 1 (no grid at all on single-TC v5e / v6e)."""
    try:
        kind = jax.devices()[0].device_kind.lower()
    except Exception:
        return 1
    if "7" in kind or "v4" in kind:
        return 2
    return 1


@jax.jit
def fused_add_conv1x1_bn(x64, x58, conv_w, gamma, beta):
    """x64, x58: (N, CIN, H, W) f32.  Returns (N, COUT, H, W) f32."""
    # N == 1: NCHW -> (CIN, N*H*W) is a pure reshape (no data movement)
    a = x64.reshape(CIN, L)
    b = x58.reshape(CIN, L)
    w_t = conv_w.reshape(COUT, CIN).T                  # (CIN, COUT), 64 KB
    g = gamma.reshape(1, COUT)
    bt = beta.reshape(1, COUT)

    nblk = _cout_blocks()                              # trace-time decision
    if nblk == 1:
        # latency-bound problem (~1.3 MB resident): no grid, whole arrays in VMEM
        out_lt = pl.pallas_call(
            _fused_kernel,
            out_shape=jax.ShapeDtypeStruct((L, COUT), jnp.float32),
            in_specs=[pl.BlockSpec(memory_space=pltpu.MemorySpace.VMEM)] * 5,
            out_specs=pl.BlockSpec(memory_space=pltpu.MemorySpace.VMEM),
        )(w_t, a, b, g, bt)
    else:
        # 2-TC chips: split COUT across the cores; BN stats are per output
        # channel so the halves are fully independent.
        cblk = COUT // nblk
        out_lt = pl.pallas_call(
            _fused_kernel,
            out_shape=jax.ShapeDtypeStruct((L, COUT), jnp.float32),
            grid=(nblk,),
            in_specs=[
                pl.BlockSpec((CIN, cblk), lambda i: (0, i)),   # weights
                pl.BlockSpec((CIN, L), lambda i: (0, 0)),      # x64 (shared)
                pl.BlockSpec((CIN, L), lambda i: (0, 0)),      # x58 (shared)
                pl.BlockSpec((1, cblk), lambda i: (0, i)),     # gamma
                pl.BlockSpec((1, cblk), lambda i: (0, i)),     # beta
            ],
            out_specs=pl.BlockSpec((L, cblk), lambda i: (0, i)),
            compiler_params=pltpu.CompilerParams(
                dimension_semantics=("parallel",)),
        )(w_t, a, b, g, bt)

    # (L, COUT) -> (N, H, W, COUT) -> NCHW
    return jnp.transpose(out_lt.reshape(N, H, W_SP, COUT), (0, 3, 1, 2))


def _reference(x64, x58, conv_w, gamma, beta):
    x = x64 + x58
    xm = x.reshape(CIN, L)                              # N == 1
    y = conv_w.reshape(COUT, CIN) @ xm                  # (COUT, L)
    mean = jnp.mean(y, axis=1, keepdims=True)
    var = jnp.mean((y - mean) ** 2, axis=1, keepdims=True)   # biased var
    y = (y - mean) / jnp.sqrt(var + EPS)
    y = y * gamma.reshape(COUT, 1) + beta.reshape(COUT, 1)
    return jnp.transpose(y.reshape(COUT, N, H, W_SP), (1, 0, 2, 3))


if __name__ == "__main__":
    key = jax.random.PRNGKey(0)
    k1, k2, k3, k4, k5 = jax.random.split(key, 5)

    # deterministic synthetic parameters (shapes from the module __init__)
    conv_w = jax.random.normal(k1, (COUT, CIN, 1, 1), jnp.float32) * (1.0 / jnp.sqrt(CIN))
    gamma = 1.0 + 0.1 * jax.random.normal(k2, (COUT,), jnp.float32)
    beta = 0.1 * jax.random.normal(k3, (COUT,), jnp.float32)

    # inputs matching the module's forward signature
    x64 = jax.random.normal(k4, (N, CIN, H, W_SP), jnp.float32)
    x58 = jax.random.normal(k5, (N, CIN, H, W_SP), jnp.float32)

    out = fused_add_conv1x1_bn(x64, x58, conv_w, gamma, beta)
    out = jax.block_until_ready(out)

    ref = _reference(x64, x58, conv_w, gamma, beta)
    assert out.shape == (N, COUT, H, W_SP)
    assert jnp.allclose(out, ref, atol=1e-3, rtol=1e-3)

    print("KERNEL_OK")
</pallas_src>

<mosaic_0001>
module attributes {stable_mosaic.version = 11 : i64} {
  func.func @_fused_kernel(%arg0: memref<64x256xf32, #tpu.memory_space<vmem>>, %arg1: memref<64x784xf32, #tpu.memory_space<vmem>>, %arg2: memref<64x784xf32, #tpu.memory_space<vmem>>, %arg3: memref<1x256xf32, #tpu.memory_space<vmem>>, %arg4: memref<1x256xf32, #tpu.memory_space<vmem>>, %arg5: memref<784x256xf32, #tpu.memory_space<vmem>>) attributes {dimension_semantics = [], scalar_prefetch = 0 : i64, scratch_operands = 0 : i64, tpu.core_type = #tpu.core_type<tc>} {
    %c0 = arith.constant 0 : index
    %c0_0 = arith.constant 0 : index
    %0 = vector.load %arg1[%c0, %c0_0] : memref<64x784xf32, #tpu.memory_space<vmem>>, vector<64x784xf32>
    %c0_1 = arith.constant 0 : index
    %c0_2 = arith.constant 0 : index
    %1 = vector.load %arg2[%c0_1, %c0_2] : memref<64x784xf32, #tpu.memory_space<vmem>>, vector<64x784xf32>
    %2 = arith.addf %0, %1 : vector<64x784xf32>
    %c0_3 = arith.constant 0 : index
    %c0_4 = arith.constant 0 : index
    %3 = vector.load %arg0[%c0_3, %c0_4] : memref<64x256xf32, #tpu.memory_space<vmem>>, vector<64x256xf32>
    %cst = arith.constant dense<0.000000e+00> : vector<784x256xf32>
    %4 = tpu.matmul %2, %3, %cst {dimension_numbers = #tpu.dot_dimension_numbers<[0], [0], [1], [1], [0, 1, 1, 1], [], []>} : vector<64x784xf32>, vector<64x256xf32>, vector<784x256xf32> -> vector<784x256xf32>
    %cst_5 = arith.constant dense<0.000000e+00> : vector<256xf32>
    %5 = vector.multi_reduction <add>, %4, %cst_5 [0] : vector<784x256xf32> to vector<256xf32>
    %6 = vector.shape_cast %5 : vector<256xf32> to vector<1x256xf32>
    %7 = arith.mulf %4, %4 : vector<784x256xf32>
    %cst_6 = arith.constant dense<0.000000e+00> : vector<256xf32>
    %8 = vector.multi_reduction <add>, %7, %cst_6 [0] : vector<784x256xf32> to vector<256xf32>
    %9 = vector.shape_cast %8 : vector<256xf32> to vector<1x256xf32>
    %cst_7 = arith.constant 0.00127551018 : f32
    %10 = vector.broadcast %cst_7 : f32 to vector<1x256xf32>
    %11 = arith.mulf %6, %10 : vector<1x256xf32>
    %cst_8 = arith.constant 0.00127551018 : f32
    %12 = vector.broadcast %cst_8 : f32 to vector<1x256xf32>
    %13 = arith.mulf %9, %12 : vector<1x256xf32>
    %14 = arith.mulf %11, %11 : vector<1x256xf32>
    %15 = arith.subf %13, %14 : vector<1x256xf32>
    %c0_9 = arith.constant 0 : index
    %c0_10 = arith.constant 0 : index
    %16 = vector.load %arg3[%c0_9, %c0_10] : memref<1x256xf32, #tpu.memory_space<vmem>>, vector<1x256xf32>
    %cst_11 = arith.constant 1.000000e-03 : f32
    %17 = vector.broadcast %cst_11 : f32 to vector<1x256xf32>
    %18 = arith.addf %15, %17 : vector<1x256xf32>
    %19 = math.rsqrt %18 : vector<1x256xf32>
    %20 = arith.mulf %16, %19 : vector<1x256xf32>
    %c0_12 = arith.constant 0 : index
    %c0_13 = arith.constant 0 : index
    %21 = vector.load %arg4[%c0_12, %c0_13] : memref<1x256xf32, #tpu.memory_space<vmem>>, vector<1x256xf32>
    %22 = arith.mulf %11, %20 : vector<1x256xf32>
    %23 = arith.subf %21, %22 : vector<1x256xf32>
    %24 = vector.broadcast %20 : vector<1x256xf32> to vector<784x256xf32>
    %25 = arith.mulf %4, %24 : vector<784x256xf32>
    %26 = vector.broadcast %23 : vector<1x256xf32> to vector<784x256xf32>
    %27 = arith.addf %25, %26 : vector<784x256xf32>
    %c0_14 = arith.constant 0 : index
    %c0_15 = arith.constant 0 : index
    %28 = vector.load %arg5[%c0_14, %c0_15] : memref<784x256xf32, #tpu.memory_space<vmem>>, vector<784x256xf32>
    tpu.vector_store %arg5[%c0_14, %c0_15], %27 {strides = array<i32>} : memref<784x256xf32, #tpu.memory_space<vmem>>, vector<784x256xf32>,
    return
  }
}

</mosaic_0001>

<bundles_post_ra>
// kernel: fused_add_conv1x1_bn.1
= control target key start
LH: loop header
LB: loop body
LE: loop exit
PB: predicated region body
PF: predicated region fallthrough
CT: control target
= control target key end

     0   :  { %vm428_vm0 = vcmask 523264   ;;  %vm1987_vm6 = vcmask 1040384   ;;  %s6661_s1 = inlined_call_operand.vmem [shape: f32[64,784], index: 1, kind: input, shape index: {}]   ;;  %s6662_s2 = inlined_call_operand.vmem [shape: f32[64,784], index: 2, kind: input, shape index: {}]   ;;  %s6663_s0 = inlined_call_operand.vmem [shape: f32[64,256], index: 0, kind: input, shape index: {}]   ;;  %s6664_s3 = inlined_call_operand.vmem [shape: f32[1,256], index: 3, kind: input, shape index: {}]   ;;  %s6665_s4 = inlined_call_operand.vmem [shape: f32[1,256], index: 4, kind: input, shape index: {}]   ;;  %s6666_s5 = inlined_call_operand.vmem [shape: f32[784,256], index: 5, kind: output, shape index: {}]  }
   0x1   :  { %v20_v0 = vld [vmem:[%s6661_s1] sm:$0xff]  ;;  %v27_v3 = vld [vmem:[%s6661_s1 + $0x38] sm:$0xff]  ;;  %v34_v6 = vld [vmem:[%s6661_s1 + $0x70] sm:$0xff] }
   0x2   :  { %v76_v1 = vld [vmem:[%s6662_s2] sm:$0xff]  ;;  %v83_v4 = vld [vmem:[%s6662_s2 + $0x38] sm:$0xff]  ;;  %v90_v7 = vld [vmem:[%s6662_s2 + $0x70] sm:$0xff] }
   0x3   :  { %v132_v2 = vadd.f32 %v76_v1, %v20_v0  ;;  %v139_v5 = vadd.f32 %v83_v4, %v27_v3  ;;  %v146_v8 = vadd.f32 %v90_v7, %v34_v6  ;;  %v41_v9 = vld [vmem:[%s6661_s1 + $0xa8] sm:$0xff]  ;;  %v23_v12 = vld [vmem:[%s6661_s1 + $0x18] sm:$0xff]  ;;  %v48_v14 = vld [vmem:[%s6661_s1 + $0xe0] sm:$0xff] }
   0x4   :  { %v97_v10 = vld [vmem:[%s6662_s2 + $0xa8] sm:$0xff]  ;;  %v79_v13 = vld [vmem:[%s6662_s2 + $0x18] sm:$0xff]  ;;  %v104_v15 = vld [vmem:[%s6662_s2 + $0xe0] sm:$0xff] }
   0x5   :  { %204 = vxpose.xlu0.b32.start [1/8] (short) %v132_v2, 128  ;;  %v153_v11 = vadd.f32 %v97_v10, %v41_v9  ;;  %v135_v16 = vadd.f32 %v79_v13, %v23_v12  ;;  %v160_v17 = vadd.f32 %v104_v15, %v48_v14  ;;  %v30_v18 = vld [vmem:[%s6661_s1 + $0x50] sm:$0xff]  ;;  %v55_v21 = vld [vmem:[%s6661_s1 + $0x118] sm:$0xff]  ;;  %v37_v24 = vld [vmem:[%s6661_s1 + $0x88] sm:$0xff] }
   0x6   :  { %v86_v19 = vld [vmem:[%s6662_s2 + $0x50] sm:$0xff]  ;;  %v111_v22 = vld [vmem:[%s6662_s2 + $0x118] sm:$0xff]  ;;  %v93_v25 = vld [vmem:[%s6662_s2 + $0x88] sm:$0xff] }
   0x7   :  { %300 = vxpose.xlu1.b32.start [1/8] (short) %v135_v16, 128  ;;  %v142_v20 = vadd.f32 %v86_v19, %v30_v18  ;;  %v167_v23 = vadd.f32 %v111_v22, %v55_v21  ;;  %v149_v26 = vadd.f32 %v93_v25, %v37_v24  ;;  %v62_v27 = vld [vmem:[%s6661_s1 + $0x150] sm:$0xff]  ;;  %v21_v29 = vld [vmem:[%s6661_s1 + $0x8] sm:$0xff]  ;;  %v44_v32 = vld [vmem:[%s6661_s1 + $0xc0] sm:$0xff] }
   0x8   :  { %v118_v28 = vld [vmem:[%s6662_s2 + $0x150] sm:$0xff]  ;;  %v77_v30 = vld [vmem:[%s6662_s2 + $0x8] sm:$0xff]  ;;  %v100_v33 = vld [vmem:[%s6662_s2 + $0xc0] sm:$0xff] }
   0x9   :  { %v174_v31 = vadd.f32 %v118_v28, %v62_v27  ;;  %v133_v34 = vadd.f32 %v77_v30, %v21_v29  ;;  %v156_v35 = vadd.f32 %v100_v33, %v44_v32  ;;  %v69_v36 = vld [vmem:[%s6661_s1 + $0x188] sm:$0xff]  ;;  %v51_v38 = vld [vmem:[%s6661_s1 + $0xf8] sm:$0xff]  ;;  %v28_v40 = vld [vmem:[%s6661_s1 + $0x40] sm:$0xff] }
   0xa   :  { %v125_v37 = vld [vmem:[%s6662_s2 + $0x188] sm:$0xff]  ;;  %v107_v39 = vld [vmem:[%s6662_s2 + $0xf8] sm:$0xff]  ;;  %v84_v41 = vld [vmem:[%s6662_s2 + $0x40] sm:$0xff] }
   0xb   :  { %236 = vxpose.xlu2.b32.start [1/8] (short) %v133_v34, 128  ;;  %v202_v42 = vld [vmem:[%s6663_s0 + $0x70] sm:$0xff]  ;;  %v181_v43 = vadd.f32 %v125_v37, %v69_v36  ;;  %v140_v44 = vadd.f32 %v84_v41, %v28_v40  ;;  %v203_v45 = vld [vmem:[%s6663_s0 + $0x78] sm:$0xff]  ;;  %v200_v46 = vld [vmem:[%s6663_s0 + $0x60] sm:$0xff]  ;;  %v163_v50 = vadd.f32 %v107_v39, %v51_v38 }
   0xc   :  { %731 = vmatpush.msra.mxu0 %v202_v42  ;;  %v201_v47 = vld [vmem:[%s6663_s0 + $0x68] sm:$0xff]  ;;  %2798 = vmatpush.msra.mxu2 %v202_v42  ;;  %v198_v48 = vld [vmem:[%s6663_s0 + $0x50] sm:$0xff]  ;;  %v199_v49 = vld [vmem:[%s6663_s0 + $0x58] sm:$0xff] }
   0xd   :  { %205 = vxpose.xlu0.b32.cont [2/8] (short) %v139_v5, 128  ;;  %1042 = vmatpush.msra.mxu1 %v203_v45  ;;  %v35_v51 = vld [vmem:[%s6661_s1 + $0x78] sm:$0xff]  ;;  %v196_v53 = vld [vmem:[%s6663_s0 + $0x40] sm:$0xff]  ;;  %v197_v54 = vld [vmem:[%s6663_s0 + $0x48] sm:$0xff] }
   0xe   :  { %2806 = vmatpush.msra.mxu3 %v203_v45  ;;  %732 = vmatpush.msra.mxu0 %v200_v46  ;;  %v91_v52 = vld [vmem:[%s6662_s2 + $0x78] sm:$0xff]  ;;  %v194_v55 = vld [vmem:[%s6663_s0 + $0x30] sm:$0xff]  ;;  %v192_v58 = vld [vmem:[%s6663_s0 + $0x20] sm:$0xff] }
   0xf   :  { %301 = vxpose.xlu1.b32.cont [2/8] (short) %v142_v20, 128  ;;  %1043 = vmatpush.msra.mxu1 %v201_v47  ;;  %v147_v56 = vadd.f32 %v91_v52, %v35_v51  ;;  %v195_v57 = vld [vmem:[%s6663_s0 + $0x38] sm:$0xff]  ;;  %v58_v59 = vld [vmem:[%s6661_s1 + $0x130] sm:$0xff]  ;;  %v193_v61 = vld [vmem:[%s6663_s0 + $0x28] sm:$0xff] }
  0x10   :  { %2799 = vmatpush.msra.mxu2 %v200_v46  ;;  %733 = vmatpush.msra.mxu0 %v198_v48  ;;  %v114_v60 = vld [vmem:[%s6662_s2 + $0x130] sm:$0xff]  ;;  %v191_v63 = vld [vmem:[%s6663_s0 + $0x18] sm:$0xff]  ;;  %v65_v4 = vld [vmem:[%s6661_s1 + $0x168] sm:$0xff] }
  0x11   :  { %1044 = vmatpush.msra.mxu1 %v199_v49  ;;  %2807 = vmatpush.msra.mxu3 %v201_v47  ;;  %v190_v62 = vld [vmem:[%s6663_s0 + $0x10] sm:$0xff]  ;;  %v170_v0 = vadd.f32 %v114_v60, %v58_v59  ;;  %v121_v5 = vld [vmem:[%s6662_s2 + $0x168] sm:$0xff]  ;;  %v72_v7 = vld [vmem:[%s6661_s1 + $0x1a0] sm:$0xff] }
  0x12   :  { %734 = vmatpush.msra.mxu0 %v196_v53  ;;  %2800 = vmatpush.msra.mxu2 %v198_v48  ;;  %v42_v1 = vld [vmem:[%s6661_s1 + $0xb0] sm:$0xff]  ;;  %v177_v6 = vadd.f32 %v121_v5, %v65_v4  ;;  %v188_v10 = vld [vmem:[%s6663_s0] sm:$0xff]  ;;  %v49_v12 = vld [vmem:[%s6661_s1 + $0xe8] sm:$0xff] }
  0x13   :  { %237 = vxpose.xlu2.b32.cont [2/8] (short) %v140_v44, 128  ;;  %1045 = vmatpush.msra.mxu1 %v197_v54  ;;  %v98_v2 = vld [vmem:[%s6662_s2 + $0xb0] sm:$0xff]  ;;  %v105_v13 = vld [vmem:[%s6662_s2 + $0xe8] sm:$0xff]  ;;  %v56_v15 = vld [vmem:[%s6661_s1 + $0x120] sm:$0xff] }
  0x14   :  { %735 = vmatpush.msra.mxu0 %v194_v55  ;;  %2808 = vmatpush.msra.mxu3 %v199_v49  ;;  %v154_v3 = vadd.f32 %v98_v2, %v42_v1  ;;  %v161_v14 = vadd.f32 %v105_v13, %v49_v12  ;;  %v112_v16 = vld [vmem:[%s6662_s2 + $0x120] sm:$0xff]  ;;  %v63_v18 = vld [vmem:[%s6661_s1 + $0x158] sm:$0xff]  ;;  %v70_v21 = vld [vmem:[%s6661_s1 + $0x190] sm:$0xff] }
  0x15   :  { %206 = vxpose.xlu0.b32.cont [3/8] (short) %v146_v8, 128  ;;  %1046 = vmatpush.msra.mxu1 %v195_v57  ;;  %v128_v8 = vld [vmem:[%s6662_s2 + $0x1a0] sm:$0xff]  ;;  %v119_v19 = vld [vmem:[%s6662_s2 + $0x158] sm:$0xff]  ;;  %v126_v22 = vld [vmem:[%s6662_s2 + $0x190] sm:$0xff] }
  0x16   :  { %2801 = vmatpush.msra.mxu2 %v196_v53  ;;  %736 = vmatpush.msra.mxu0 %v192_v58  ;;  %v184_v9 = vadd.f32 %v128_v8, %v72_v7  ;;  %v175_v20 = vadd.f32 %v119_v19, %v63_v18  ;;  %v80_v27 = vld [vmem:[%s6662_s2 + $0x20] sm:$0xff]  ;;  %v31_v30 = vld [vmem:[%s6661_s1 + $0x58] sm:$0xff]  ;;  %v38_v34 = vld [vmem:[%s6661_s1 + $0x90] sm:$0xff] }
  0x17   :  { %302 = vxpose.xlu1.b32.cont [3/8] (short) %v149_v26, 128  ;;  %1047 = vmatpush.msra.mxu1 %v193_v61  ;;  %v24_v26 = vld [vmem:[%s6661_s1 + $0x20] sm:$0xff]  ;;  %v45_v38 = vld [vmem:[%s6661_s1 + $0xc8] sm:$0xff]  ;;  %v59_v47 = vld [vmem:[%s6661_s1 + $0x138] sm:$0xff] }
  0x18   :  { %2809 = vmatpush.msra.mxu3 %v197_v54  ;;  %737 = vmatpush.msra.mxu0 %v190_v62  ;;  %v136_v28 = vadd.f32 %v80_v27, %v24_v26  ;;  %v101_v39 = vld [vmem:[%s6662_s2 + $0xc8] sm:$0xff]  ;;  %v52_v42 = vld [vmem:[%s6661_s1 + $0x100] sm:$0xff]  ;;  %v115_v48 = vld [vmem:[%s6662_s2 + $0x138] sm:$0xff] }
  0x19   :  { %2802 = vmatpush.msra.mxu2 %v194_v55  ;;  %1048 = vmatpush.msra.mxu1 %v191_v63  ;;  %v157_v40 = vadd.f32 %v101_v39, %v45_v38  ;;  %v171_v49 = vadd.f32 %v115_v48, %v59_v47  ;;  %v22_v52 = vld [vmem:[%s6661_s1 + $0x10] sm:$0xff]  ;;  %v29_v60 = vld [vmem:[%s6661_s1 + $0x48] sm:$0xff]  ;;  %v36_v4 = vld [vmem:[%s6661_s1 + $0x80] sm:$0xff] }
  0x1a   :  { %2810 = vmatpush.msra.mxu3 %v195_v57  ;;  %738 = vmatpush.msra.mxu0 %v188_v10  ;;  %v78_v53 = vld [vmem:[%s6662_s2 + $0x10] sm:$0xff]  ;;  %v92_v5 = vld [vmem:[%s6662_s2 + $0x80] sm:$0xff] }
  0x1b   :  { %238 = vxpose.xlu2.b32.cont [3/8] (short) %v147_v56, 128  ;;  %2803 = vmatpush.msra.mxu2 %v192_v58  ;;  %v66_v54 = vld [vmem:[%s6661_s1 + $0x170] sm:$0xff]  ;;  %v134_v55 = vadd.f32 %v78_v53, %v22_v52  ;;  %v64_v26 = vld [vmem:[%s6661_s1 + $0x160] sm:$0xff]  ;;  %v25_v53 = vld [vmem:[%s6661_s1 + $0x28] sm:$0xff] }
  0x1c   :  { %2811 = vmatpush.msra.mxu3 %v193_v61  ;;  %v122_v56 = vld [vmem:[%s6662_s2 + $0x170] sm:$0xff]  ;;  %v85_v61 = vld [vmem:[%s6662_s2 + $0x48] sm:$0xff]  ;;  %v120_v27 = vld [vmem:[%s6662_s2 + $0x160] sm:$0xff] }
  0x1d   :  { %207 = vxpose.xlu0.b32.cont [4/8] (short) %v153_v11, 128  ;;  %2804 = vmatpush.msra.mxu2 %v190_v62  ;;  %v189_v11 = vld [vmem:[%s6663_s0 + $0x8] sm:$0xff]  ;;  %v178_v57 = vadd.f32 %v122_v56, %v66_v54 }
  0x1e   :  { %2812 = vmatpush.msra.mxu3 %v191_v63  ;;  %1049 = vmatpush.msra.mxu1 %v189_v11  ;;  %v73_v62 = vld [vmem:[%s6661_s1 + $0x1a8] sm:$0xff]  ;;  %v141_v63 = vadd.f32 %v85_v61, %v29_v60  ;;  %v88_v60 = vld [vmem:[%s6662_s2 + $0x60] sm:$0xff] }
  0x1f   :  { %303 = vxpose.xlu1.b32.cont [4/8] (short) %v156_v35, 128  ;;  %2805 = vmatpush.msra.mxu2 %v188_v10  ;;  %v94_v35 = vld [vmem:[%s6662_s2 + $0x90] sm:$0xff]  ;;  %v99_v10 = vld [vmem:[%s6662_s2 + $0xb8] sm:$0xff]  ;;  %v81_v54 = vld [vmem:[%s6662_s2 + $0x28] sm:$0xff] }
  0x20   :  { %2813 = vmatpush.msra.mxu3 %v189_v11  ;;  %v150_v36 = vadd.f32 %v94_v35, %v38_v34 }
  0x23   :  { %239 = vxpose.xlu2.b32.cont [4/8] (short) %v154_v3, 128 }
  0x25   :  { %208 = vxpose.xlu0.b32.cont [5/8] (short) %v160_v17, 128  ;;  %v168_v17 = vadd.f32 %v112_v16, %v56_v15  ;;  %v106_v15 = vld [vmem:[%s6662_s2 + $0xf0] sm:$0xff] }
  0x27   :  { %304 = vxpose.xlu1.b32.cont [5/8] (short) %v163_v50, 128 }
  0x2b   :  { %240 = vxpose.xlu2.b32.cont [5/8] (short) %v161_v14, 128  ;;  %v50_v14 = vld [vmem:[%s6661_s1 + $0xf0] sm:$0xff] }
  0x2c   :  { %v162_v16 = vadd.f32 %v106_v15, %v50_v14 }
  0x2d   :  { %209 = vxpose.xlu0.b32.cont [6/8] (short) %v167_v23, 128  ;;  %v182_v23 = vadd.f32 %v126_v22, %v70_v21  ;;  %v113_v21 = vld [vmem:[%s6662_s2 + $0x128] sm:$0xff] }
  0x2f   :  { %305 = vxpose.xlu1.b32.cont [6/8] (short) %v170_v0, 128  ;;  %v129_v0 = vld [vmem:[%s6662_s2 + $0x1a8] sm:$0xff] }
  0x30   :  { %v185_v1 = vadd.f32 %v129_v0, %v73_v62 }
  0x33   :  { %241 = vxpose.xlu2.b32.cont [6/8] (short) %v168_v17, 128 }
  0x35   :  { %210 = vxpose.xlu0.b32.cont [7/8] (short) %v174_v31, 128  ;;  %v87_v31 = vld [vmem:[%s6662_s2 + $0x58] sm:$0xff] }
  0x36   :  { %v143_v32 = vadd.f32 %v87_v31, %v31_v30 }
  0x37   :  { %306 = vxpose.xlu1.b32.cont [7/8] (short) %v177_v6, 128  ;;  %v148_v6 = vadd.f32 %v92_v5, %v36_v4 }
  0x3b   :  { %242 = vxpose.xlu2.b32.cont [7/8] (short) %v175_v20, 128  ;;  %v57_v20 = vld [vmem:[%s6661_s1 + $0x128] sm:$0xff] }
  0x3c   :  { %v169_v22 = vadd.f32 %v113_v21, %v57_v20 }
  0x3d   :  { %211 = vxpose.xlu0.b32.end [8/8] (short) %v181_v43, 128  ;;  %v108_v43 = vld [vmem:[%s6662_s2 + $0x100] sm:$0xff] }
  0x3e   :  { %v164_v44 = vadd.f32 %v108_v43, %v52_v42 }
  0x3f   :  { %307 = vxpose.xlu1.b32.end [8/8] (short) %v184_v9, 128  ;;  %v43_v9 = vld [vmem:[%s6661_s1 + $0xb8] sm:$0xff] }
  0x40   :  { %v155_v11 = vadd.f32 %v99_v10, %v43_v9  ;;  %v46_v9 = vld [vmem:[%s6661_s1 + $0xd0] sm:$0xff] }
  0x41   :  { %v102_v10 = vld [vmem:[%s6662_s2 + $0xd0] sm:$0xff] }
  0x43   :  { %243 = vxpose.xlu2.b32.end [8/8] (short) %v182_v23, 128 }
  0x85   :  { %332 = vxpose.xlu0.b32.start [1/8] (short) %v136_v28, 128  ;;  %v176_v28 = vadd.f32 %v120_v27, %v64_v26 }
  0x87   :  { %268 = vxpose.xlu1.b32.start [1/8] (short) %v134_v55, 128  ;;  %v137_v55 = vadd.f32 %v81_v54, %v25_v53 }
  0x8b   :  { %364 = vxpose.xlu2.b32.start [1/8] (short) %v137_v55, 128 }
  0x8d   :  { %333 = vxpose.xlu0.b32.cont [2/8] (short) %v143_v32, 128  ;;  %v71_v32 = vld [vmem:[%s6661_s1 + $0x198] sm:$0xff] }
  0x8f   :  { %269 = vxpose.xlu1.b32.cont [2/8] (short) %v141_v63, 128 }
  0x95   :  { %334 = vxpose.xlu0.b32.cont [3/8] (short) %v150_v36, 128 }
  0x97   :  { %270 = vxpose.xlu1.b32.cont [3/8] (short) %v148_v6, 128 }
  0x9d   :  { %335 = vxpose.xlu0.b32.cont [4/8] (short) %v157_v40, 128 }
  0x9f   :  { %271 = vxpose.xlu1.b32.cont [4/8] (short) %v155_v11, 128  ;;  %v158_v11 = vadd.f32 %v102_v10, %v46_v9 }
  0xa4   :  { %v252_v17 = vpop.trf.xlu2 }
  0xa5   :  { %336 = vxpose.xlu0.b32.cont [5/8] (short) %v164_v44, 128 }
  0xa7   :  { %272 = vxpose.xlu1.b32.cont [5/8] (short) %v162_v16, 128  ;;  %v53_v16 = vld [vmem:[%s6661_s1 + $0x108] sm:$0xff] }
  0xa9   :  { %v220_v24 = vpop.trf.xlu0 }
  0xaa   :  { %2602 = vmatmul.msk.f32.vlgmr.msra.gmra.mxu0 %vm428_vm0, %v220_v24  ;;  %2700 = vmatmul.msk.f32.vlgmr.msra.gmra.mxu1 %vm428_vm0, %v220_v24 }
  0xab   :  { %v3085_v46 = vpop.trf.xlu1 }
  0xac   :  { %v253_v24 = vpop.trf.xlu2 }
  0xad   :  { %337 = vxpose.xlu0.b32.cont [6/8] (short) %v171_v49, 128 }
  0xaf   :  { %273 = vxpose.xlu1.b32.cont [6/8] (short) %v169_v22, 128 }
  0xb1   :  { %v221_v25 = vpop.trf.xlu0 }
  0xb2   :  { %2603 = vmatmul.msk.f32.gmra.mxu0 %vm428_vm0, %v221_v25  ;;  %2701 = vmatmul.msk.f32.gmra.mxu1 %vm428_vm0, %v221_v25 }
  0xb3   :  { %v317_v51 = vpop.trf.xlu1 }
  0xb4   :  { %2651 = vmatmul.msk.f32.vlgmr.msra.gmra.mxu2 %vm428_vm0, %v317_v51  ;;  %2749 = vmatmul.msk.f32.vlgmr.msra.gmra.mxu3 %vm428_vm0, %v317_v51  ;;  %v254_v30 = vpop.trf.xlu2 }
  0xb5   :  { %338 = vxpose.xlu0.b32.cont [7/8] (short) %v178_v57, 128 }
  0xb7   :  { %274 = vxpose.xlu1.b32.cont [7/8] (short) %v176_v28, 128 }
  0xb9   :  { %v222_v29 = vpop.trf.xlu0 }
  0xba   :  { %2604 = vmatmul.msk.f32.gmra.mxu0 %vm428_vm0, %v222_v29  ;;  %2702 = vmatmul.msk.f32.gmra.mxu1 %vm428_vm0, %v222_v29 }
  0xbb   :  { %v318_v59 = vpop.trf.xlu1 }
  0xbc   :  { %2652 = vmatmul.msk.f32.gmra.mxu2 %vm428_vm0, %v318_v59  ;;  %2750 = vmatmul.msk.f32.gmra.mxu3 %vm428_vm0, %v318_v59  ;;  %v255_v36 = vpop.trf.xlu2  ;;  %v32_v59 = vld [vmem:[%s6661_s1 + $0x60] sm:$0xff] }
  0xbd   :  { %339 = vxpose.xlu0.b32.end [8/8] (short) %v185_v1, 128  ;;  %v144_v62 = vadd.f32 %v88_v60, %v32_v59 }
  0xbf   :  { %365 = vxpose.xlu2.b32.cont [2/8] (short) %v144_v62, 128 }
  0xc1   :  { %v223_v33 = vpop.trf.xlu0 }
  0xc2   :  { %2605 = vmatmul.msk.f32.gmra.mxu0 %vm428_vm0, %v223_v33  ;;  %2703 = vmatmul.msk.f32.gmra.mxu1 %vm428_vm0, %v223_v33  ;;  %v127_v33 = vld [vmem:[%s6662_s2 + $0x198] sm:$0xff] }
  0xc3   :  { %v319_v3 = vpop.trf.xlu1  ;;  %v183_v34 = vadd.f32 %v127_v33, %v71_v32  ;;  %v67_v32 = vld [vmem:[%s6661_s1 + $0x178] sm:$0xff] }
  0xc4   :  { %2653 = vmatmul.msk.f32.gmra.mxu2 %vm428_vm0, %v319_v3  ;;  %2751 = vmatmul.msk.f32.gmra.mxu3 %vm428_vm0, %v319_v3  ;;  %v95_v3 = vld [vmem:[%s6662_s2 + $0x98] sm:$0xff] }
  0xc5   :  { %275 = vxpose.xlu1.b32.end [8/8] (short) %v183_v34, 128  ;;  %v123_v33 = vld [vmem:[%s6662_s2 + $0x178] sm:$0xff] }
  0xc9   :  { %v224_v37 = vpop.trf.xlu0 }
  0xca   :  { %2606 = vmatmul.msk.f32.gmra.mxu0 %vm428_vm0, %v224_v37  ;;  %2704 = vmatmul.msk.f32.gmra.mxu1 %vm428_vm0, %v224_v37 }
  0xcb   :  { %v320_v8 = vpop.trf.xlu1 }
  0xcc   :  { %2654 = vmatmul.msk.f32.gmra.mxu2 %vm428_vm0, %v320_v8  ;;  %2752 = vmatmul.msk.f32.gmra.mxu3 %vm428_vm0, %v320_v8 }
  0xd1   :  { %v225_v41 = vpop.trf.xlu0 }
  0xd2   :  { %2607 = vmatmul.msk.f32.gmra.mxu0 %vm428_vm0, %v225_v41  ;;  %2705 = vmatmul.msk.f32.gmra.mxu1 %vm428_vm0, %v225_v41  ;;  %v256_v41 = vpop.trf.xlu2 }
  0xd3   :  { %v321_v13 = vpop.trf.xlu1 }
  0xd4   :  { %2655 = vmatmul.msk.f32.gmra.mxu2 %vm428_vm0, %v321_v13  ;;  %2753 = vmatmul.msk.f32.gmra.mxu3 %vm428_vm0, %v321_v13 }
  0xd9   :  { %v226_v45 = vpop.trf.xlu0 }
  0xda   :  { %2608 = vmatmul.msk.f32.gmra.mxu0 %vm428_vm0, %v226_v45  ;;  %2706 = vmatmul.msk.f32.gmra.mxu1 %vm428_vm0, %v226_v45  ;;  %v257_v45 = vpop.trf.xlu2 }
  0xdb   :  { %v322_v19 = vpop.trf.xlu1 }
  0xdc   :  { %2656 = vmatmul.msk.f32.gmra.mxu2 %vm428_vm0, %v322_v19  ;;  %2754 = vmatmul.msk.f32.gmra.mxu3 %vm428_vm0, %v322_v19 }
  0xe1   :  { %v227_v50 = vpop.trf.xlu0 }
  0xe2   :  { %2609 = vmatmul.msk.f32.gmra.mxu0 %vm428_vm0, %v227_v50  ;;  %2707 = vmatmul.msk.f32.gmra.mxu1 %vm428_vm0, %v227_v50  ;;  %v258_v52 = vpop.trf.xlu2 }
  0xe3   :  { %v323_v25 = vpop.trf.xlu1 }
  0xe4   :  { %2657 = vmatmul.msk.f32.gmra.mxu2 %vm428_vm0, %v323_v25  ;;  %2755 = vmatmul.msk.f32.gmra.mxu3 %vm428_vm0, %v323_v25  ;;  %v116_v25 = vld [vmem:[%s6662_s2 + $0x140] sm:$0xff] }
  0xe9   :  { %v228_v58 = vpop.trf.xlu0 }
  0xea   :  { %2610 = vmatmul.msk.f32.gmra.mxu0 %vm428_vm0, %v228_v58  ;;  %2708 = vmatmul.msk.f32.gmra.mxu1 %vm428_vm0, %v228_v58  ;;  %v259_v61 = vpop.trf.xlu2 }
  0xeb   :  { %v324_v31 = vpop.trf.xlu1 }
  0xec   :  { %2658 = vmatmul.msk.f32.gmra.mxu2 %vm428_vm0, %v324_v31  ;;  %2756 = vmatmul.msk.f32.gmra.mxu3 %vm428_vm0, %v324_v31 }
  0xf1   :  { %v229_v2 = vpop.trf.xlu0 }
  0xf2   :  { %2611 = vmatmul.msk.f32.gmra.mxu0 %vm428_vm0, %v229_v2  ;;  %2709 = vmatmul.msk.f32.gmra.mxu1 %vm428_vm0, %v229_v2  ;;  %v39_v2 = vld [vmem:[%s6661_s1 + $0x98] sm:$0xff]  ;;  %v260_v6 = vpop.trf.xlu2 }
  0xf3   :  { %v325_v37 = vpop.trf.xlu1  ;;  %v151_v4 = vadd.f32 %v95_v3, %v39_v2 }
  0xf4   :  { %2659 = vmatmul.msk.f32.gmra.mxu2 %vm428_vm0, %v325_v37  ;;  %2757 = vmatmul.msk.f32.gmra.mxu3 %vm428_vm0, %v325_v37 }
  0xf5   :  { %366 = vxpose.xlu2.b32.cont [3/8] (short) %v151_v4, 128 }
  0xf9   :  { %v230_v7 = vpop.trf.xlu0 }
  0xfa   :  { %2612 = vmatmul.msk.f32.gmra.mxu0 %vm428_vm0, %v230_v7  ;;  %2710 = vmatmul.msk.f32.gmra.mxu1 %vm428_vm0, %v230_v7  ;;  %v261_v13 = vpop.trf.xlu2 }
  0xfb   :  { %v326_v40 = vpop.trf.xlu1 }
  0xfc   :  { %2660 = vmatmul.msk.f32.gmra.mxu2 %vm428_vm0, %v326_v40  ;;  %2758 = vmatmul.msk.f32.gmra.mxu3 %vm428_vm0, %v326_v40 }
  0xfd   :  { %367 = vxpose.xlu2.b32.cont [4/8] (short) %v158_v11, 128 }
 0x101   :  { %v231_v12 = vpop.trf.xlu0 }
 0x102   :  { %2613 = vmatmul.msk.f32.gmra.mxu0 %vm428_vm0, %v231_v12  ;;  %2711 = vmatmul.msk.f32.gmra.mxu1 %vm428_vm0, %v231_v12  ;;  %v262_v22 = vpop.trf.xlu2 }
 0x103   :  { %v327_v44 = vpop.trf.xlu1 }
 0x104   :  { %2661 = vmatmul.msk.f32.gmra.mxu2 %vm428_vm0, %v327_v44  ;;  %2759 = vmatmul.msk.f32.gmra.mxu3 %vm428_vm0, %v327_v44 }
 0x109   :  { %v232_v18 = vpop.trf.xlu0 }
 0x10a   :  { %2614 = vmatmul.msk.f32.gmra.mxu0 %vm428_vm0, %v232_v18  ;;  %2712 = vmatmul.msk.f32.gmra.mxu1 %vm428_vm0, %v232_v18  ;;  %v263_v37 = vpop.trf.xlu2 }
 0x10b   :  { %v328_v49 = vpop.trf.xlu1 }
 0x10c   :  { %2662 = vmatmul.msk.f32.gmra.mxu2 %vm428_vm0, %v328_v49  ;;  %2760 = vmatmul.msk.f32.gmra.mxu3 %vm428_vm0, %v328_v49  ;;  %v130_v49 = vld [vmem:[%s6662_s2 + $0x1b0] sm:$0xff] }
 0x111   :  { %v233_v23 = vpop.trf.xlu0 }
 0x112   :  { %2615 = vmatmul.msk.f32.gmra.mxu0 %vm428_vm0, %v233_v23  ;;  %2713 = vmatmul.msk.f32.gmra.mxu1 %vm428_vm0, %v233_v23  ;;  %v264_v55 = vpop.trf.xlu2 }
 0x113   :  { %v329_v56 = vpop.trf.xlu1 }
 0x114   :  { %2663 = vmatmul.msk.f32.gmra.mxu2 %vm428_vm0, %v329_v56  ;;  %2761 = vmatmul.msk.f32.gmra.mxu3 %vm428_vm0, %v329_v56 }
 0x119   :  { %v234_v29 = vpop.trf.xlu0 }
 0x11a   :  { %2616 = vmatmul.msk.f32.gmra.mxu0 %vm428_vm0, %v234_v29  ;;  %2714 = vmatmul.msk.f32.gmra.mxu1 %vm428_vm0, %v234_v29  ;;  %v265_v3 = vpop.trf.xlu2 }
 0x11b   :  { %v330_v63 = vpop.trf.xlu1 }
 0x11c   :  { %2664 = vmatmul.msk.f32.gmra.mxu2 %vm428_vm0, %v330_v63  ;;  %2762 = vmatmul.msk.f32.gmra.mxu3 %vm428_vm0, %v330_v63 }
 0x121   :  { %v235_v35 = vpop.trf.xlu0 }
 0x122   :  { %2617 = vmatmul.msk.f32.gmra.mxu0 %vm428_vm0, %v235_v35  ;;  %2715 = vmatmul.msk.f32.gmra.mxu1 %vm428_vm0, %v235_v35 }
 0x123   :  { %v331_v5 = vpop.trf.xlu1 }
 0x124   :  { %2665 = vmatmul.msk.f32.gmra.mxu2 %vm428_vm0, %v331_v5  ;;  %2763 = vmatmul.msk.f32.gmra.mxu3 %vm428_vm0, %v331_v5 }
 0x127   :  { %v3189_v38 = vpop.f32.mrf.mxu0  ;;  %v3191_v39 = vpop.f32.mrf.mxu1 }
 0x128   :  { %6913 = vst [vmem:[#allocation2_spill] sm:$0xff] %v3189_v38 }
 0x129   :  { %6914 = vst [vmem:[#allocation3_spill] sm:$0xff] %v3191_v39  ;;  %v348_v12 = vpop.trf.xlu0 }
 0x12a   :  { %2618 = vmatmul.msk.f32.gmra.mxu0 %vm428_vm0, %v252_v17  ;;  %2716 = vmatmul.msk.f32.gmra.mxu1 %vm428_vm0, %v252_v17  ;;  %v109_v17 = vld [vmem:[%s6662_s2 + $0x108] sm:$0xff] }
 0x12b   :  { %v165_v18 = vadd.f32 %v109_v17, %v53_v16 }
 0x12c   :  { %2666 = vmatmul.msk.f32.gmra.mxu2 %vm428_vm0, %v348_v12  ;;  %2764 = vmatmul.msk.f32.gmra.mxu3 %vm428_vm0, %v348_v12 }
 0x12d   :  { %368 = vxpose.xlu2.b32.cont [5/8] (short) %v165_v18, 128  ;;  %v266_v18 = vpop.trf.xlu2 }
 0x12f   :  { %v3197_v42 = vpop.f32.mrf.mxu0  ;;  %v3199_v43 = vpop.f32.mrf.mxu1 }
 0x130   :  { %6915 = vst [vmem:[#allocation4_spill] sm:$0xff] %v3197_v42 }
 0x131   :  { %6916 = vst [vmem:[#allocation5_spill] sm:$0xff] %v3199_v43  ;;  %v349_v19 = vpop.trf.xlu0  ;;  %v284_v4 = vpop.trf.xlu1 }
 0x132   :  { %2619 = vmatmul.msk.f32.gmra.mxu0 %vm428_vm0, %v253_v24  ;;  %2717 = vmatmul.msk.f32.gmra.mxu1 %vm428_vm0, %v253_v24  ;;  %v60_v24 = vld [vmem:[%s6661_s1 + $0x140] sm:$0xff] }
 0x133   :  { %v172_v28 = vadd.f32 %v116_v25, %v60_v24 }
 0x134   :  { %2667 = vmatmul.msk.f32.gmra.mxu2 %vm428_vm0, %v349_v19  ;;  %2765 = vmatmul.msk.f32.gmra.mxu3 %vm428_vm0, %v349_v19 }
 0x135   :  { %369 = vxpose.xlu2.b32.cont [6/8] (short) %v172_v28, 128 }
 0x137   :  { %v3205_v47 = vpop.f32.mrf.mxu0  ;;  %v3207_v48 = vpop.f32.mrf.mxu1 }
 0x138   :  { %v3287_v23 = vpop.f32.mrf.mxu2  ;;  %v3297_v26 = vpop.f32.mrf.mxu3 }
 0x139   :  { %6924 = vst [vmem:[#allocation13_spill] sm:$0xff] %v3287_v23  ;;  %v350_v27 = vpop.trf.xlu0  ;;  %v285_v12 = vpop.trf.xlu1 }
 0x13a   :  { %2620 = vmatmul.msk.f32.gmra.mxu0 %vm428_vm0, %v254_v30  ;;  %2718 = vmatmul.msk.f32.gmra.mxu1 %vm428_vm0, %v254_v30  ;;  %6925 = vst [vmem:[#allocation14_spill] sm:$0xff] %v3297_v26 }
 0x13c   :  { %2668 = vmatmul.msk.f32.gmra.mxu2 %vm428_vm0, %v350_v27  ;;  %2766 = vmatmul.msk.f32.gmra.mxu3 %vm428_vm0, %v350_v27 }
 0x13f   :  { %v3213_v50 = vpop.f32.mrf.mxu0  ;;  %v3215_v51 = vpop.f32.mrf.mxu1 }
 0x140   :  { %6917 = vst [vmem:[#allocation6_spill] sm:$0xff] %v3213_v50  ;;  %v3305_v31 = vpop.f32.mrf.mxu2  ;;  %v3315_v34 = vpop.f32.mrf.mxu3 }
 0x141   :  { %6918 = vst [vmem:[#allocation7_spill] sm:$0xff] %v3215_v51  ;;  %v351_v35 = vpop.trf.xlu0  ;;  %v286_v24 = vpop.trf.xlu1 }
 0x142   :  { %2621 = vmatmul.msk.f32.gmra.mxu0 %vm428_vm0, %v255_v36  ;;  %2719 = vmatmul.msk.f32.gmra.mxu1 %vm428_vm0, %v255_v36  ;;  %6928 = vst [vmem:[#allocation17_spill] sm:$0xff] %v3305_v31  ;;  %v179_v36 = vadd.f32 %v123_v33, %v67_v32  ;;  %v267_v32 = vpop.trf.xlu2  ;;  %v75_v31 = vld [vmem:[%s6661_s1 + $0x1b8] sm:$0xff] }
 0x143   :  { %6929 = vst [vmem:[#allocation18_spill] sm:$0xff] %v3315_v34 }
 0x144   :  { %2669 = vmatmul.msk.f32.gmra.mxu2 %vm428_vm0, %v351_v35  ;;  %2767 = vmatmul.msk.f32.gmra.mxu3 %vm428_vm0, %v351_v35 }
 0x145   :  { %370 = vxpose.xlu2.b32.cont [7/8] (short) %v179_v36, 128 }
 0x147   :  { %v3227_v57 = vpop.f32.mrf.mxu0  ;;  %v3229_v58 = vpop.f32.mrf.mxu1 }
 0x148   :  { %v3323_v44 = vpop.f32.mrf.mxu2 }
 0x149   :  { %6932 = vst [vmem:[#allocation21_spill] sm:$0xff] %v3323_v44  ;;  %v352_v53 = vpop.trf.xlu0  ;;  %v68_v44 = vld [vmem:[%s6661_s1 + $0x180] sm:$0xff] }
 0x14a   :  { %2622 = vmatmul.msk.f32.gmra.mxu0 %vm428_vm0, %v256_v41  ;;  %2720 = vmatmul.msk.f32.gmra.mxu1 %vm428_vm0, %v256_v41 }
 0x14c   :  { %2670 = vmatmul.msk.f32.gmra.mxu2 %vm428_vm0, %v352_v53  ;;  %2768 = vmatmul.msk.f32.gmra.mxu3 %vm428_vm0, %v352_v53 }
 0x14f   :  { %v3241_v0 = vpop.f32.mrf.mxu0  ;;  %v3243_v1 = vpop.f32.mrf.mxu1 }
 0x150   :  { %6919 = vst [vmem:[#allocation8_spill] sm:$0xff] %v3241_v0  ;;  %v3341_v60 = vpop.f32.mrf.mxu2 }
 0x151   :  { %6920 = vst [vmem:[#allocation9_spill] sm:$0xff] %v3243_v1  ;;  %v353_v62 = vpop.trf.xlu0 }
 0x152   :  { %2623 = vmatmul.msk.f32.gmra.mxu0 %vm428_vm0, %v257_v45  ;;  %2721 = vmatmul.msk.f32.gmra.mxu1 %vm428_vm0, %v257_v45  ;;  %v74_v45 = vld [vmem:[%s6661_s1 + $0x1b0] sm:$0xff]  ;;  %6936 = vst [vmem:[#allocation25_spill] sm:$0xff] %v3341_v60  ;;  %v117_v60 = vld [vmem:[%s6662_s2 + $0x148] sm:$0xff] }
 0x153   :  { %v186_v54 = vadd.f32 %v130_v49, %v74_v45  ;;  %v287_v49 = vpop.trf.xlu1 }
 0x154   :  { %2671 = vmatmul.msk.f32.gmra.mxu2 %vm428_vm0, %v353_v62  ;;  %2769 = vmatmul.msk.f32.gmra.mxu3 %vm428_vm0, %v353_v62 }
 0x155   :  { %371 = vxpose.xlu2.b32.end [8/8] (short) %v186_v54, 128 }
 0x157   :  { %v3255_v7 = vpop.f32.mrf.mxu0  ;;  %v3257_v8 = vpop.f32.mrf.mxu1 }
 0x158   :  { %v3353_v5 = vpop.f32.mrf.mxu2 }
 0x159   :  { %6940 = vst [vmem:[#allocation29_spill] sm:$0xff] %v3353_v5  ;;  %v354_v9 = vpop.trf.xlu0 }
 0x15a   :  { %2624 = vmatmul.msk.f32.gmra.mxu0 %vm428_vm0, %v258_v52  ;;  %2722 = vmatmul.msk.f32.gmra.mxu1 %vm428_vm0, %v258_v52  ;;  %v3333_v52 = vpop.f32.mrf.mxu3 }
 0x15b   :  { %6933 = vst [vmem:[#allocation22_spill] sm:$0xff] %v3333_v52 }
 0x15c   :  { %2672 = vmatmul.msk.f32.gmra.mxu2 %vm428_vm0, %v354_v9  ;;  %2770 = vmatmul.msk.f32.gmra.mxu3 %vm428_vm0, %v354_v9  ;;  %v288_v9 = vpop.trf.xlu1 }
 0x15f   :  { %v3269_v14 = vpop.f32.mrf.mxu0  ;;  %v3271_v15 = vpop.f32.mrf.mxu1 }
 0x160   :  { %6921 = vst [vmem:[#allocation10_spill] sm:$0xff] %v3269_v14 }
 0x161   :  { %6922 = vst [vmem:[#allocation11_spill] sm:$0xff] %v3271_v15  ;;  %v355_v17 = vpop.trf.xlu0 }
 0x162   :  { %2625 = vmatmul.msk.f32.gmra.mxu0 %vm428_vm0, %v259_v61  ;;  %2723 = vmatmul.msk.f32.gmra.mxu1 %vm428_vm0, %v259_v61  ;;  %v3345_v61 = vpop.f32.mrf.mxu3 }
 0x163   :  { %6937 = vst [vmem:[#allocation26_spill] sm:$0xff] %v3345_v61  ;;  %v61_v61 = vld [vmem:[%s6661_s1 + $0x148] sm:$0xff] }
 0x164   :  { %2673 = vmatmul.msk.f32.gmra.mxu2 %vm428_vm0, %v355_v17  ;;  %2771 = vmatmul.msk.f32.gmra.mxu3 %vm428_vm0, %v355_v17 }
 0x167   :  { %v3283_v20 = vpop.f32.mrf.mxu0  ;;  %v3285_v21 = vpop.f32.mrf.mxu1 }
 0x168   :  { %6923 = vst [vmem:[#allocation12_spill] sm:$0xff] %v3285_v21 }
 0x169   :  { %v356_v28 = vpop.trf.xlu0 }
 0x16a   :  { %2626 = vmatmul.msk.f32.gmra.mxu0 %vm428_vm0, %v260_v6  ;;  %2724 = vmatmul.msk.f32.gmra.mxu1 %vm428_vm0, %v260_v6  ;;  %v3357_v6 = vpop.f32.mrf.mxu3 }
 0x16b   :  { %6941 = vst [vmem:[#allocation30_spill] sm:$0xff] %v3357_v6  ;;  %v54_v6 = vld [vmem:[%s6661_s1 + $0x110] sm:$0xff] }
 0x16c   :  { %2674 = vmatmul.msk.f32.gmra.mxu2 %vm428_vm0, %v356_v28  ;;  %2772 = vmatmul.msk.f32.gmra.mxu3 %vm428_vm0, %v356_v28 }
 0x16f   :  { %v3301_v29 = vpop.f32.mrf.mxu0  ;;  %v3303_v30 = vpop.f32.mrf.mxu1 }
 0x170   :  { %6926 = vst [vmem:[#allocation15_spill] sm:$0xff] %v3301_v29 }
 0x171   :  { %6927 = vst [vmem:[#allocation16_spill] sm:$0xff] %v3303_v30  ;;  %v357_v45 = vpop.trf.xlu0 }
 0x172   :  { %2627 = vmatmul.msk.f32.gmra.mxu0 %vm428_vm0, %v261_v13  ;;  %2725 = vmatmul.msk.f32.gmra.mxu1 %vm428_vm0, %v261_v13  ;;  %v3365_v13 = vpop.f32.mrf.mxu2  ;;  %v3369_v16 = vpop.f32.mrf.mxu3 }
 0x173   :  { %6944 = vst [vmem:[#allocation33_spill] sm:$0xff] %v3365_v13  ;;  %v47_v13 = vld [vmem:[%s6661_s1 + $0xd8] sm:$0xff] }
 0x174   :  { %6945 = vst [vmem:[#allocation34_spill] sm:$0xff] %v3369_v16  ;;  %2675 = vmatmul.msk.f32.gmra.mxu2 %vm428_vm0, %v357_v45  ;;  %2773 = vmatmul.msk.f32.gmra.mxu3 %vm428_vm0, %v357_v45  ;;  %v26_v45 = vld [vmem:[%s6661_s1 + $0x30] sm:$0xff] }
 0x177   :  { %v3319_v40 = vpop.f32.mrf.mxu0  ;;  %v3321_v41 = vpop.f32.mrf.mxu1 }
 0x178   :  { %6930 = vst [vmem:[#allocation19_spill] sm:$0xff] %v3319_v40 }
 0x179   :  { %6931 = vst [vmem:[#allocation20_spill] sm:$0xff] %v3321_v41 }
 0x17a   :  { %2628 = vmatmul.msk.f32.gmra.mxu0 %vm428_vm0, %v262_v22  ;;  %2726 = vmatmul.msk.f32.gmra.mxu1 %vm428_vm0, %v262_v22  ;;  %v3377_v25 = vpop.f32.mrf.mxu2  ;;  %v3381_v27 = vpop.f32.mrf.mxu3 }
 0x17b   :  { %6948 = vst [vmem:[#allocation37_spill] sm:$0xff] %v3377_v25  ;;  %v40_v25 = vld [vmem:[%s6661_s1 + $0xa0] sm:$0xff] }
 0x17c   :  { %6949 = vst [vmem:[#allocation38_spill] sm:$0xff] %v3381_v27 }
 0x17f   :  { %v3337_v56 = vpop.f32.mrf.mxu0  ;;  %v3339_v59 = vpop.f32.mrf.mxu1 }
 0x180   :  { %6934 = vst [vmem:[#allocation23_spill] sm:$0xff] %v3337_v56 }
 0x181   :  { %6935 = vst [vmem:[#allocation24_spill] sm:$0xff] %v3339_v59 }
 0x182   :  { %2629 = vmatmul.msk.f32.gmra.mxu0 %vm428_vm0, %v263_v37  ;;  %2727 = vmatmul.msk.f32.gmra.mxu1 %vm428_vm0, %v263_v37  ;;  %v3389_v36 = vpop.f32.mrf.mxu2  ;;  %v3393_v37 = vpop.f32.mrf.mxu3 }
 0x183   :  { %6952 = vst [vmem:[#allocation41_spill] sm:$0xff] %v3389_v36  ;;  %v33_v36 = vld [vmem:[%s6661_s1 + $0x68] sm:$0xff] }
 0x184   :  { %6953 = vst [vmem:[#allocation42_spill] sm:$0xff] %v3393_v37 }
 0x187   :  { %v3349_v63 = vpop.f32.mrf.mxu0  ;;  %v3351_v2 = vpop.f32.mrf.mxu1 }
 0x188   :  { %6938 = vst [vmem:[#allocation27_spill] sm:$0xff] %v3349_v63 }
 0x189   :  { %6939 = vst [vmem:[#allocation28_spill] sm:$0xff] %v3351_v2 }
 0x18a   :  { %2630 = vmatmul.msk.f32.gmra.mxu0 %vm428_vm0, %v264_v55  ;;  %2728 = vmatmul.msk.f32.gmra.mxu1 %vm428_vm0, %v264_v55  ;;  %v3401_v55 = vpop.f32.mrf.mxu2  ;;  %v3405_v62 = vpop.f32.mrf.mxu3 }
 0x18b   :  { %6956 = vst [vmem:[#allocation45_spill] sm:$0xff] %v3401_v55  ;;  %v289_v55 = vpop.trf.xlu1 }
 0x18c   :  { %6957 = vst [vmem:[#allocation46_spill] sm:$0xff] %v3405_v62 }
 0x18f   :  { %v3361_v10 = vpop.f32.mrf.mxu0  ;;  %v3363_v11 = vpop.f32.mrf.mxu1 }
 0x190   :  { %6942 = vst [vmem:[#allocation31_spill] sm:$0xff] %v3361_v10 }
 0x191   :  { %6943 = vst [vmem:[#allocation32_spill] sm:$0xff] %v3363_v11 }
 0x192   :  { %2631 = vmatmul.msk.f32.gmra.mxu0 %vm428_vm0, %v265_v3  ;;  %2729 = vmatmul.msk.f32.gmra.mxu1 %vm428_vm0, %v265_v3  ;;  %v358_v3 = vpop.trf.xlu0  ;;  %v3413_v28 = vpop.f32.mrf.mxu2 }
 0x193   :  { %2676 = vmatmul.msk.f32.gmra.mxu2 %vm428_vm0, %v358_v3  ;;  %2774 = vmatmul.msk.f32.gmra.mxu3 %vm428_vm0, %v358_v3  ;;  %6960 = vst [vmem:[#allocation49_spill] sm:$0xff] %v3413_v28  ;;  %v82_v3 = vld [vmem:[%s6662_s2 + $0x30] sm:$0xff]  ;;  %v290_v27 = vpop.trf.xlu1 }
 0x197   :  { %v3373_v19 = vpop.f32.mrf.mxu0  ;;  %v3375_v22 = vpop.f32.mrf.mxu1 }
 0x198   :  { %6946 = vst [vmem:[#allocation35_spill] sm:$0xff] %v3373_v19 }
 0x199   :  { %6947 = vst [vmem:[#allocation36_spill] sm:$0xff] %v3375_v22 }
 0x19a   :  { %2632 = vmatmul.msk.f32.gmra.mxu0 %vm428_vm0, %v266_v18  ;;  %2730 = vmatmul.msk.f32.gmra.mxu1 %vm428_vm0, %v266_v18 }
 0x19b   :  { %v291_v16 = vpop.trf.xlu1 }
 0x19f   :  { %v3385_v33 = vpop.f32.mrf.mxu0  ;;  %v3387_v35 = vpop.f32.mrf.mxu1 }
 0x1a0   :  { %6950 = vst [vmem:[#allocation39_spill] sm:$0xff] %v3385_v33 }
 0x1a1   :  { %6951 = vst [vmem:[#allocation40_spill] sm:$0xff] %v3387_v35 }
 0x1a2   :  { %2633 = vmatmul.msk.f32.gmra.mxu0 %vm428_vm0, %v267_v32  ;;  %2731 = vmatmul.msk.f32.gmra.mxu1 %vm428_vm0, %v267_v32  ;;  %v3417_v32 = vpop.f32.mrf.mxu3 }
 0x1a3   :  { %6961 = vst [vmem:[#allocation50_spill] sm:$0xff] %v3417_v32  ;;  %v3431_v32 = vpop.f32.mrf.mxu2 }
 0x1a4   :  { %6964 = vst [vmem:[#allocation53_spill] sm:$0xff] %v3431_v32 }
 0x1a7   :  { %v3397_v53 = vpop.f32.mrf.mxu0  ;;  %v3399_v54 = vpop.f32.mrf.mxu1 }
 0x1a8   :  { %6954 = vst [vmem:[#allocation43_spill] sm:$0xff] %v3397_v53 }
 0x1a9   :  { %6955 = vst [vmem:[#allocation44_spill] sm:$0xff] %v3399_v54 }
 0x1aa   :  { %2634 = vmatmul.msk.f32.gmra.mxu0 %vm428_vm0, %v284_v4  ;;  %2732 = vmatmul.msk.f32.gmra.mxu1 %vm428_vm0, %v284_v4  ;;  %v359_v4 = vpop.trf.xlu0 }
 0x1ab   :  { %2677 = vmatmul.msk.f32.gmra.mxu2 %vm428_vm0, %v359_v4  ;;  %2775 = vmatmul.msk.f32.gmra.mxu3 %vm428_vm0, %v359_v4  ;;  %v3435_v4 = vpop.f32.mrf.mxu3 }
 0x1ac   :  { %6965 = vst [vmem:[#allocation54_spill] sm:$0xff] %v3435_v4  ;;  %v3449_v4 = vpop.f32.mrf.mxu2 }
 0x1ad   :  { %6968 = vst [vmem:[#allocation57_spill] sm:$0xff] %v3449_v4 }
 0x1af   :  { %v3409_v17 = vpop.f32.mrf.mxu0  ;;  %v3411_v18 = vpop.f32.mrf.mxu1 }
 0x1b0   :  { %6958 = vst [vmem:[#allocation47_spill] sm:$0xff] %v3409_v17 }
 0x1b1   :  { %6959 = vst [vmem:[#allocation48_spill] sm:$0xff] %v3411_v18 }
 0x1b2   :  { %2635 = vmatmul.msk.f32.gmra.mxu0 %vm428_vm0, %v285_v12  ;;  %2733 = vmatmul.msk.f32.gmra.mxu1 %vm428_vm0, %v285_v12  ;;  %v138_v12 = vadd.f32 %v82_v3, %v26_v45  ;;  %v360_v37 = vpop.trf.xlu0  ;;  %v89_v45 = vld [vmem:[%s6662_s2 + $0x68] sm:$0xff] }
 0x1b3   :  { %2678 = vmatmul.msk.f32.gmra.mxu2 %vm428_vm0, %v360_v37  ;;  %2776 = vmatmul.msk.f32.gmra.mxu3 %vm428_vm0, %v360_v37  ;;  %v3453_v37 = vpop.f32.mrf.mxu3 }
 0x1b4   :  { %396 = vxpose.xlu0.b32.start [1/8] (short) (narrow) %v138_v12, 16  ;;  %6969 = vst [vmem:[#allocation58_spill] sm:$0xff] %v3453_v37  ;;  %v3467_v37 = vpop.f32.mrf.mxu2 }
 0x1b5   :  { %6972 = vst [vmem:[#allocation61_spill] sm:$0xff] %v3467_v37 }
 0x1b6   :  { %v380_v5 = vpop.trf.xlu2 }
 0x1b7   :  { %v3427_v28 = vpop.f32.mrf.mxu0  ;;  %v3429_v62 = vpop.f32.mrf.mxu1 }
 0x1b8   :  { %6962 = vst [vmem:[#allocation51_spill] sm:$0xff] %v3427_v28 }
 0x1b9   :  { %6963 = vst [vmem:[#allocation52_spill] sm:$0xff] %v3429_v62 }
 0x1ba   :  { %2636 = vmatmul.msk.f32.gmra.mxu0 %vm428_vm0, %v286_v24  ;;  %2734 = vmatmul.msk.f32.gmra.mxu1 %vm428_vm0, %v286_v24  ;;  %v145_v24 = vadd.f32 %v89_v45, %v33_v36  ;;  %v361_v32 = vpop.trf.xlu0  ;;  %v96_v36 = vld [vmem:[%s6662_s2 + $0xa0] sm:$0xff] }
 0x1bb   :  { %2679 = vmatmul.msk.f32.gmra.mxu2 %vm428_vm0, %v361_v32  ;;  %2777 = vmatmul.msk.f32.gmra.mxu3 %vm428_vm0, %v361_v32  ;;  %v3471_v32 = vpop.f32.mrf.mxu3 }
 0x1bc   :  { %397 = vxpose.xlu0.b32.cont [2/8] (short) (narrow) %v145_v24, 16  ;;  %6973 = vst [vmem:[#allocation62_spill] sm:$0xff] %v3471_v32  ;;  %v3485_v32 = vpop.f32.mrf.mxu2 }
 0x1bd   :  { %6976 = vst [vmem:[#allocation65_spill] sm:$0xff] %v3485_v32  ;;  %v292_v32 = vpop.trf.xlu1 }
 0x1be   :  { %v381_v52 = vpop.trf.xlu2 }
 0x1bf   :  { %v3445_v3 = vpop.f32.mrf.mxu0  ;;  %v3447_v12 = vpop.f32.mrf.mxu1 }
 0x1c0   :  { %6966 = vst [vmem:[#allocation55_spill] sm:$0xff] %v3445_v3 }
 0x1c1   :  { %6967 = vst [vmem:[#allocation56_spill] sm:$0xff] %v3447_v12 }
 0x1c2   :  { %2637 = vmatmul.msk.f32.gmra.mxu0 %vm428_vm0, %v287_v49  ;;  %2735 = vmatmul.msk.f32.gmra.mxu1 %vm428_vm0, %v287_v49  ;;  %v152_v49 = vadd.f32 %v96_v36, %v40_v25  ;;  %v362_v4 = vpop.trf.xlu0  ;;  %v103_v25 = vld [vmem:[%s6662_s2 + $0xd8] sm:$0xff] }
 0x1c3   :  { %2680 = vmatmul.msk.f32.gmra.mxu2 %vm428_vm0, %v362_v4  ;;  %2778 = vmatmul.msk.f32.gmra.mxu3 %vm428_vm0, %v362_v4  ;;  %v3489_v4 = vpop.f32.mrf.mxu3 }
 0x1c4   :  { %398 = vxpose.xlu0.b32.cont [3/8] (short) (narrow) %v152_v49, 16  ;;  %6977 = vst [vmem:[#allocation66_spill] sm:$0xff] %v3489_v4  ;;  %v3503_v4 = vpop.f32.mrf.mxu2 }
 0x1c5   :  { %6980 = vst [vmem:[#allocation69_spill] sm:$0xff] %v3503_v4 }
 0x1c6   :  { %v382_v34 = vpop.trf.xlu2 }
 0x1c7   :  { %v3463_v45 = vpop.f32.mrf.mxu0  ;;  %v3465_v24 = vpop.f32.mrf.mxu1 }
 0x1c8   :  { %6970 = vst [vmem:[#allocation59_spill] sm:$0xff] %v3463_v45 }
 0x1c9   :  { %6971 = vst [vmem:[#allocation60_spill] sm:$0xff] %v3465_v24 }
 0x1ca   :  { %2638 = vmatmul.msk.f32.gmra.mxu0 %vm428_vm0, %v288_v9  ;;  %2736 = vmatmul.msk.f32.gmra.mxu1 %vm428_vm0, %v288_v9  ;;  %v159_v9 = vadd.f32 %v103_v25, %v47_v13  ;;  %v363_v37 = vpop.trf.xlu0  ;;  %v110_v13 = vld [vmem:[%s6662_s2 + $0x110] sm:$0xff] }
 0x1cb   :  { %2681 = vmatmul.msk.f32.gmra.mxu2 %vm428_vm0, %v363_v37  ;;  %2779 = vmatmul.msk.f32.gmra.mxu3 %vm428_vm0, %v363_v37  ;;  %v3507_v37 = vpop.f32.mrf.mxu3 }
 0x1cc   :  { %399 = vxpose.xlu0.b32.cont [4/8] (short) (narrow) %v159_v9, 16  ;;  %6981 = vst [vmem:[#allocation70_spill] sm:$0xff] %v3507_v37  ;;  %v293_v37 = vpop.trf.xlu1 }
 0x1ce   :  { %v383_v26 = vpop.trf.xlu2 }
 0x1cf   :  { %v3481_v36 = vpop.f32.mrf.mxu0  ;;  %v3483_v49 = vpop.f32.mrf.mxu1 }
 0x1d0   :  { %6974 = vst [vmem:[#allocation63_spill] sm:$0xff] %v3481_v36 }
 0x1d1   :  { %6975 = vst [vmem:[#allocation64_spill] sm:$0xff] %v3483_v49 }
 0x1d2   :  { %2639 = vmatmul.msk.f32.gmra.mxu0 %vm428_vm0, %v289_v55  ;;  %2737 = vmatmul.msk.f32.gmra.mxu1 %vm428_vm0, %v289_v55  ;;  %v166_v55 = vadd.f32 %v110_v13, %v54_v6 }
 0x1d3   :  { %2682 = vmatmul.msk.f32.gmra.mxu2 %vm428_vm0, %v380_v5  ;;  %2780 = vmatmul.msk.f32.gmra.mxu3 %vm428_vm0, %v380_v5  ;;  %v3525_v4 = vpop.f32.mrf.mxu3  ;;  %v124_v5 = vld [vmem:[%s6662_s2 + $0x180] sm:$0xff] }
 0x1d4   :  { %400 = vxpose.xlu0.b32.cont [5/8] (short) (narrow) %v166_v55, 16  ;;  %v3521_v55 = vpop.f32.mrf.mxu2  ;;  %6985 = vst [vmem:[#allocation74_spill] sm:$0xff] %v3525_v4 }
 0x1d5   :  { %6984 = vst [vmem:[#allocation73_spill] sm:$0xff] %v3521_v55  ;;  %v294_v55 = vpop.trf.xlu1 }
 0x1d7   :  { %v3499_v25 = vpop.f32.mrf.mxu0  ;;  %v3501_v9 = vpop.f32.mrf.mxu1 }
 0x1d8   :  { %6978 = vst [vmem:[#allocation67_spill] sm:$0xff] %v3499_v25 }
 0x1d9   :  { %6979 = vst [vmem:[#allocation68_spill] sm:$0xff] %v3501_v9 }
 0x1da   :  { %2640 = vmatmul.msk.f32.gmra.mxu0 %vm428_vm0, %v290_v27  ;;  %2738 = vmatmul.msk.f32.gmra.mxu1 %vm428_vm0, %v290_v27  ;;  %v173_v27 = vadd.f32 %v117_v60, %v61_v61 }
 0x1db   :  { %2683 = vmatmul.msk.f32.gmra.mxu2 %vm428_vm0, %v381_v52  ;;  %2781 = vmatmul.msk.f32.gmra.mxu3 %vm428_vm0, %v381_v52  ;;  %v3543_v4 = vpop.f32.mrf.mxu3  ;;  %v131_v52 = vld [vmem:[%s6662_s2 + $0x1b8] sm:$0xff] }
 0x1dc   :  { %401 = vxpose.xlu0.b32.cont [6/8] (short) (narrow) %v173_v27, 16  ;;  %v3539_v27 = vpop.f32.mrf.mxu2  ;;  %6989 = vst [vmem:[#allocation78_spill] sm:$0xff] %v3543_v4 }
 0x1dd   :  { %6988 = vst [vmem:[#allocation77_spill] sm:$0xff] %v3539_v27  ;;  %v295_v27 = vpop.trf.xlu1 }
 0x1df   :  { %v3515_v6 = vpop.f32.mrf.mxu0  ;;  %v3517_v13 = vpop.f32.mrf.mxu1 }
 0x1e0   :  { %6982 = vst [vmem:[#allocation71_spill] sm:$0xff] %v3515_v6 }
 0x1e1   :  { %6983 = vst [vmem:[#allocation72_spill] sm:$0xff] %v3517_v13 }
 0x1e2   :  { %2641 = vmatmul.msk.f32.gmra.mxu0 %vm428_vm0, %v291_v16  ;;  %2739 = vmatmul.msk.f32.gmra.mxu1 %vm428_vm0, %v291_v16  ;;  %v180_v16 = vadd.f32 %v124_v5, %v68_v44 }
 0x1e3   :  { %2684 = vmatmul.msk.f32.gmra.mxu2 %vm428_vm0, %v382_v34  ;;  %2782 = vmatmul.msk.f32.gmra.mxu3 %vm428_vm0, %v382_v34  ;;  %v3561_v4 = vpop.f32.mrf.mxu3 }
 0x1e4   :  { %402 = vxpose.xlu0.b32.cont [7/8] (short) (narrow) %v180_v16, 16  ;;  %v3557_v16 = vpop.f32.mrf.mxu2  ;;  %6993 = vst [vmem:[#allocation82_spill] sm:$0xff] %v3561_v4 }
 0x1e5   :  { %6992 = vst [vmem:[#allocation81_spill] sm:$0xff] %v3557_v16  ;;  %v296_v4 = vpop.trf.xlu1 }
 0x1e7   :  { %v3533_v60 = vpop.f32.mrf.mxu0  ;;  %v3535_v61 = vpop.f32.mrf.mxu1 }
 0x1e8   :  { %6986 = vst [vmem:[#allocation75_spill] sm:$0xff] %v3533_v60 }
 0x1e9   :  { %6987 = vst [vmem:[#allocation76_spill] sm:$0xff] %v3535_v61 }
 0x1ea   :  { %2642 = vmatmul.msk.f32.gmra.mxu0 %vm428_vm0, %v292_v32  ;;  %2740 = vmatmul.msk.f32.gmra.mxu1 %vm428_vm0, %v292_v32  ;;  %v187_v32 = vadd.f32 %v131_v52, %v75_v31 }
 0x1eb   :  { %2685 = vmatmul.msk.f32.gmra.mxu2 %vm428_vm0, %v383_v26  ;;  %2783 = vmatmul.msk.f32.gmra.mxu3 %vm428_vm0, %v383_v26  ;;  %v3573_v34 = vpop.f32.mrf.mxu3 }
 0x1ec   :  { %403 = vxpose.xlu0.b32.end [8/8] (short) (narrow) %v187_v32, 16  ;;  %v3569_v31 = vpop.f32.mrf.mxu2  ;;  %6997 = vst [vmem:[#allocation86_spill] sm:$0xff] %v3573_v34 }
 0x1ed   :  { %6996 = vst [vmem:[#allocation85_spill] sm:$0xff] %v3569_v31 }
 0x1ef   :  { %v3551_v44 = vpop.f32.mrf.mxu0  ;;  %v3553_v5 = vpop.f32.mrf.mxu1 }
 0x1f0   :  { %6990 = vst [vmem:[#allocation79_spill] sm:$0xff] %v3551_v44 }
 0x1f1   :  { %6991 = vst [vmem:[#allocation80_spill] sm:$0xff] %v3553_v5  ;;  %v1558_v5 = vmul.f32 %v3215_v51, %v3215_v51 }
 0x1f2   :  { %2643 = vmatmul.msk.f32.gmra.mxu0 %vm428_vm0, %v293_v37  ;;  %2741 = vmatmul.msk.f32.gmra.mxu1 %vm428_vm0, %v293_v37  ;;  %v384_v37 = vpop.trf.xlu2 }
 0x1f3   :  { %2686 = vmatmul.msk.f32.gmra.mxu2 %vm428_vm0, %v384_v37  ;;  %2784 = vmatmul.msk.f32.gmra.mxu3 %vm428_vm0, %v384_v37  ;;  %v3585_v26 = vpop.f32.mrf.mxu3  ;;  %v297_v37 = vpop.trf.xlu1 }
 0x1f4   :  { %v3581_v16 = vpop.f32.mrf.mxu2  ;;  %7001 = vst [vmem:[#allocation90_spill] sm:$0xff] %v3585_v26 }
 0x1f5   :  { %7000 = vst [vmem:[#allocation89_spill] sm:$0xff] %v3581_v16 }
 0x1f7   :  { %v3563_v23 = vpop.f32.mrf.mxu0  ;;  %v3565_v44 = vpop.f32.mrf.mxu1 }
 0x1f8   :  { %6994 = vst [vmem:[#allocation83_spill] sm:$0xff] %v3563_v23 }
 0x1f9   :  { %6995 = vst [vmem:[#allocation84_spill] sm:$0xff] %v3565_v44 }
 0x1fa   :  { %2644 = vmatmul.msk.f32.gmra.mxu0 %vm428_vm0, %v294_v55  ;;  %2742 = vmatmul.msk.f32.gmra.mxu1 %vm428_vm0, %v294_v55  ;;  %v385_v55 = vpop.trf.xlu2 }
 0x1fb   :  { %2687 = vmatmul.msk.f32.gmra.mxu2 %vm428_vm0, %v385_v55  ;;  %2785 = vmatmul.msk.f32.gmra.mxu3 %vm428_vm0, %v385_v55  ;;  %v3597_v16 = vpop.f32.mrf.mxu3 }
 0x1fc   :  { %7005 = vst [vmem:[#allocation94_spill] sm:$0xff] %v3597_v16 }
 0x1ff   :  { %v3575_v52 = vpop.f32.mrf.mxu0  ;;  %v3577_v32 = vpop.f32.mrf.mxu1 }
 0x200   :  { %6998 = vst [vmem:[#allocation87_spill] sm:$0xff] %v3575_v52 }
 0x201   :  { %6999 = vst [vmem:[#allocation88_spill] sm:$0xff] %v3577_v32  ;;  %v3593_v32 = vpop.f32.mrf.mxu2 }
 0x202   :  { %2645 = vmatmul.msk.f32.gmra.mxu0 %vm428_vm0, %v295_v27  ;;  %2743 = vmatmul.msk.f32.gmra.mxu1 %vm428_vm0, %v295_v27  ;;  %7004 = vst [vmem:[#allocation93_spill] sm:$0xff] %v3593_v32  ;;  %v386_v27 = vpop.trf.xlu2 }
 0x203   :  { %2688 = vmatmul.msk.f32.gmra.mxu2 %vm428_vm0, %v386_v27  ;;  %2786 = vmatmul.msk.f32.gmra.mxu3 %vm428_vm0, %v386_v27  ;;  %v3609_v55 = vpop.f32.mrf.mxu3 }
 0x204   :  { %7009 = vst [vmem:[#allocation98_spill] sm:$0xff] %v3609_v55 }
 0x207   :  { %v3587_v34 = vpop.f32.mrf.mxu0  ;;  %v3589_v31 = vpop.f32.mrf.mxu1 }
 0x208   :  { %7002 = vst [vmem:[#allocation91_spill] sm:$0xff] %v3587_v34 }
 0x209   :  { %7003 = vst [vmem:[#allocation92_spill] sm:$0xff] %v3589_v31  ;;  %v3605_v31 = vpop.f32.mrf.mxu2 }
 0x20a   :  { %2646 = vmatmul.msk.f32.gmra.mxu0 %vm428_vm0, %v296_v4  ;;  %2744 = vmatmul.msk.f32.gmra.mxu1 %vm428_vm0, %v296_v4  ;;  %7008 = vst [vmem:[#allocation97_spill] sm:$0xff] %v3605_v31  ;;  %v298_v4 = vpop.trf.xlu1  ;;  %v387_v32 = vpop.trf.xlu2 }
 0x20b   :  { %2689 = vmatmul.msk.f32.gmra.mxu2 %vm428_vm0, %v387_v32  ;;  %2787 = vmatmul.msk.f32.gmra.mxu3 %vm428_vm0, %v387_v32  ;;  %v3621_v27 = vpop.f32.mrf.mxu3 }
 0x20c   :  { %7013 = vst [vmem:[#allocation102_spill] sm:$0xff] %v3621_v27 }
 0x20f   :  { %v3599_v26 = vpop.f32.mrf.mxu0  ;;  %v3601_v52 = vpop.f32.mrf.mxu1 }
 0x210   :  { %7006 = vst [vmem:[#allocation95_spill] sm:$0xff] %v3599_v26 }
 0x211   :  { %7007 = vst [vmem:[#allocation96_spill] sm:$0xff] %v3601_v52  ;;  %v3617_v52 = vpop.f32.mrf.mxu2 }
 0x212   :  { %2647 = vmatmul.msk.f32.gmra.mxu0 %vm428_vm0, %v297_v37  ;;  %2745 = vmatmul.msk.f32.gmra.mxu1 %vm428_vm0, %v297_v37  ;;  %7012 = vst [vmem:[#allocation101_spill] sm:$0xff] %v3617_v52  ;;  %v299_v37 = vpop.trf.xlu1  ;;  %v388_v55 = vpop.trf.xlu2 }
 0x213   :  { %2690 = vmatmul.msk.f32.gmra.mxu2 %vm428_vm0, %v388_v55  ;;  %2788 = vmatmul.msk.f32.gmra.mxu3 %vm428_vm0, %v388_v55  ;;  %v3633_v32 = vpop.f32.mrf.mxu3 }
 0x214   :  { %7017 = vst [vmem:[#allocation106_spill] sm:$0xff] %v3633_v32 }
 0x217   :  { %v3611_v16 = vpop.f32.mrf.mxu0  ;;  %v3613_v34 = vpop.f32.mrf.mxu1 }
 0x218   :  { %7010 = vst [vmem:[#allocation99_spill] sm:$0xff] %v3611_v16  ;;  %v1557_v16 = vmul.f32 %v3213_v50, %v3213_v50 }
 0x219   :  { %7011 = vst [vmem:[#allocation100_spill] sm:$0xff] %v3613_v34  ;;  %v3629_v34 = vpop.f32.mrf.mxu2 }
 0x21a   :  { %2648 = vmatmul.msk.f32.gmra.mxu0 %vm428_vm0, %v298_v4  ;;  %2746 = vmatmul.msk.f32.gmra.mxu1 %vm428_vm0, %v298_v4  ;;  %7016 = vst [vmem:[#allocation105_spill] sm:$0xff] %v3629_v34  ;;  %v389_v4 = vpop.trf.xlu2 }
 0x21b   :  { %2691 = vmatmul.msk.f32.gmra.mxu2 %vm428_vm0, %v389_v4  ;;  %2789 = vmatmul.msk.f32.gmra.mxu3 %vm428_vm0, %v389_v4  ;;  %v3647_v55 = vpop.f32.mrf.mxu3 }
 0x21c   :  { %7021 = vst [vmem:[#allocation110_spill] sm:$0xff] %v3647_v55 }
 0x21f   :  { %v3623_v31 = vpop.f32.mrf.mxu0  ;;  %v3625_v26 = vpop.f32.mrf.mxu1 }
 0x220   :  { %7014 = vst [vmem:[#allocation103_spill] sm:$0xff] %v3623_v31 }
 0x221   :  { %7015 = vst [vmem:[#allocation104_spill] sm:$0xff] %v3625_v26  ;;  %v3641_v26 = vpop.f32.mrf.mxu2 }
 0x222   :  { %2649 = vmatmul.msk.f32.gmra.mxu0 %vm428_vm0, %v299_v37  ;;  %2747 = vmatmul.msk.f32.gmra.mxu1 %vm428_vm0, %v299_v37  ;;  %7020 = vst [vmem:[#allocation109_spill] sm:$0xff] %v3641_v26  ;;  %v390_v37 = vpop.trf.xlu2 }
 0x223   :  { %2692 = vmatmul.msk.f32.gmra.mxu2 %vm428_vm0, %v390_v37  ;;  %2790 = vmatmul.msk.f32.gmra.mxu3 %vm428_vm0, %v390_v37  ;;  %v3657_v26 = vpop.f32.mrf.mxu3 }
 0x224   :  { %7025 = vst [vmem:[#allocation114_spill] sm:$0xff] %v3657_v26 }
 0x227   :  { %v3635_v27 = vpop.f32.mrf.mxu0  ;;  %v3637_v52 = vpop.f32.mrf.mxu1 }
 0x228   :  { %7018 = vst [vmem:[#allocation107_spill] sm:$0xff] %v3635_v27 }
 0x229   :  { %7019 = vst [vmem:[#allocation108_spill] sm:$0xff] %v3637_v52  ;;  %v3655_v4 = vpop.f32.mrf.mxu2 }
 0x22a   :  { %2650 = vmatmul.msk.f32.gmra.mxu0 %vm428_vm0, %v3085_v46  ;;  %2748 = vmatmul.msk.f32.gmra.mxu1 %vm428_vm0, %v3085_v46  ;;  %7024 = vst [vmem:[#allocation113_spill] sm:$0xff] %v3655_v4  ;;  %v391_v52 = vpop.trf.xlu2 }
 0x22b   :  { %2693 = vmatmul.msk.f32.gmra.mxu2 %vm428_vm0, %v391_v52  ;;  %2791 = vmatmul.msk.f32.gmra.mxu3 %vm428_vm0, %v391_v52  ;;  %v1553_v52 = vmul.f32 %v3197_v42, %v3197_v42 }
 0x22e   :  { %v3667_v55 = vpop.f32.mrf.mxu3 }
 0x22f   :  { %v3649_v32 = vpop.f32.mrf.mxu0  ;;  %v3651_v34 = vpop.f32.mrf.mxu1  ;;  %7029 = vst [vmem:[#allocation118_spill] sm:$0xff] %v3667_v55  ;;  %v1554_v55 = vmul.f32 %v3199_v43, %v3199_v43 }
 0x230   :  { %7022 = vst [vmem:[#allocation111_spill] sm:$0xff] %v3649_v32 }
 0x231   :  { %7023 = vst [vmem:[#allocation112_spill] sm:$0xff] %v3651_v34  ;;  %v3665_v46 = vpop.f32.mrf.mxu2 }
 0x232   :  { %7028 = vst [vmem:[#allocation117_spill] sm:$0xff] %v3665_v46  ;;  %v392_v34 = vpop.trf.xlu2 }
 0x233   :  { %2694 = vmatmul.msk.f32.gmra.mxu2 %vm428_vm0, %v392_v34  ;;  %2792 = vmatmul.msk.f32.gmra.mxu3 %vm428_vm0, %v392_v34  ;;  %v1551_v34 = vmul.f32 %v3189_v38, %v3189_v38 }
 0x236   :  { %v3677_v4 = vpop.f32.mrf.mxu3 }
 0x237   :  { %v3659_v27 = vpop.f32.mrf.mxu0  ;;  %v3661_v31 = vpop.f32.mrf.mxu1  ;;  %7033 = vst [vmem:[#allocation122_spill] sm:$0xff] %v3677_v4  ;;  %v1555_v4 = vmul.f32 %v3205_v47, %v3205_v47 }
 0x238   :  { %7026 = vst [vmem:[#allocation115_spill] sm:$0xff] %v3659_v27 }
 0x239   :  { %7027 = vst [vmem:[#allocation116_spill] sm:$0xff] %v3661_v31  ;;  %v3675_v26 = vpop.f32.mrf.mxu2 }
 0x23a   :  { %7032 = vst [vmem:[#allocation121_spill] sm:$0xff] %v3675_v26  ;;  %v393_v31 = vpop.trf.xlu2  ;;  %v1552_v26 = vmul.f32 %v3191_v39, %v3191_v39 }
 0x23b   :  { %2695 = vmatmul.msk.f32.gmra.mxu2 %vm428_vm0, %v393_v31  ;;  %2793 = vmatmul.msk.f32.gmra.mxu3 %vm428_vm0, %v393_v31  ;;  %v1448_v31 = vadd.f32 %v3199_v43, %v3191_v39  ;;  %v1560_v43 = vmul.f32 %v3229_v58, %v3229_v58 }
 0x23c   :  { %v1850_v23 = vadd.f32 %v1554_v55, %v1552_v26  ;;  %v1561_v55 = vmul.f32 %v3241_v0, %v3241_v0 }
 0x23e   :  { %v3705_v44 = vpop.f32.mrf.mxu3 }
 0x23f   :  { %v3669_v32 = vpop.f32.mrf.mxu0  ;;  %v3671_v37 = vpop.f32.mrf.mxu1  ;;  %7037 = vst [vmem:[#allocation126_spill] sm:$0xff] %v3705_v44 }
 0x240   :  { %7030 = vst [vmem:[#allocation119_spill] sm:$0xff] %v3669_v32 }
 0x241   :  { %7031 = vst [vmem:[#allocation120_spill] sm:$0xff] %v3671_v37  ;;  %v1556_v37 = vmul.f32 %v3207_v48, %v3207_v48  ;;  %v3697_v27 = vpop.f32.mrf.mxu2 }
 0x242   :  { %7036 = vst [vmem:[#allocation125_spill] sm:$0xff] %v3697_v27  ;;  %v1449_v27 = vadd.f32 %v1448_v31, %v3207_v48 }
 0x244   :  { %v1450_v26 = vadd.f32 %v1449_v27, %v3215_v51  ;;  %v1564_v27 = vmul.f32 %v3257_v8, %v3257_v8 }
 0x247   :  { %v3683_v46 = vpop.f32.mrf.mxu0  ;;  %v3685_v32 = vpop.f32.mrf.mxu1 }
 0x248   :  { %7034 = vst [vmem:[#allocation123_spill] sm:$0xff] %v3683_v46  ;;  %v1747_v46 = vadd.f32 %v1553_v52, %v1551_v34  ;;  %v1559_v52 = vmul.f32 %v3227_v57, %v3227_v57  ;;  %v1851_v34 = vadd.f32 %v1850_v23, %v1556_v37 }
 0x249   :  { %7035 = vst [vmem:[#allocation124_spill] sm:$0xff] %v3685_v32  ;;  %v1345_v32 = vadd.f32 %v3197_v42, %v3189_v38  ;;  %v394_v38 = vpop.trf.xlu2  ;;  %v3733_v37 = vpop.f32.mrf.mxu2 }
 0x24a   :  { %v1748_v60 = vadd.f32 %v1747_v46, %v1555_v4  ;;  %v1562_v4 = vmul.f32 %v3243_v1, %v3243_v1  ;;  %2696 = vmatmul.msk.f32.gmra.mxu2 %vm428_vm0, %v394_v38  ;;  %2794 = vmatmul.msk.f32.gmra.mxu3 %vm428_vm0, %v394_v38  ;;  %v1565_v38 = vmul.f32 %v3269_v14, %v3269_v14 }
 0x24b   :  { %v1346_v61 = vadd.f32 %v1345_v32, %v3205_v47  ;;  %v1852_v32 = vadd.f32 %v1851_v34, %v1558_v5 }
 0x24c   :  { %v1749_v39 = vadd.f32 %v1748_v60, %v1557_v16  ;;  %v1563_v16 = vmul.f32 %v3255_v7, %v3255_v7 }
 0x24d   :  { %v1347_v42 = vadd.f32 %v1346_v61, %v3213_v50  ;;  %v1451_v61 = vadd.f32 %v1450_v26, %v3229_v58  ;;  %v1853_v5 = vadd.f32 %v1852_v32, %v1560_v43 }
 0x24e   :  { %v1750_v60 = vadd.f32 %v1749_v39, %v1559_v52  ;;  %v3739_v39 = vpop.f32.mrf.mxu3  ;;  %v1566_v52 = vmul.f32 %v3271_v15, %v3271_v15 }
 0x24f   :  { %v3721_v46 = vpop.f32.mrf.mxu0  ;;  %v3723_v31 = vpop.f32.mrf.mxu1  ;;  %v1348_v23 = vadd.f32 %v1347_v42, %v3227_v57  ;;  %v1452_v50 = vadd.f32 %v1451_v61, %v3243_v1  ;;  %v1854_v42 = vadd.f32 %v1853_v5, %v1562_v4  ;;  %v1569_v5 = vmul.f32 %v3301_v29, %v3301_v29 }
 0x250   :  { %7038 = vst [vmem:[#allocation127_spill] sm:$0xff] %v3721_v46  ;;  %v1751_v51 = vadd.f32 %v1750_v60, %v1561_v55  ;;  %v1568_v60 = vmul.f32 %v3285_v21, %v3285_v21 }
 0x251   :  { %7039 = vst [vmem:[#allocation128_spill] sm:$0xff] %v3723_v31  ;;  %v1349_v34 = vadd.f32 %v1348_v23, %v3241_v0  ;;  %v1453_v32 = vadd.f32 %v1452_v50, %v3257_v8  ;;  %v1567_v23 = vmul.f32 %v3283_v20, %v3283_v20  ;;  %v1855_v55 = vadd.f32 %v1854_v42, %v1564_v27  ;;  %v395_v0 = vpop.trf.xlu2 }
 0x252   :  { %v1752_v26 = vadd.f32 %v1751_v51, %v1563_v16  ;;  %v1570_v50 = vmul.f32 %v3303_v30, %v3303_v30  ;;  %2697 = vmatmul.msk.f32.gmra.mxu2 %vm428_vm0, %v395_v0  ;;  %2795 = vmatmul.msk.f32.gmra.mxu3 %vm428_vm0, %v395_v0  ;;  %v1573_v0 = vmul.f32 %v3337_v56, %v3337_v56 }
 0x253   :  { %v1350_v43 = vadd.f32 %v1349_v34, %v3255_v7  ;;  %v1454_v4 = vadd.f32 %v1453_v32, %v3271_v15  ;;  %v1856_v34 = vadd.f32 %v1855_v55, %v1566_v52  ;;  %v3767_v32 = vpop.f32.mrf.mxu2 }
 0x254   :  { %v1753_v1 = vadd.f32 %v1752_v26, %v1565_v38  ;;  %v1572_v26 = vmul.f32 %v3321_v41, %v3321_v41 }
 0x255   :  { %v1351_v61 = vadd.f32 %v1350_v43, %v3269_v14  ;;  %v1455_v42 = vadd.f32 %v1454_v4, %v3285_v21  ;;  %v1571_v43 = vmul.f32 %v3319_v40, %v3319_v40  ;;  %v1857_v52 = vadd.f32 %v1856_v34, %v1568_v60 }
 0x256   :  { %v1754_v38 = vadd.f32 %v1753_v1, %v1567_v23  ;;  %v3773_v1 = vpop.f32.mrf.mxu3 }
 0x257   :  { %v3755_v51 = vpop.f32.mrf.mxu0  ;;  %v3757_v16 = vpop.f32.mrf.mxu1  ;;  %v1352_v27 = vadd.f32 %v1351_v61, %v3283_v20  ;;  %v1456_v14 = vadd.f32 %v1455_v42, %v3303_v30  ;;  %7042 = vst [vmem:[#allocation131_spill] sm:$0xff] %v3773_v1  ;;  %v1858_v23 = vadd.f32 %v1857_v52, %v1570_v50  ;;  %v1574_v61 = vmul.f32 %v3339_v59, %v3339_v59 }
 0x258   :  { %7040 = vst [vmem:[#allocation129_spill] sm:$0xff] %v3755_v51  ;;  %v1755_v15 = vadd.f32 %v1754_v38, %v1569_v5  ;;  %v1576_v38 = vmul.f32 %v3351_v2, %v3351_v2  ;;  %v412_v42 = vpop.trf.xlu0  ;;  %v1577_v52 = vmul.f32 %v3361_v10, %v3361_v10 }
 0x259   :  { %7041 = vst [vmem:[#allocation130_spill] sm:$0xff] %v3757_v16  ;;  %v1353_v55 = vadd.f32 %v1352_v27, %v3301_v29  ;;  %v1457_v34 = vadd.f32 %v1456_v14, %v3321_v41  ;;  %v1575_v27 = vmul.f32 %v3349_v63, %v3349_v63  ;;  %v1859_v5 = vadd.f32 %v1858_v23, %v1572_v26 }
 0x25a   :  { %v1756_v4 = vadd.f32 %v1755_v15, %v1571_v43  ;;  %v1578_v14 = vmul.f32 %v3363_v11, %v3363_v11  ;;  %2698 = vmatmul.msk.f32.gmra.mxu2 %vm428_vm0, %v412_v42  ;;  %2796 = vmatmul.msk.f32.gmra.mxu3 %vm428_vm0, %v412_v42  ;;  %v1581_v42 = vmul.f32 %v3385_v33, %v3385_v33 }
 0x25b   :  { %v1354_v60 = vadd.f32 %v1353_v55, %v3319_v40  ;;  %v1458_v50 = vadd.f32 %v1457_v34, %v3339_v59  ;;  %v1860_v55 = vadd.f32 %v1859_v5, %v1574_v61  ;;  %v7079_v40 = vld [vmem:[#allocation119_spill] sm:$0xff] }
 0x25c   :  { %v1757_v29 = vadd.f32 %v1756_v4, %v1573_v0  ;;  %v1580_v4 = vmul.f32 %v3375_v22, %v3375_v22  ;;  %v1621_v21 = vmul.f32 %v7079_v40, %v7079_v40 }
 0x25d   :  { %v1355_v30 = vadd.f32 %v1354_v60, %v3337_v56  ;;  %v1459_v23 = vadd.f32 %v1458_v50, %v3351_v2  ;;  %v1579_v60 = vmul.f32 %v3373_v19, %v3373_v19  ;;  %v1861_v61 = vadd.f32 %v1860_v55, %v1576_v38  ;;  %v3805_v56 = vpop.f32.mrf.mxu2 }
 0x25e   :  { %v1758_v0 = vadd.f32 %v1757_v29, %v1575_v27  ;;  %v3807_v29 = vpop.f32.mrf.mxu3  ;;  %v1582_v27 = vmul.f32 %v3387_v35, %v3387_v35 }
 0x25f   :  { %v3789_v15 = vpop.f32.mrf.mxu0  ;;  %v3791_v43 = vpop.f32.mrf.mxu1  ;;  %v1356_v26 = vadd.f32 %v1355_v30, %v3349_v63  ;;  %v1460_v59 = vadd.f32 %v1459_v23, %v3363_v11  ;;  %v1862_v30 = vadd.f32 %v1861_v61, %v1578_v14  ;;  %v7073_v63 = vld [vmem:[#allocation111_spill] sm:$0xff] }
 0x260   :  { %7043 = vst [vmem:[#allocation132_spill] sm:$0xff] %v3789_v15  ;;  %v1759_v5 = vadd.f32 %v1758_v0, %v1577_v52  ;;  %v1583_v52 = vmul.f32 %v3397_v53, %v3397_v53  ;;  %v1584_v0 = vmul.f32 %v3399_v54, %v3399_v54  ;;  %v413_v23 = vpop.trf.xlu0  ;;  %v1617_v41 = vmul.f32 %v7073_v63, %v7073_v63 }
 0x261   :  { %7044 = vst [vmem:[#allocation133_spill] sm:$0xff] %v3791_v43  ;;  %v1357_v34 = vadd.f32 %v1356_v26, %v3361_v10  ;;  %v1461_v55 = vadd.f32 %v1460_v59, %v3375_v22  ;;  %v1863_v26 = vadd.f32 %v1862_v30, %v1580_v4  ;;  %v1586_v59 = vmul.f32 %v3411_v18, %v3411_v18 }
 0x262   :  { %v1760_v50 = vadd.f32 %v1759_v5, %v1579_v60  ;;  %2699 = vmatmul.msk.f32.gmra.mxu2 %vm428_vm0, %v413_v23  ;;  %2797 = vmatmul.msk.f32.gmra.mxu3 %vm428_vm0, %v413_v23 }
 0x263   :  { %v1358_v38 = vadd.f32 %v1357_v34, %v3373_v19  ;;  %v1462_v14 = vadd.f32 %v1461_v55, %v3387_v35  ;;  %v1864_v61 = vadd.f32 %v1863_v26, %v1582_v27  ;;  %v1585_v34 = vmul.f32 %v3409_v17, %v3409_v17 }
 0x264   :  { %v1761_v10 = vadd.f32 %v1760_v50, %v1581_v42  ;;  %v1588_v50 = vmul.f32 %v3429_v62, %v3429_v62 }
 0x265   :  { %v1359_v11 = vadd.f32 %v1358_v38, %v3385_v33  ;;  %v1463_v42 = vadd.f32 %v1462_v14, %v3399_v54  ;;  %v1865_v27 = vadd.f32 %v1864_v61, %v1584_v0  ;;  %v1587_v38 = vmul.f32 %v3427_v28, %v3427_v28  ;;  %v3837_v35 = vpop.f32.mrf.mxu2 }
 0x266   :  { %v1762_v30 = vadd.f32 %v1761_v10, %v1583_v52  ;;  %v3839_v33 = vpop.f32.mrf.mxu3  ;;  %v1589_v10 = vmul.f32 %v3445_v3, %v3445_v3  ;;  %v1590_v52 = vmul.f32 %v3447_v12, %v3447_v12 }
 0x267   :  { %v3823_v60 = vpop.f32.mrf.mxu0  ;;  %v3825_v4 = vpop.f32.mrf.mxu1  ;;  %v1360_v5 = vadd.f32 %v1359_v11, %v3397_v53  ;;  %v1464_v26 = vadd.f32 %v1463_v42, %v3411_v18  ;;  %v1866_v11 = vadd.f32 %v1865_v27, %v1586_v59  ;;  %v1591_v42 = vmul.f32 %v3463_v45, %v3463_v45  ;;  %v7062_v53 = vld [vmem:[#allocation95_spill] sm:$0xff] }
 0x268   :  { %7045 = vst [vmem:[#allocation134_spill] sm:$0xff] %v3823_v60  ;;  %v1763_v23 = vadd.f32 %v1762_v30, %v1585_v34  ;;  %v1592_v18 = vmul.f32 %v3465_v24, %v3465_v24  ;;  %v1609_v22 = vmul.f32 %v7062_v53, %v7062_v53 }
 0x269   :  { %7046 = vst [vmem:[#allocation135_spill] sm:$0xff] %v3825_v4  ;;  %v1361_v55 = vadd.f32 %v1360_v5, %v3409_v17  ;;  %v1465_v14 = vadd.f32 %v1464_v26, %v3429_v62  ;;  %v1867_v5 = vadd.f32 %v1866_v11, %v1588_v50  ;;  %v1593_v17 = vmul.f32 %v3481_v36, %v3481_v36 }
 0x26a   :  { %v1764_v61 = vadd.f32 %v1763_v23, %v1587_v38 }
 0x26b   :  { %v1362_v0 = vadd.f32 %v1361_v55, %v3427_v28  ;;  %v1466_v59 = vadd.f32 %v1465_v14, %v3447_v12  ;;  %v1868_v27 = vadd.f32 %v1867_v5, %v1590_v52  ;;  %v1594_v55 = vmul.f32 %v3483_v49, %v3483_v49 }
 0x26c   :  { %v1765_v30 = vadd.f32 %v1764_v61, %v1589_v10  ;;  %v1595_v10 = vmul.f32 %v3499_v25, %v3499_v25  ;;  %v1596_v52 = vmul.f32 %v3501_v9, %v3501_v9 }
 0x26d   :  { %v1363_v34 = vadd.f32 %v1362_v0, %v3445_v3  ;;  %v1467_v23 = vadd.f32 %v1466_v59, %v3465_v24  ;;  %v1869_v0 = vadd.f32 %v1868_v27, %v1592_v18  ;;  %v3869_v5 = vpop.f32.mrf.mxu2  ;;  %v1598_v18 = vmul.f32 %v3517_v13, %v3517_v13 }
 0x26e   :  { %v1766_v11 = vadd.f32 %v1765_v30, %v1591_v42  ;;  %v3871_v12 = vpop.f32.mrf.mxu3  ;;  %v1597_v42 = vmul.f32 %v3515_v6, %v3515_v6 }
 0x26f   :  { %v3857_v38 = vpop.f32.mrf.mxu0  ;;  %v3859_v50 = vpop.f32.mrf.mxu1  ;;  %v1364_v26 = vadd.f32 %v1363_v34, %v3463_v45  ;;  %v1468_v61 = vadd.f32 %v1467_v23, %v3483_v49  ;;  %7049 = vst [vmem:[#allocation138_spill] sm:$0xff] %v3871_v12  ;;  %v1870_v34 = vadd.f32 %v1869_v0, %v1594_v55  ;;  %v7051_v49 = vld [vmem:[#allocation76_spill] sm:$0xff]  ;;  %v7052_v45 = vld [vmem:[#allocation79_spill] sm:$0xff] }
 0x270   :  { %7047 = vst [vmem:[#allocation136_spill] sm:$0xff] %v3857_v38  ;;  %v1767_v3 = vadd.f32 %v1766_v11, %v1593_v17  ;;  %v1600_v24 = vmul.f32 %v7051_v49, %v7051_v49  ;;  %v1601_v62 = vmul.f32 %v7052_v45, %v7052_v45 }
 0x271   :  { %7048 = vst [vmem:[#allocation137_spill] sm:$0xff] %v3859_v50  ;;  %v1365_v14 = vadd.f32 %v1364_v26, %v3481_v36  ;;  %v1469_v30 = vadd.f32 %v1468_v61, %v3501_v9  ;;  %v1871_v26 = vadd.f32 %v1870_v34, %v1596_v52  ;;  %v7050_v36 = vld [vmem:[#allocation75_spill] sm:$0xff] }
 0x272   :  { %v1768_v27 = vadd.f32 %v1767_v3, %v1595_v10  ;;  %v1599_v23 = vmul.f32 %v7050_v36, %v7050_v36 }
 0x273   :  { %v1366_v59 = vadd.f32 %v1365_v14, %v3499_v25  ;;  %v1470_v55 = vadd.f32 %v1469_v30, %v3517_v13  ;;  %v1872_v0 = vadd.f32 %v1871_v26, %v1598_v18  ;;  %v7053_v14 = vld [vmem:[#allocation80_spill] sm:$0xff] }
 0x274   :  { %v1769_v11 = vadd.f32 %v1768_v27, %v1597_v42  ;;  %v1602_v61 = vmul.f32 %v7053_v14, %v7053_v14  ;;  %v7057_v18 = vld [vmem:[#allocation84_spill] sm:$0xff] }
 0x275   :  { %v1367_v17 = vadd.f32 %v1366_v59, %v3515_v6  ;;  %v1471_v34 = vadd.f32 %v1470_v55, %v7051_v49  ;;  %v1873_v59 = vadd.f32 %v1872_v0, %v1600_v24  ;;  %v7056_v6 = vld [vmem:[#allocation83_spill] sm:$0xff]  ;;  %v1604_v30 = vmul.f32 %v7057_v18, %v7057_v18  ;;  %v3901_v13 = vpop.f32.mrf.mxu2  ;;  %v7059_v24 = vld [vmem:[#allocation88_spill] sm:$0xff] }
 0x276   :  { %v1770_v9 = vadd.f32 %v1769_v11, %v1599_v23  ;;  %v1603_v42 = vmul.f32 %v7056_v6, %v7056_v6  ;;  %v3903_v25 = vpop.f32.mrf.mxu3  ;;  %v1606_v55 = vmul.f32 %v7059_v24, %v7059_v24 }
 0x277   :  { %v3889_v3 = vpop.f32.mrf.mxu0  ;;  %v3891_v10 = vpop.f32.mrf.mxu1  ;;  %v1368_v52 = vadd.f32 %v1367_v17, %v7050_v36  ;;  %v1472_v26 = vadd.f32 %v1471_v34, %v7053_v14  ;;  %v1874_v17 = vadd.f32 %v1873_v59, %v1602_v61  ;;  %v7058_v36 = vld [vmem:[#allocation87_spill] sm:$0xff]  ;;  %v7061_v14 = vld [vmem:[#allocation92_spill] sm:$0xff] }
 0x278   :  { %7054 = vst [vmem:[#allocation139_spill] sm:$0xff] %v3889_v3  ;;  %v1771_v28 = vadd.f32 %v1770_v9, %v1601_v62  ;;  %v1605_v23 = vmul.f32 %v7058_v36, %v7058_v36  ;;  %v1608_v54 = vmul.f32 %v7061_v14, %v7061_v14 }
 0x279   :  { %7055 = vst [vmem:[#allocation140_spill] sm:$0xff] %v3891_v10  ;;  %v1369_v27 = vadd.f32 %v1368_v52, %v7052_v45  ;;  %v1473_v0 = vadd.f32 %v1472_v26, %v7057_v18  ;;  %v1875_v52 = vadd.f32 %v1874_v17, %v1604_v30  ;;  %v7060_v45 = vld [vmem:[#allocation91_spill] sm:$0xff] }
 0x27a   :  { %v1772_v49 = vadd.f32 %v1771_v28, %v1603_v42  ;;  %v1607_v34 = vmul.f32 %v7060_v45, %v7060_v45 }
 0x27b   :  { %v1370_v11 = vadd.f32 %v1369_v27, %v7056_v6  ;;  %v1474_v9 = vadd.f32 %v1473_v0, %v7059_v24  ;;  %v1876_v59 = vadd.f32 %v1875_v52, %v1606_v55  ;;  %v7063_v27 = vld [vmem:[#allocation96_spill] sm:$0xff] }
 0x27c   :  { %v1773_v61 = vadd.f32 %v1772_v49, %v1605_v23  ;;  %v1610_v26 = vmul.f32 %v7063_v27, %v7063_v27  ;;  %v7067_v23 = vld [vmem:[#allocation100_spill] sm:$0xff] }
 0x27d   :  { %v1371_v62 = vadd.f32 %v1370_v11, %v7058_v36  ;;  %v1475_v17 = vadd.f32 %v1474_v9, %v7061_v14  ;;  %v1877_v11 = vadd.f32 %v1876_v59, %v1608_v54  ;;  %v7066_v36 = vld [vmem:[#allocation99_spill] sm:$0xff]  ;;  %v1612_v55 = vmul.f32 %v7067_v23, %v7067_v23  ;;  %v3933_v24 = vpop.f32.mrf.mxu2  ;;  %v7070_v54 = vld [vmem:[#allocation104_spill] sm:$0xff] }
 0x27e   :  { %v1774_v18 = vadd.f32 %v1773_v61, %v1607_v34  ;;  %v1611_v49 = vmul.f32 %v7066_v36, %v7066_v36  ;;  %v3935_v6 = vpop.f32.mrf.mxu3  ;;  %v1614_v9 = vmul.f32 %v7070_v54, %v7070_v54 }
 0x27f   :  { %v3921_v28 = vpop.f32.mrf.mxu0  ;;  %v3923_v42 = vpop.f32.mrf.mxu1  ;;  %v1372_v30 = vadd.f32 %v1371_v62, %v7060_v45  ;;  %v1476_v52 = vadd.f32 %v1475_v17, %v7063_v27  ;;  %7068 = vst [vmem:[#allocation143_spill] sm:$0xff] %v3935_v6  ;;  %v1878_v62 = vadd.f32 %v1877_v11, %v1610_v26  ;;  %v7069_v45 = vld [vmem:[#allocation103_spill] sm:$0xff]  ;;  %v7072_v27 = vld [vmem:[#allocation108_spill] sm:$0xff] }
 0x280   :  { %7064 = vst [vmem:[#allocation141_spill] sm:$0xff] %v3921_v28  ;;  %v1775_v19 = vadd.f32 %v1774_v18, %v1609_v22  ;;  %v1613_v34 = vmul.f32 %v7069_v45, %v7069_v45  ;;  %v1616_v2 = vmul.f32 %v7072_v27, %v7072_v27 }
 0x281   :  { %7065 = vst [vmem:[#allocation142_spill] sm:$0xff] %v3923_v42  ;;  %v1373_v0 = vadd.f32 %v1372_v30, %v7062_v53  ;;  %v1477_v59 = vadd.f32 %v1476_v52, %v7067_v23  ;;  %v1879_v30 = vadd.f32 %v1878_v62, %v1612_v55  ;;  %v7071_v53 = vld [vmem:[#allocation107_spill] sm:$0xff] }
 0x282   :  { %v1776_v14 = vadd.f32 %v1775_v19, %v1611_v49  ;;  %v1615_v17 = vmul.f32 %v7071_v53, %v7071_v53 }
 0x283   :  { %v1374_v61 = vadd.f32 %v1373_v0, %v7066_v36  ;;  %v1478_v18 = vadd.f32 %v1477_v59, %v7070_v54  ;;  %v1880_v11 = vadd.f32 %v1879_v30, %v1614_v9  ;;  %v7074_v0 = vld [vmem:[#allocation112_spill] sm:$0xff] }
 0x284   :  { %v1777_v26 = vadd.f32 %v1776_v14, %v1613_v34  ;;  %v1618_v52 = vmul.f32 %v7074_v0, %v7074_v0  ;;  %v7078_v34 = vld [vmem:[#allocation116_spill] sm:$0xff] }
 0x285   :  { %v1375_v22 = vadd.f32 %v1374_v61, %v7069_v45  ;;  %v1479_v62 = vadd.f32 %v1478_v18, %v7072_v27  ;;  %v1881_v61 = vadd.f32 %v1880_v11, %v1616_v2  ;;  %v7077_v45 = vld [vmem:[#allocation115_spill] sm:$0xff]  ;;  %v1620_v9 = vmul.f32 %v7078_v34, %v7078_v34 }
 0x286   :  { %v1778_v23 = vadd.f32 %v1777_v26, %v1615_v17  ;;  %v1619_v14 = vmul.f32 %v7077_v45, %v7077_v45  ;;  %v3971_v26 = vpop.f32.mrf.mxu2  ;;  %v3973_v11 = vpop.f32.mrf.mxu3 }
 0x287   :  { %v3953_v19 = vpop.f32.mrf.mxu0  ;;  %v3955_v49 = vpop.f32.mrf.mxu1  ;;  %v1376_v55 = vadd.f32 %v1375_v22, %v7071_v53  ;;  %v1480_v30 = vadd.f32 %v1479_v62, %v7074_v0  ;;  %v1882_v36 = vadd.f32 %v1881_v61, %v1618_v52  ;;  %v7080_v22 = vld [vmem:[#allocation120_spill] sm:$0xff] }
 0x288   :  { %7075 = vst [vmem:[#allocation144_spill] sm:$0xff] %v3953_v19  ;;  %v1779_v54 = vadd.f32 %v1778_v23, %v1617_v41  ;;  %v1622_v18 = vmul.f32 %v7080_v22, %v7080_v22  ;;  %v7082_v23 = vld [vmem:[#allocation124_spill] sm:$0xff] }
 0x289   :  { %7076 = vst [vmem:[#allocation145_spill] sm:$0xff] %v3955_v49  ;;  %v1377_v59 = vadd.f32 %v1376_v55, %v7073_v63  ;;  %v1481_v17 = vadd.f32 %v1480_v30, %v7078_v34  ;;  %v1883_v55 = vadd.f32 %v1882_v36, %v1620_v9  ;;  %v7081_v63 = vld [vmem:[#allocation123_spill] sm:$0xff]  ;;  %v1624_v52 = vmul.f32 %v7082_v23, %v7082_v23 }
 0x28a   :  { %v1780_v27 = vadd.f32 %v1779_v54, %v1619_v14  ;;  %v1623_v41 = vmul.f32 %v7081_v63, %v7081_v63  ;;  %v1625_v30 = vmul.f32 %v3721_v46, %v3721_v46  ;;  %v1626_v34 = vmul.f32 %v3723_v31, %v3723_v31 }
 0x28b   :  { %v1378_v2 = vadd.f32 %v1377_v59, %v7077_v45  ;;  %v1482_v61 = vadd.f32 %v1481_v17, %v7080_v22  ;;  %v1884_v59 = vadd.f32 %v1883_v55, %v1622_v18 }
 0x28c   :  { %v1781_v0 = vadd.f32 %v1780_v27, %v1621_v21  ;;  %v1627_v21 = vmul.f32 %v3755_v51, %v3755_v51  ;;  %v1628_v27 = vmul.f32 %v3757_v16, %v3757_v16 }
 0x28d   :  { %v1379_v62 = vadd.f32 %v1378_v2, %v7079_v40  ;;  %v1483_v9 = vadd.f32 %v1482_v61, %v7082_v23  ;;  %v1885_v2 = vadd.f32 %v1884_v59, %v1624_v52  ;;  %v1629_v40 = vmul.f32 %v3789_v15, %v3789_v15 }
 0x28e   :  { %v1782_v45 = vadd.f32 %v1781_v0, %v1623_v41  ;;  %v1631_v59 = vmul.f32 %v3823_v60, %v3823_v60 }
 0x28f   :  { %v3985_v54 = vpop.f32.mrf.mxu0  ;;  %v3987_v36 = vpop.f32.mrf.mxu1  ;;  %v1380_v14 = vadd.f32 %v1379_v62, %v7081_v63  ;;  %v1484_v17 = vadd.f32 %v1483_v9, %v3723_v31  ;;  %v1886_v22 = vadd.f32 %v1885_v2, %v1626_v34  ;;  %v1630_v62 = vmul.f32 %v3791_v43, %v3791_v43  ;;  %v7154_v63 = vld [vmem:[#allocation125_spill] sm:$0xff] }
 0x290   :  { %7083 = vst [vmem:[#allocation146_spill] sm:$0xff] %v3985_v54  ;;  %v1783_v55 = vadd.f32 %v1782_v45, %v1625_v30  ;;  %v4009_v30 = vpop.f32.mrf.mxu2  ;;  %v4011_v9 = vpop.f32.mrf.mxu3  ;;  %v1705_v53 = vmul.f32 %v7154_v63, %v7154_v63 }
 0x291   :  { %7084 = vst [vmem:[#allocation147_spill] sm:$0xff] %v3987_v36  ;;  %v1381_v18 = vadd.f32 %v1380_v14, %v3721_v46  ;;  %v1485_v41 = vadd.f32 %v1484_v17, %v3757_v16  ;;  %v1887_v61 = vadd.f32 %v1886_v22, %v1628_v27  ;;  %v1632_v14 = vmul.f32 %v3825_v4, %v3825_v4  ;;  %v7142_v46 = vld [vmem:[#allocation105_spill] sm:$0xff] }
 0x292   :  { %v1784_v52 = vadd.f32 %v1783_v55, %v1627_v21  ;;  %v1633_v21 = vmul.f32 %v3857_v38, %v3857_v38  ;;  %v1634_v22 = vmul.f32 %v3859_v50, %v3859_v50  ;;  %v1695_v23 = vmul.f32 %v7142_v46, %v7142_v46 }
 0x293   :  { %v1382_v0 = vadd.f32 %v1381_v18, %v3755_v51  ;;  %v1486_v34 = vadd.f32 %v1485_v41, %v3791_v43  ;;  %v1888_v18 = vadd.f32 %v1887_v61, %v1630_v62  ;;  %v1636_v62 = vmul.f32 %v3891_v10, %v3891_v10 }
 0x294   :  { %v1785_v2 = vadd.f32 %v1784_v52, %v1629_v40  ;;  %v1635_v40 = vmul.f32 %v3889_v3, %v3889_v3  ;;  %v1637_v51 = vmul.f32 %v3921_v28, %v3921_v28 }
 0x295   :  { %v1383_v45 = vadd.f32 %v1382_v0, %v3789_v15  ;;  %v1487_v0 = vadd.f32 %v1486_v34, %v3825_v4  ;;  %v1889_v43 = vadd.f32 %v1888_v18, %v1632_v14  ;;  %v1639_v18 = vmul.f32 %v3953_v19, %v3953_v19 }
 0x296   :  { %v1786_v41 = vadd.f32 %v1785_v2, %v1631_v59 }
 0x297   :  { %v4017_v27 = vpop.f32.mrf.mxu0  ;;  %v4019_v17 = vpop.f32.mrf.mxu1  ;;  %v1384_v55 = vadd.f32 %v1383_v45, %v3823_v60  ;;  %v1488_v61 = vadd.f32 %v1487_v0, %v3859_v50  ;;  %v1890_v16 = vadd.f32 %v1889_v43, %v1634_v22  ;;  %v1638_v45 = vmul.f32 %v3923_v42, %v3923_v42  ;;  %v7130_v60 = vld [vmem:[#allocation85_spill] sm:$0xff] }
 0x298   :  { %7085 = vst [vmem:[#allocation148_spill] sm:$0xff] %v4017_v27  ;;  %v1787_v15 = vadd.f32 %v1786_v41, %v1633_v21  ;;  %v1641_v41 = vmul.f32 %v3985_v54, %v3985_v54  ;;  %v1685_v31 = vmul.f32 %v7130_v60, %v7130_v60 }
 0x299   :  { %7086 = vst [vmem:[#allocation149_spill] sm:$0xff] %v4019_v17  ;;  %v1385_v52 = vadd.f32 %v1384_v55, %v3857_v38  ;;  %v1489_v14 = vadd.f32 %v1488_v61, %v3891_v10  ;;  %v1891_v2 = vadd.f32 %v1890_v16, %v1636_v62  ;;  %v1640_v55 = vmul.f32 %v3955_v49, %v3955_v49  ;;  %v4051_v61 = vpop.f32.mrf.mxu2  ;;  %v7118_v38 = vld [vmem:[#allocation65_spill] sm:$0xff] }
 0x29a   :  { %v1788_v34 = vadd.f32 %v1787_v15, %v1635_v40  ;;  %v1675_v4 = vmul.f32 %v7118_v38, %v7118_v38 }
 0x29b   :  { %v1386_v59 = vadd.f32 %v1385_v52, %v3889_v3  ;;  %v1490_v21 = vadd.f32 %v1489_v14, %v3923_v42  ;;  %v1892_v0 = vadd.f32 %v1891_v2, %v1638_v45  ;;  %v1642_v52 = vmul.f32 %v3987_v36, %v3987_v36  ;;  %v7108_v3 = vld [vmem:[#allocation45_spill] sm:$0xff] }
 0x29c   :  { %v1789_v22 = vadd.f32 %v1788_v34, %v1637_v51  ;;  %v1643_v14 = vmul.f32 %v4017_v27, %v4017_v27  ;;  %v1644_v34 = vmul.f32 %v4019_v17, %v4019_v17  ;;  %v1665_v50 = vmul.f32 %v7108_v3, %v7108_v3 }
 0x29d   :  { %v1387_v43 = vadd.f32 %v1386_v59, %v3921_v28  ;;  %v1491_v62 = vadd.f32 %v1490_v21, %v3955_v49  ;;  %v4053_v59 = vpop.f32.mrf.mxu3  ;;  %v1893_v45 = vadd.f32 %v1892_v0, %v1640_v55 }
 0x29e   :  { %v1790_v51 = vadd.f32 %v1789_v22, %v1639_v18 }
 0x29f   :  { %v4045_v15 = vpop.f32.mrf.mxu0  ;;  %v4047_v16 = vpop.f32.mrf.mxu1  ;;  %v1388_v40 = vadd.f32 %v1387_v43, %v3953_v19  ;;  %v1492_v42 = vadd.f32 %v1491_v62, %v3987_v36  ;;  %v1894_v43 = vadd.f32 %v1893_v45, %v1642_v52  ;;  %v7097_v36 = vld [vmem:[#allocation25_spill] sm:$0xff] }
 0x2a0   :  { %7087 = vst [vmem:[#allocation150_spill] sm:$0xff] %v4045_v15  ;;  %v1791_v28 = vadd.f32 %v1790_v51, %v1641_v41  ;;  %v1645_v21 = vmul.f32 %v4045_v15, %v4045_v15  ;;  %v1646_v49 = vmul.f32 %v4047_v16, %v4047_v16  ;;  %v1655_v10 = vmul.f32 %v7097_v36, %v7097_v36 }
 0x2a1   :  { %7088 = vst [vmem:[#allocation151_spill] sm:$0xff] %v4047_v16  ;;  %v1389_v2 = vadd.f32 %v1388_v40, %v3985_v54  ;;  %v1493_v55 = vadd.f32 %v1492_v42, %v4019_v17  ;;  %v1895_v0 = vadd.f32 %v1894_v43, %v1644_v34  ;;  %v7091_v42 = vld [vmem:[#allocation13_spill] sm:$0xff]  ;;  %v7092_v34 = vld [vmem:[#allocation14_spill] sm:$0xff] }
 0x2a2   :  { %v1792_v22 = vadd.f32 %v1791_v28, %v1643_v14  ;;  %v1649_v14 = vmul.f32 %v7091_v42, %v7091_v42 }
 0x2a3   :  { %v1390_v18 = vadd.f32 %v1389_v2, %v4017_v27  ;;  %v1494_v40 = vadd.f32 %v1493_v55, %v4047_v16  ;;  %v1896_v62 = vadd.f32 %v1895_v0, %v1646_v49  ;;  %v1650_v49 = vmul.f32 %v7092_v34, %v7092_v34  ;;  %v4085_v55 = vpop.f32.mrf.mxu2  ;;  %v7093_v0 = vld [vmem:[#allocation17_spill] sm:$0xff] }
 0x2a4   :  { %v1793_v54 = vadd.f32 %v1792_v22, %v1645_v21 }
 0x2a5   :  { %v1391_v19 = vadd.f32 %v1390_v18, %v4045_v15  ;;  %v4087_v22 = vpop.f32.mrf.mxu3 }
 0x2a7   :  { %v4069_v41 = vpop.f32.mrf.mxu0  ;;  %v4071_v52 = vpop.f32.mrf.mxu1 }
 0x2a8   :  { %7089 = vst [vmem:[#allocation152_spill] sm:$0xff] %v4069_v41  ;;  %v1392_v51 = vadd.f32 %v1391_v19, %v4069_v41  ;;  %v1647_v45 = vmul.f32 %v4069_v41, %v4069_v41  ;;  %v1495_v2 = vadd.f32 %v1494_v40, %v4071_v52  ;;  %v1648_v28 = vmul.f32 %v4071_v52, %v4071_v52 }
 0x2a9   :  { %7090 = vst [vmem:[#allocation153_spill] sm:$0xff] %v4071_v52  ;;  %v1651_v40 = vmul.f32 %v7093_v0, %v7093_v0  ;;  %v7094_v52 = vld [vmem:[#allocation18_spill] sm:$0xff] }
 0x2aa   :  { %v1393_v43 = vadd.f32 %v1392_v51, %v7091_v42  ;;  %v1794_v21 = vadd.f32 %v1793_v54, %v1647_v45  ;;  %v1496_v18 = vadd.f32 %v1495_v2, %v7092_v34  ;;  %v1897_v19 = vadd.f32 %v1896_v62, %v1648_v28  ;;  %v7095_v54 = vld [vmem:[#allocation21_spill] sm:$0xff]  ;;  %v7096_v62 = vld [vmem:[#allocation22_spill] sm:$0xff] }
 0x2ab   :  { %v1652_v41 = vmul.f32 %v7094_v52, %v7094_v52  ;;  %v1653_v45 = vmul.f32 %v7095_v54, %v7095_v54  ;;  %v1654_v2 = vmul.f32 %v7096_v62, %v7096_v62 }
 0x2ac   :  { %v1394_v16 = vadd.f32 %v1393_v43, %v7093_v0  ;;  %v1795_v15 = vadd.f32 %v1794_v21, %v1649_v14  ;;  %v1497_v17 = vadd.f32 %v1496_v18, %v7094_v52  ;;  %v1898_v51 = vadd.f32 %v1897_v19, %v1650_v49  ;;  %v7098_v43 = vld [vmem:[#allocation26_spill] sm:$0xff]  ;;  %v7099_v52 = vld [vmem:[#allocation29_spill] sm:$0xff] }
 0x2ad   :  { %v1656_v14 = vmul.f32 %v7098_v43, %v7098_v43  ;;  %v1657_v0 = vmul.f32 %v7099_v52, %v7099_v52 }
 0x2ae   :  { %v1395_v28 = vadd.f32 %v1394_v16, %v7095_v54  ;;  %v1796_v34 = vadd.f32 %v1795_v15, %v1651_v40  ;;  %v1498_v42 = vadd.f32 %v1497_v17, %v7096_v62  ;;  %v1899_v27 = vadd.f32 %v1898_v51, %v1652_v41  ;;  %v7100_v16 = vld [vmem:[#allocation30_spill] sm:$0xff]  ;;  %v7101_v62 = vld [vmem:[#allocation33_spill] sm:$0xff] }
 0x2af   :  { %v1658_v15 = vmul.f32 %v7100_v16, %v7100_v16  ;;  %v1659_v54 = vmul.f32 %v7101_v62, %v7101_v62 }
 0x2b0   :  { %v1396_v49 = vadd.f32 %v1395_v28, %v7097_v36  ;;  %v1797_v21 = vadd.f32 %v1796_v34, %v1653_v45  ;;  %v1499_v18 = vadd.f32 %v1498_v42, %v7098_v43  ;;  %v1900_v19 = vadd.f32 %v1899_v27, %v1654_v2  ;;  %v7102_v28 = vld [vmem:[#allocation34_spill] sm:$0xff]  ;;  %v4119_v43 = vpop.f32.mrf.mxu2  ;;  %v4121_v36 = vpop.f32.mrf.mxu3 }
 0x2b1   :  { %v1660_v34 = vmul.f32 %v7102_v28, %v7102_v28  ;;  %7103 = vst [vmem:[#allocation154_spill] sm:$0xff] %v4121_v36 }
 0x2b2   :  { %v1397_v17 = vadd.f32 %v1396_v49, %v7099_v52  ;;  %v1798_v41 = vadd.f32 %v1797_v21, %v1655_v10  ;;  %v1500_v40 = vadd.f32 %v1499_v18, %v7100_v16  ;;  %v1901_v51 = vadd.f32 %v1900_v19, %v1656_v14  ;;  %v7104_v10 = vld [vmem:[#allocation37_spill] sm:$0xff]  ;;  %v7105_v14 = vld [vmem:[#allocation38_spill] sm:$0xff] }
 0x2b3   :  { %v1661_v49 = vmul.f32 %v7104_v10, %v7104_v10  ;;  %v1662_v21 = vmul.f32 %v7105_v14, %v7105_v14 }
 0x2b4   :  { %v1398_v27 = vadd.f32 %v1397_v17, %v7101_v62  ;;  %v1799_v42 = vadd.f32 %v1798_v41, %v1657_v0  ;;  %v1501_v45 = vadd.f32 %v1500_v40, %v7102_v28  ;;  %v1902_v2 = vadd.f32 %v1901_v51, %v1658_v15  ;;  %v7106_v0 = vld [vmem:[#allocation41_spill] sm:$0xff]  ;;  %v7107_v15 = vld [vmem:[#allocation42_spill] sm:$0xff] }
 0x2b5   :  { %v1663_v41 = vmul.f32 %v7106_v0, %v7106_v0  ;;  %v1664_v40 = vmul.f32 %v7107_v15, %v7107_v15 }
 0x2b6   :  { %v1399_v18 = vadd.f32 %v1398_v27, %v7104_v10  ;;  %v1800_v19 = vadd.f32 %v1799_v42, %v1659_v54  ;;  %v1502_v16 = vadd.f32 %v1501_v45, %v7105_v14  ;;  %v1903_v17 = vadd.f32 %v1902_v2, %v1660_v34  ;;  %v7109_v27 = vld [vmem:[#allocation46_spill] sm:$0xff]  ;;  %v7110_v14 = vld [vmem:[#allocation49_spill] sm:$0xff] }
 0x2b7   :  { %v1666_v54 = vmul.f32 %v7109_v27, %v7109_v27  ;;  %v1667_v10 = vmul.f32 %v7110_v14, %v7110_v14 }
 0x2b8   :  { %v1400_v51 = vadd.f32 %v1399_v18, %v7106_v0  ;;  %v1801_v28 = vadd.f32 %v1800_v19, %v1661_v49  ;;  %v1503_v62 = vadd.f32 %v1502_v16, %v7107_v15  ;;  %v1904_v52 = vadd.f32 %v1903_v17, %v1662_v21  ;;  %v7111_v18 = vld [vmem:[#allocation50_spill] sm:$0xff]  ;;  %v7112_v15 = vld [vmem:[#allocation53_spill] sm:$0xff] }
 0x2b9   :  { %v1668_v49 = vmul.f32 %v7111_v18, %v7111_v18  ;;  %v1669_v0 = vmul.f32 %v7112_v15, %v7112_v15 }
 0x2ba   :  { %v1401_v34 = vadd.f32 %v1400_v51, %v7108_v3  ;;  %v1802_v42 = vadd.f32 %v1801_v28, %v1663_v41  ;;  %v1504_v45 = vadd.f32 %v1503_v62, %v7109_v27  ;;  %v1905_v2 = vadd.f32 %v1904_v52, %v1664_v40  ;;  %v7113_v51 = vld [vmem:[#allocation54_spill] sm:$0xff]  ;;  %v4153_v27 = vpop.f32.mrf.mxu2  ;;  %v4155_v3 = vpop.f32.mrf.mxu3 }
 0x2bb   :  { %v1670_v28 = vmul.f32 %v7113_v51, %v7113_v51 }
 0x2bc   :  { %v1402_v16 = vadd.f32 %v1401_v34, %v7110_v14  ;;  %v1803_v21 = vadd.f32 %v1802_v42, %v1665_v50  ;;  %v1505_v19 = vadd.f32 %v1504_v45, %v7111_v18  ;;  %v1906_v17 = vadd.f32 %v1905_v2, %v1666_v54  ;;  %v7114_v50 = vld [vmem:[#allocation57_spill] sm:$0xff]  ;;  %v7115_v54 = vld [vmem:[#allocation58_spill] sm:$0xff] }
 0x2bd   :  { %v1671_v34 = vmul.f32 %v7114_v50, %v7114_v50  ;;  %v1672_v42 = vmul.f32 %v7115_v54, %v7115_v54 }
 0x2be   :  { %v1403_v52 = vadd.f32 %v1402_v16, %v7112_v15  ;;  %v1804_v62 = vadd.f32 %v1803_v21, %v1667_v10  ;;  %v1506_v41 = vadd.f32 %v1505_v19, %v7113_v51  ;;  %v1907_v40 = vadd.f32 %v1906_v17, %v1668_v49  ;;  %v7116_v10 = vld [vmem:[#allocation61_spill] sm:$0xff]  ;;  %v7117_v49 = vld [vmem:[#allocation62_spill] sm:$0xff] }
 0x2bf   :  { %v1673_v21 = vmul.f32 %v7116_v10, %v7116_v10  ;;  %v1674_v19 = vmul.f32 %v7117_v49, %v7117_v49 }
 0x2c0   :  { %v1404_v45 = vadd.f32 %v1403_v52, %v7114_v50  ;;  %v1805_v2 = vadd.f32 %v1804_v62, %v1669_v0  ;;  %v1507_v18 = vadd.f32 %v1506_v41, %v7115_v54  ;;  %v1908_v16 = vadd.f32 %v1907_v40, %v1670_v28  ;;  %v7119_v52 = vld [vmem:[#allocation66_spill] sm:$0xff]  ;;  %v7120_v54 = vld [vmem:[#allocation69_spill] sm:$0xff] }
 0x2c1   :  { %v1676_v0 = vmul.f32 %v7119_v52, %v7119_v52  ;;  %v1677_v50 = vmul.f32 %v7120_v54, %v7120_v54 }
 0x2c2   :  { %v1405_v17 = vadd.f32 %v1404_v45, %v7116_v10  ;;  %v1806_v51 = vadd.f32 %v1805_v2, %v1671_v34  ;;  %v1508_v15 = vadd.f32 %v1507_v18, %v7117_v49  ;;  %v1909_v14 = vadd.f32 %v1908_v16, %v1672_v42  ;;  %v7121_v45 = vld [vmem:[#allocation70_spill] sm:$0xff]  ;;  %v7122_v49 = vld [vmem:[#allocation73_spill] sm:$0xff] }
 0x2c3   :  { %v1678_v34 = vmul.f32 %v7121_v45, %v7121_v45  ;;  %v1679_v10 = vmul.f32 %v7122_v49, %v7122_v49 }
 0x2c4   :  { %v1406_v28 = vadd.f32 %v1405_v17, %v7118_v38  ;;  %v1807_v62 = vadd.f32 %v1806_v51, %v1673_v21  ;;  %v1509_v41 = vadd.f32 %v1508_v15, %v7119_v52  ;;  %v1910_v40 = vadd.f32 %v1909_v14, %v1674_v19  ;;  %v7123_v17 = vld [vmem:[#allocation74_spill] sm:$0xff]  ;;  %v4187_v52 = vpop.f32.mrf.mxu2  ;;  %v4189_v38 = vpop.f32.mrf.mxu3 }
 0x2c5   :  { %v1680_v51 = vmul.f32 %v7123_v17, %v7123_v17  ;;  %7124 = vst [vmem:[#allocation155_spill] sm:$0xff] %v4187_v52 }
 0x2c6   :  { %v1407_v18 = vadd.f32 %v1406_v28, %v7120_v54  ;;  %v1808_v42 = vadd.f32 %v1807_v62, %v1675_v4  ;;  %v1510_v2 = vadd.f32 %v1509_v41, %v7121_v45  ;;  %v1911_v16 = vadd.f32 %v1910_v40, %v1676_v0  ;;  %7125 = vst [vmem:[#allocation156_spill] sm:$0xff] %v4189_v38  ;;  %v7126_v4 = vld [vmem:[#allocation77_spill] sm:$0xff]  ;;  %v7127_v0 = vld [vmem:[#allocation78_spill] sm:$0xff] }
 0x2c7   :  { %v1681_v28 = vmul.f32 %v7126_v4, %v7126_v4  ;;  %v1682_v62 = vmul.f32 %v7127_v0, %v7127_v0 }
 0x2c8   :  { %v1408_v14 = vadd.f32 %v1407_v18, %v7122_v49  ;;  %v1809_v15 = vadd.f32 %v1808_v42, %v1677_v50  ;;  %v1511_v21 = vadd.f32 %v1510_v2, %v7123_v17  ;;  %v1912_v19 = vadd.f32 %v1911_v16, %v1678_v34  ;;  %v7128_v50 = vld [vmem:[#allocation81_spill] sm:$0xff]  ;;  %v7129_v34 = vld [vmem:[#allocation82_spill] sm:$0xff] }
 0x2c9   :  { %v1683_v42 = vmul.f32 %v7128_v50, %v7128_v50  ;;  %v1684_v2 = vmul.f32 %v7129_v34, %v7129_v34 }
 0x2ca   :  { %v1409_v41 = vadd.f32 %v1408_v14, %v7126_v4  ;;  %v1810_v40 = vadd.f32 %v1809_v15, %v1679_v10  ;;  %v1512_v45 = vadd.f32 %v1511_v21, %v7127_v0  ;;  %v1913_v18 = vadd.f32 %v1912_v19, %v1680_v51  ;;  %v7131_v14 = vld [vmem:[#allocation86_spill] sm:$0xff]  ;;  %v7132_v0 = vld [vmem:[#allocation89_spill] sm:$0xff] }
 0x2cb   :  { %v1686_v10 = vmul.f32 %v7131_v14, %v7131_v14  ;;  %v1687_v4 = vmul.f32 %v7132_v0, %v7132_v0 }
 0x2cc   :  { %v1410_v16 = vadd.f32 %v1409_v41, %v7128_v50  ;;  %v1811_v17 = vadd.f32 %v1810_v40, %v1681_v28  ;;  %v1513_v49 = vadd.f32 %v1512_v45, %v7129_v34  ;;  %v1914_v54 = vadd.f32 %v1913_v18, %v1682_v62  ;;  %v7133_v41 = vld [vmem:[#allocation90_spill] sm:$0xff]  ;;  %v7134_v34 = vld [vmem:[#allocation93_spill] sm:$0xff]  ;;  %v4223_v50 = vpop.f32.mrf.mxu3 }
 0x2cd   :  { %v1688_v28 = vmul.f32 %v7133_v41, %v7133_v41  ;;  %7137 = vst [vmem:[#allocation158_spill] sm:$0xff] %v4223_v50 }
 0x2ce   :  { %v1812_v15 = vadd.f32 %v1811_v17, %v1683_v42  ;;  %v1915_v51 = vadd.f32 %v1914_v54, %v1684_v2  ;;  %v1411_v21 = vadd.f32 %v1410_v16, %v7130_v60  ;;  %v1514_v19 = vadd.f32 %v1513_v49, %v7131_v14  ;;  %v7135_v54 = vld [vmem:[#allocation94_spill] sm:$0xff]  ;;  %v4221_v60 = vpop.f32.mrf.mxu2 }
 0x2cf   :  { %v1689_v17 = vmul.f32 %v7134_v34, %v7134_v34  ;;  %v1690_v42 = vmul.f32 %v7135_v54, %v7135_v54  ;;  %7136 = vst [vmem:[#allocation157_spill] sm:$0xff] %v4221_v60 }
 0x2d0   :  { %v1412_v45 = vadd.f32 %v1411_v21, %v7132_v0  ;;  %v1813_v62 = vadd.f32 %v1812_v15, %v1685_v31  ;;  %v1515_v40 = vadd.f32 %v1514_v19, %v7133_v41  ;;  %v1916_v18 = vadd.f32 %v1915_v51, %v1686_v10  ;;  %v7138_v31 = vld [vmem:[#allocation97_spill] sm:$0xff]  ;;  %v7139_v10 = vld [vmem:[#allocation98_spill] sm:$0xff] }
 0x2d1   :  { %v1691_v15 = vmul.f32 %v7138_v31, %v7138_v31  ;;  %v1692_v51 = vmul.f32 %v7139_v10, %v7139_v10 }
 0x2d2   :  { %v1413_v49 = vadd.f32 %v1412_v45, %v7134_v34  ;;  %v1814_v2 = vadd.f32 %v1813_v62, %v1687_v4  ;;  %v1516_v16 = vadd.f32 %v1515_v40, %v7135_v54  ;;  %v1917_v14 = vadd.f32 %v1916_v18, %v1688_v28  ;;  %v7140_v4 = vld [vmem:[#allocation101_spill] sm:$0xff]  ;;  %v7141_v28 = vld [vmem:[#allocation102_spill] sm:$0xff] }
 0x2d3   :  { %v1693_v62 = vmul.f32 %v7140_v4, %v7140_v4  ;;  %v1694_v40 = vmul.f32 %v7141_v28, %v7141_v28 }
 0x2d4   :  { %v1414_v21 = vadd.f32 %v1413_v49, %v7138_v31  ;;  %v1815_v19 = vadd.f32 %v1814_v2, %v1689_v17  ;;  %v1517_v41 = vadd.f32 %v1516_v16, %v7139_v10  ;;  %v1918_v45 = vadd.f32 %v1917_v14, %v1690_v42  ;;  %v7143_v49 = vld [vmem:[#allocation106_spill] sm:$0xff]  ;;  %v7144_v10 = vld [vmem:[#allocation109_spill] sm:$0xff] }
 0x2d5   :  { %v1696_v17 = vmul.f32 %v7143_v49, %v7143_v49  ;;  %v1697_v31 = vmul.f32 %v7144_v10, %v7144_v10 }
 0x2d6   :  { %v1415_v18 = vadd.f32 %v1414_v21, %v7140_v4  ;;  %v1816_v54 = vadd.f32 %v1815_v19, %v1691_v15  ;;  %v1518_v34 = vadd.f32 %v1517_v41, %v7141_v28  ;;  %v1919_v0 = vadd.f32 %v1918_v45, %v1692_v51  ;;  %v7145_v21 = vld [vmem:[#allocation110_spill] sm:$0xff]  ;;  %v7146_v28 = vld [vmem:[#allocation113_spill] sm:$0xff] }
 0x2d7   :  { %v1698_v15 = vmul.f32 %v7145_v21, %v7145_v21  ;;  %v1699_v4 = vmul.f32 %v7146_v28, %v7146_v28 }
 0x2d8   :  { %v1416_v14 = vadd.f32 %v1415_v18, %v7142_v46  ;;  %v1817_v42 = vadd.f32 %v1816_v54, %v1693_v62  ;;  %v1519_v2 = vadd.f32 %v1518_v34, %v7143_v49  ;;  %v1920_v16 = vadd.f32 %v1919_v0, %v1694_v40  ;;  %v7147_v18 = vld [vmem:[#allocation114_spill] sm:$0xff]  ;;  %v4255_v49 = vpop.f32.mrf.mxu2  ;;  %v4257_v46 = vpop.f32.mrf.mxu3 }
 0x2d9   :  { %v1700_v54 = vmul.f32 %v7147_v18, %v7147_v18  ;;  %7148 = vst [vmem:[#allocation159_spill] sm:$0xff] %v4255_v49 }
 0x2da   :  { %v1417_v41 = vadd.f32 %v1416_v14, %v7144_v10  ;;  %v1818_v51 = vadd.f32 %v1817_v42, %v1695_v23  ;;  %v1520_v19 = vadd.f32 %v1519_v2, %v7145_v21  ;;  %v1921_v45 = vadd.f32 %v1920_v16, %v1696_v17  ;;  %7149 = vst [vmem:[#allocation160_spill] sm:$0xff] %v4257_v46  ;;  %v7150_v23 = vld [vmem:[#allocation117_spill] sm:$0xff]  ;;  %v7151_v17 = vld [vmem:[#allocation118_spill] sm:$0xff] }
 0x2db   :  { %v1701_v14 = vmul.f32 %v7150_v23, %v7150_v23  ;;  %v1702_v42 = vmul.f32 %v7151_v17, %v7151_v17 }
 0x2dc   :  { %v1418_v0 = vadd.f32 %v1417_v41, %v7146_v28  ;;  %v1819_v34 = vadd.f32 %v1818_v51, %v1697_v31  ;;  %v1521_v62 = vadd.f32 %v1520_v19, %v7147_v18  ;;  %v1922_v40 = vadd.f32 %v1921_v45, %v1698_v15  ;;  %v7152_v31 = vld [vmem:[#allocation121_spill] sm:$0xff]  ;;  %v7153_v15 = vld [vmem:[#allocation122_spill] sm:$0xff] }
 0x2dd   :  { %v1703_v51 = vmul.f32 %v7152_v31, %v7152_v31  ;;  %v1704_v19 = vmul.f32 %v7153_v15, %v7153_v15 }
 0x2de   :  { %v1419_v2 = vadd.f32 %v1418_v0, %v7150_v23  ;;  %v1820_v16 = vadd.f32 %v1819_v34, %v1699_v4  ;;  %v1522_v21 = vadd.f32 %v1521_v62, %v7151_v17  ;;  %v1923_v41 = vadd.f32 %v1922_v40, %v1700_v54 }
 0x2df   :  { %v1706_v4 = vmul.f32 %v3705_v44, %v3705_v44  ;;  %v1707_v40 = vmul.f32 %v3733_v37, %v3733_v37 }
 0x2e0   :  { %v1420_v45 = vadd.f32 %v1419_v2, %v7152_v31  ;;  %v1821_v18 = vadd.f32 %v1820_v16, %v1701_v14  ;;  %v1523_v28 = vadd.f32 %v1522_v21, %v7153_v15  ;;  %v1924_v10 = vadd.f32 %v1923_v41, %v1702_v42 }
 0x2e1   :  { %v1708_v14 = vmul.f32 %v3739_v39, %v3739_v39  ;;  %v1709_v41 = vmul.f32 %v3767_v32, %v3767_v32 }
 0x2e2   :  { %v1421_v54 = vadd.f32 %v1420_v45, %v7154_v63  ;;  %v1822_v0 = vadd.f32 %v1821_v18, %v1703_v51  ;;  %v1524_v34 = vadd.f32 %v1523_v28, %v3705_v44  ;;  %v1925_v62 = vadd.f32 %v1924_v10, %v1704_v19  ;;  %v4289_v45 = vpop.f32.mrf.mxu2  ;;  %v4291_v44 = vpop.f32.mrf.mxu3 }
 0x2e3   :  { %v1710_v18 = vmul.f32 %v3773_v1, %v3773_v1  ;;  %7155 = vst [vmem:[#allocation117_spill] sm:$0xff] %v4289_v45 }
 0x2e4   :  { %v1422_v21 = vadd.f32 %v1421_v54, %v3733_v37  ;;  %v1823_v42 = vadd.f32 %v1822_v0, %v1705_v53  ;;  %v1525_v2 = vadd.f32 %v1524_v34, %v3739_v39  ;;  %v1926_v16 = vadd.f32 %v1925_v62, %v1706_v4  ;;  %7156 = vst [vmem:[#allocation118_spill] sm:$0xff] %v4291_v44 }
 0x2e5   :  { %v1711_v53 = vmul.f32 %v3805_v56, %v3805_v56  ;;  %v1712_v4 = vmul.f32 %v3807_v29, %v3807_v29 }
 0x2e6   :  { %v1423_v10 = vadd.f32 %v1422_v21, %v3767_v32  ;;  %v1824_v28 = vadd.f32 %v1823_v42, %v1707_v40  ;;  %v1526_v51 = vadd.f32 %v1525_v2, %v3773_v1  ;;  %v1927_v19 = vadd.f32 %v1926_v16, %v1708_v14 }
 0x2e7   :  { %v1713_v40 = vmul.f32 %v3837_v35, %v3837_v35  ;;  %v1714_v14 = vmul.f32 %v3839_v33, %v3839_v33  ;;  %v1715_v1 = vmul.f32 %v3869_v5, %v3869_v5 }
 0x2e8   :  { %v1424_v54 = vadd.f32 %v1423_v10, %v3805_v56  ;;  %v1825_v0 = vadd.f32 %v1824_v28, %v1709_v41  ;;  %v1527_v34 = vadd.f32 %v1526_v51, %v3807_v29  ;;  %v1928_v62 = vadd.f32 %v1927_v19, %v1710_v18 }
 0x2e9   :  { %v1716_v41 = vmul.f32 %v3871_v12, %v3871_v12  ;;  %v1717_v19 = vmul.f32 %v3901_v13, %v3901_v13 }
 0x2ea   :  { %v1425_v21 = vadd.f32 %v1424_v54, %v3837_v35  ;;  %v1826_v42 = vadd.f32 %v1825_v0, %v1711_v53  ;;  %v1528_v2 = vadd.f32 %v1527_v34, %v3839_v33  ;;  %v1929_v16 = vadd.f32 %v1928_v62, %v1712_v4 }
 0x2eb   :  { %v1718_v53 = vmul.f32 %v3903_v25, %v3903_v25  ;;  %v1719_v62 = vmul.f32 %v3933_v24, %v3933_v24 }
 0x2ec   :  { %v1426_v18 = vadd.f32 %v1425_v21, %v3869_v5  ;;  %v1827_v10 = vadd.f32 %v1826_v42, %v1713_v40  ;;  %v1529_v28 = vadd.f32 %v1528_v2, %v3871_v12  ;;  %v1930_v51 = vadd.f32 %v1929_v16, %v1714_v14  ;;  %v4323_v16 = vpop.f32.mrf.mxu2  ;;  %v4325_v12 = vpop.f32.mrf.mxu3 }
 0x2ed   :  { %v1720_v40 = vmul.f32 %v3935_v6, %v3935_v6  ;;  %7157 = vst [vmem:[#allocation121_spill] sm:$0xff] %v4323_v16 }
 0x2ee   :  { %v1427_v4 = vadd.f32 %v1426_v18, %v3901_v13  ;;  %v1828_v54 = vadd.f32 %v1827_v10, %v1715_v1  ;;  %v1530_v0 = vadd.f32 %v1529_v28, %v3903_v25  ;;  %v1931_v34 = vadd.f32 %v1930_v51, %v1716_v41  ;;  %7158 = vst [vmem:[#allocation122_spill] sm:$0xff] %v4325_v12 }
 0x2ef   :  { %v1721_v1 = vmul.f32 %v3971_v26, %v3971_v26  ;;  %v1722_v41 = vmul.f32 %v3973_v11, %v3973_v11 }
 0x2f0   :  { %v1428_v14 = vadd.f32 %v1427_v4, %v3933_v24  ;;  %v1829_v21 = vadd.f32 %v1828_v54, %v1717_v19  ;;  %v1531_v42 = vadd.f32 %v1530_v0, %v3935_v6  ;;  %v1932_v2 = vadd.f32 %v1931_v34, %v1718_v53 }
 0x2f1   :  { %v1723_v19 = vmul.f32 %v4009_v30, %v4009_v30  ;;  %v1724_v53 = vmul.f32 %v4011_v9, %v4011_v9  ;;  %v1725_v6 = vmul.f32 %v4051_v61, %v4051_v61 }
 0x2f2   :  { %v1429_v18 = vadd.f32 %v1428_v14, %v3971_v26  ;;  %v1830_v10 = vadd.f32 %v1829_v21, %v1719_v62  ;;  %v1532_v28 = vadd.f32 %v1531_v42, %v3973_v11  ;;  %v1933_v51 = vadd.f32 %v1932_v2, %v1720_v40 }
 0x2f3   :  { %v1726_v62 = vmul.f32 %v4053_v59, %v4053_v59  ;;  %v1727_v2 = vmul.f32 %v4085_v55, %v4085_v55 }
 0x2f4   :  { %v1831_v4 = vadd.f32 %v1830_v10, %v1721_v1  ;;  %v1934_v54 = vadd.f32 %v1933_v51, %v1722_v41  ;;  %v1430_v0 = vadd.f32 %v1429_v18, %v4009_v30  ;;  %v1533_v34 = vadd.f32 %v1532_v28, %v4011_v9 }
 0x2f5   :  { %v1728_v1 = vmul.f32 %v4087_v22, %v4087_v22  ;;  %v1729_v51 = vmul.f32 %v4119_v43, %v4119_v43 }
 0x2f6   :  { %v1832_v14 = vadd.f32 %v1831_v4, %v1723_v19  ;;  %v1935_v40 = vadd.f32 %v1934_v54, %v1724_v53  ;;  %v1431_v21 = vadd.f32 %v1430_v0, %v4051_v61  ;;  %v1534_v42 = vadd.f32 %v1533_v34, %v4053_v59  ;;  %v4357_v34 = vpop.f32.mrf.mxu2 }
 0x2f7   :  { %v1730_v19 = vmul.f32 %v4121_v36, %v4121_v36 }
 0x2f8   :  { %v1833_v41 = vadd.f32 %v1832_v14, %v1725_v6  ;;  %v1936_v18 = vadd.f32 %v1935_v40, %v1726_v62  ;;  %v1432_v10 = vadd.f32 %v1431_v21, %v4085_v55  ;;  %v1535_v28 = vadd.f32 %v1534_v42, %v4087_v22  ;;  %v4359_v6 = vpop.f32.mrf.mxu3 }
 0x2f9   :  { %v1731_v62 = vmul.f32 %v4153_v27, %v4153_v27  ;;  %v1732_v14 = vmul.f32 %v4155_v3, %v4155_v3 }
 0x2fa   :  { %v1834_v53 = vadd.f32 %v1833_v41, %v1727_v2  ;;  %v1937_v4 = vadd.f32 %v1936_v18, %v1728_v1  ;;  %v1433_v54 = vadd.f32 %v1432_v10, %v4119_v43  ;;  %v1536_v0 = vadd.f32 %v1535_v28, %v4121_v36 }
 0x2fb   :  { %v1733_v1 = vmul.f32 %v4187_v52, %v4187_v52  ;;  %v1734_v41 = vmul.f32 %v4189_v38, %v4189_v38 }
 0x2fc   :  { %v1835_v40 = vadd.f32 %v1834_v53, %v1729_v51  ;;  %v1938_v21 = vadd.f32 %v1937_v4, %v1730_v19  ;;  %v1434_v42 = vadd.f32 %v1433_v54, %v4153_v27  ;;  %v1537_v2 = vadd.f32 %v1536_v0, %v4155_v3 }
 0x2fd   :  { %v1735_v51 = vmul.f32 %v4221_v60, %v4221_v60  ;;  %v1736_v19 = vmul.f32 %v4223_v50, %v4223_v50 }
 0x2fe   :  { %v1836_v18 = vadd.f32 %v1835_v40, %v1731_v62  ;;  %v1939_v10 = vadd.f32 %v1938_v21, %v1732_v14  ;;  %v1435_v28 = vadd.f32 %v1434_v42, %v4187_v52  ;;  %v1538_v36 = vadd.f32 %v1537_v2, %v4189_v38 }
 0x2ff   :  { %v1737_v62 = vmul.f32 %v4255_v49, %v4255_v49  ;;  %v1738_v14 = vmul.f32 %v4257_v46, %v4257_v46 }
 0x300   :  { %v1837_v53 = vadd.f32 %v1836_v18, %v1733_v1  ;;  %v1940_v4 = vadd.f32 %v1939_v10, %v1734_v41  ;;  %v1436_v54 = vadd.f32 %v1435_v28, %v4221_v60  ;;  %v1539_v0 = vadd.f32 %v1538_v36, %v4223_v50  ;;  %v4391_v50 = vpop.f32.mrf.mxu2 }
 0x301   :  { %v1739_v1 = vmul.f32 %v4289_v45, %v4289_v45  ;;  %v1740_v41 = vmul.f32 %v4291_v44, %v4291_v44 }
 0x302   :  { %v1838_v40 = vadd.f32 %v1837_v53, %v1735_v51  ;;  %v1941_v21 = vadd.f32 %v1940_v4, %v1736_v19  ;;  %v1437_v42 = vadd.f32 %v1436_v54, %v4255_v49  ;;  %v1540_v2 = vadd.f32 %v1539_v0, %v4257_v46  ;;  %v4393_v51 = vpop.f32.mrf.mxu3 }
 0x303   :  { %7159 = vst [vmem:[#allocation125_spill] sm:$0xff] %v4393_v51  ;;  %v1741_v19 = vmul.f32 %v4323_v16, %v4323_v16  ;;  %v1742_v53 = vmul.f32 %v4325_v12, %v4325_v12 }
 0x304   :  { %v1839_v18 = vadd.f32 %v1838_v40, %v1737_v62  ;;  %v1942_v36 = vadd.f32 %v1941_v21, %v1738_v14  ;;  %v1438_v10 = vadd.f32 %v1437_v42, %v4289_v45  ;;  %v1541_v28 = vadd.f32 %v1540_v2, %v4291_v44 }
 0x305   :  { %v1743_v14 = vmul.f32 %v4357_v34, %v4357_v34  ;;  %v1744_v40 = vmul.f32 %v4359_v6, %v4359_v6  ;;  %v1745_v21 = vmul.f32 %v4391_v50, %v4391_v50  ;;  %v1746_v42 = vmul.f32 %v4393_v51, %v4393_v51 }
 0x306   :  { %v1840_v4 = vadd.f32 %v1839_v18, %v1739_v1  ;;  %v1943_v54 = vadd.f32 %v1942_v36, %v1740_v41  ;;  %v1439_v0 = vadd.f32 %v1438_v10, %v4323_v16  ;;  %v1542_v62 = vadd.f32 %v1541_v28, %v4325_v12 }
 0x308   :  { %v1841_v2 = vadd.f32 %v1840_v4, %v1741_v19  ;;  %v1944_v44 = vadd.f32 %v1943_v54, %v1742_v53  ;;  %v1440_v1 = vadd.f32 %v1439_v0, %v4357_v34  ;;  %v1543_v41 = vadd.f32 %v1542_v62, %v4359_v6 }
 0x30a   :  { %v1842_v18 = vadd.f32 %v1841_v2, %v1743_v14  ;;  %v1945_v36 = vadd.f32 %v1944_v44, %v1744_v40  ;;  %v1441_v10 = vadd.f32 %v1440_v1, %v4391_v50  ;;  %v1544_v28 = vadd.f32 %v1543_v41, %v4393_v51 }
 0x30c   :  { %v1442_v12 = vrot.slane %v1441_v10, 4  ;;  %v1843_v16 = vadd.f32 %v1842_v18, %v1745_v21  ;;  %v1545_v45 = vrot.slane %v1544_v28, 4  ;;  %v1946_v46 = vadd.f32 %v1945_v36, %v1746_v42 }
 0x30e   :  { %v1443_v49 = vadd.f32 %v1442_v12, %v1441_v10  ;;  %v1844_v60 = vrot.slane %v1843_v16, 4  ;;  %v1546_v38 = vadd.f32 %v1545_v45, %v1544_v28  ;;  %v1947_v52 = vrot.slane %v1946_v46, 4 }
 0x310   :  { %v1444_v19 = vrot.slane %v1443_v49, 2  ;;  %v1845_v53 = vadd.f32 %v1844_v60, %v1843_v16  ;;  %v1547_v4 = vrot.slane %v1546_v38, 2  ;;  %v1948_v54 = vadd.f32 %v1947_v52, %v1946_v46 }
 0x312   :  { %v1445_v0 = vadd.f32 %v1444_v19, %v1443_v49  ;;  %v1846_v62 = vrot.slane %v1845_v53, 2  ;;  %v1548_v14 = vadd.f32 %v1547_v4, %v1546_v38  ;;  %v1949_v44 = vrot.slane %v1948_v54, 2 }
 0x314   :  { %v1446_v40 = vrot.slane %v1445_v0, 1  ;;  %v1847_v2 = vadd.f32 %v1846_v62, %v1845_v53  ;;  %v1549_v1 = vrot.slane %v1548_v14, 1  ;;  %v1950_v41 = vadd.f32 %v1949_v44, %v1948_v54 }
 0x316   :  { %v1447_v51 = vadd.f32 %v1446_v40, %v1445_v0  ;;  %v1848_v21 = vrot.slane %v1847_v2, 1  ;;  %v1550_v18 = vadd.f32 %v1549_v1, %v1548_v14  ;;  %v1951_v42 = vrot.slane %v1950_v41, 1 }
 0x318   :  { %v1849_v12 = vadd.f32 %v1848_v21, %v1847_v2  ;;  %v1953_v36 = vmul.f32 0.0012755102, %v1447_v51  ;;  %v1952_v45 = vadd.f32 %v1951_v42, %v1950_v41  ;;  %v1954_v10 = vmul.f32 0.0012755102, %v1550_v18  ;;  %v1961_v18 = vld [vmem:[%s6664_s3] sm:$0x3] }
 0x31a   :  { %v1955_v28 = vmul.f32 0.0012755102, %v1849_v12  ;;  %v1957_v60 = vmul.f32 %v1953_v36, %v1953_v36  ;;  %v1956_v16 = vmul.f32 0.0012755102, %v1952_v45  ;;  %v1958_v46 = vmul.f32 %v1954_v10, %v1954_v10 }
 0x31c   :  { %v1959_v52 = vsub.f32 %v1955_v28, %v1957_v60  ;;  %v1960_v49 = vsub.f32 %v1956_v16, %v1958_v46 }
 0x31e   :  { %v1962_v38 = vadd.f32 0.001, %v1959_v52  ;;  %v1963_v19 = vadd.f32 0.001, %v1960_v49 }
 0x320   :  { %2815 = vrsqrt.f32 %v1962_v38  ;;  %vm1980_vm3 = vweird.f32 %v1963_v19  ;;  %vm1970_vm5 = vweird.f32 %v1962_v38 }
 0x321   :  { %2817 = vrsqrt.f32 %v1963_v19 }
 0x326   :  { %v2816_v53 = vpop.eup %2815 }
 0x327   :  { %v2818_v4 = vpop.eup %2817  ;;  %v1965_v54 = vmul.f32 %v2816_v53, %v1962_v38  ;;  %vm1971_vm2 = vweird.f32 %v2816_v53  ;;  %v7162_v38 = vld [vmem:[#allocation2_spill] sm:$0xff] }
 0x328   :  { %v1975_v0 = vmul.f32 %v2818_v4, %v1963_v19  ;;  %vm1981_vm1 = vweird.f32 %v2818_v4  ;;  %vm1972_vm7 = vmor %vm1970_vm5, %vm1971_vm2 }
 0x329   :  { %v1966_v62 = vmul.f32 %v2816_v53, %v1965_v54  ;;  %vm1982_vm4 = vmor %vm1980_vm3, %vm1981_vm1 }
 0x32a   :  { %v1976_v14 = vmul.f32 %v2818_v4, %v1975_v0 }
 0x32b   :  { %v1967_v44 = vmul.f32 0.5, %v1966_v62  ;;  %v7165_v62 = vld [vmem:[#allocation5_spill] sm:$0xff] }
 0x32c   :  { %v1977_v51 = vmul.f32 0.5, %v1976_v14 }
 0x32d   :  { %v1968_v40 = vsub.f32 1.5, %v1967_v44 }
 0x32e   :  { %v1978_v2 = vsub.f32 1.5, %v1977_v51 }
 0x32f   :  { %v1969_v1 = vmul.f32 %v2816_v53, %v1968_v40  ;;  %v7166_v40 = vld [vmem:[#allocation6_spill] sm:$0xff] }
 0x330   :  { %v1979_v41 = vmul.f32 %v2818_v4, %v1978_v2 }
 0x331   :  { %v1973_v12 = vsel %vm1972_vm7, %v2816_v53, %v1969_v1  ;;  %v7164_v53 = vld [vmem:[#allocation4_spill] sm:$0xff]  ;;  %v7167_v1 = vld [vmem:[#allocation7_spill] sm:$0xff] }
 0x332   :  { %v1983_v21 = vsel %vm1982_vm4, %v2818_v4, %v1979_v41  ;;  %v7163_v4 = vld [vmem:[#allocation3_spill] sm:$0xff] }
 0x333   :  { %v1986_v42 = vrot.slane %v1983_v21, 7 }
 0x335   :  { %v1988_v45 = vsel %vm1987_vm6, %v1973_v12, %v1986_v42  ;;  %v7169_v42 = vld [vmem:[#allocation9_spill] sm:$0xff] }
 0x336   :  { %v1990_v28 = vmul.f32 %v1988_v45, %v1961_v18  ;;  %v7168_v18 = vld [vmem:[#allocation8_spill] sm:$0xff] }
 0x338   :  { %v4417_v60 = vperm.slane %v1990_v28, 1  ;;  %v4420_v46 = vperm.slane %v1990_v28, 0  ;;  %v7170_v28 = vld [vmem:[#allocation10_spill] sm:$0xff] }
 0x33a   :  { %7160 = vst [vmem:[#allocation161_spill] sm:$0xff] %v4417_v60  ;;  %v1998_v16 = vmul.f32 %v4417_v60, %v1954_v10  ;;  %v1997_v49 = vmul.f32 %v4420_v46, %v1953_v36  ;;  %v4425_v19 = vmul.f32 %v4420_v46, %v7162_v38  ;;  %v4429_v54 = vmul.f32 %v4417_v60, %v7163_v4  ;;  %v1991_v36 = vld [vmem:[%s6665_s4] sm:$0x3] }
 0x33b   :  { %7161 = vst [vmem:[#allocation162_spill] sm:$0xff] %v4420_v46  ;;  %v4433_v0 = vmul.f32 %v4420_v46, %v7164_v53  ;;  %v4437_v10 = vmul.f32 %v4417_v60, %v7165_v62  ;;  %v4445_v44 = vmul.f32 %v4420_v46, %v3205_v47  ;;  %v4449_v51 = vmul.f32 %v4417_v60, %v3207_v48  ;;  %v7174_v62 = vld [vmem:[#allocation16_spill] sm:$0xff] }
 0x33c   :  { %v2001_v52 = vrot.slane %v1998_v16, 7  ;;  %v4453_v2 = vmul.f32 %v4420_v46, %v7166_v40  ;;  %v4457_v41 = vmul.f32 %v4417_v60, %v7167_v1  ;;  %v4461_v21 = vmul.f32 %v4420_v46, %v3227_v57  ;;  %v7177_v1 = vld [vmem:[#allocation20_spill] sm:$0xff] }
 0x33d   :  { %v4465_v47 = vmul.f32 %v4417_v60, %v3229_v58  ;;  %v4469_v48 = vmul.f32 %v4420_v46, %v7168_v18  ;;  %v4473_v12 = vmul.f32 %v4417_v60, %v7169_v42  ;;  %v4477_v45 = vmul.f32 %v4420_v46, %v3255_v7  ;;  %v7172_v7 = vld [vmem:[#allocation12_spill] sm:$0xff]  ;;  %v7179_v18 = vld [vmem:[#allocation23_spill] sm:$0xff] }
 0x33e   :  { %v2002_v14 = vsel %vm1987_vm6, %v1997_v49, %v2001_v52  ;;  %v4481_v57 = vmul.f32 %v4417_v60, %v3257_v8  ;;  %v4485_v58 = vmul.f32 %v4420_v46, %v7170_v28  ;;  %v7171_v52 = vld [vmem:[#allocation11_spill] sm:$0xff]  ;;  %v4495_v38 = vmul.f32 %v4420_v46, %v3283_v20  ;;  %v7181_v28 = vld [vmem:[#allocation24_spill] sm:$0xff] }
 0x33f   :  { %v4487_v16 = vsub.f32 %v1991_v36, %v2002_v14  ;;  %v4491_v49 = vmul.f32 %v4417_v60, %v7171_v52  ;;  %v4499_v4 = vmul.f32 %v4417_v60, %v7172_v7  ;;  %v7173_v8 = vld [vmem:[#allocation15_spill] sm:$0xff]  ;;  %v4507_v36 = vmul.f32 %v4417_v60, %v7174_v62  ;;  %v7185_v62 = vld [vmem:[#allocation28_spill] sm:$0xff] }
 0x340   :  { %v4503_v53 = vmul.f32 %v4420_v46, %v7173_v8  ;;  %v7175_v14 = vld [vmem:[#allocation19_spill] sm:$0xff]  ;;  %v4515_v20 = vmul.f32 %v4417_v60, %v7177_v1  ;;  %v4519_v42 = vmul.f32 %v4420_v46, %v7179_v18  ;;  %v4523_v52 = vmul.f32 %v4417_v60, %v7181_v28 }
 0x341   :  { %v4511_v40 = vmul.f32 %v4420_v46, %v7175_v14  ;;  %v7183_v7 = vld [vmem:[#allocation27_spill] sm:$0xff]  ;;  %v4531_v14 = vmul.f32 %v4417_v60, %v7185_v62 }
 0x342   :  { %7178 = vst [vmem:[#allocation3_spill] sm:$0xff] %v4515_v20  ;;  %v4527_v8 = vmul.f32 %v4420_v46, %v7183_v7  ;;  %v7189_v20 = vld [vmem:[#allocation32_spill] sm:$0xff] }
 0x343   :  { %7176 = vst [vmem:[#allocation2_spill] sm:$0xff] %v4511_v40  ;;  %v7187_v40 = vld [vmem:[#allocation31_spill] sm:$0xff]  ;;  %v4539_v18 = vmul.f32 %v4417_v60, %v7189_v20 }
 0x344   :  { %7180 = vst [vmem:[#allocation4_spill] sm:$0xff] %v4519_v42  ;;  %v4535_v1 = vmul.f32 %v4420_v46, %v7187_v40  ;;  %v7191_v42 = vld [vmem:[#allocation35_spill] sm:$0xff] }
 0x345   :  { %7182 = vst [vmem:[#allocation5_spill] sm:$0xff] %v4523_v52  ;;  %v4543_v28 = vmul.f32 %v4420_v46, %v7191_v42  ;;  %v7193_v52 = vld [vmem:[#allocation36_spill] sm:$0xff] }
 0x346   :  { %7184 = vst [vmem:[#allocation6_spill] sm:$0xff] %v4527_v8  ;;  %v4547_v7 = vmul.f32 %v4417_v60, %v7193_v52  ;;  %v7195_v8 = vld [vmem:[#allocation39_spill] sm:$0xff] }
 0x347   :  { %7186 = vst [vmem:[#allocation7_spill] sm:$0xff] %v4531_v14  ;;  %v4551_v62 = vmul.f32 %v4420_v46, %v7195_v8  ;;  %v7197_v14 = vld [vmem:[#allocation40_spill] sm:$0xff] }
 0x348   :  { %7188 = vst [vmem:[#allocation8_spill] sm:$0xff] %v4535_v1  ;;  %v4555_v40 = vmul.f32 %v4417_v60, %v7197_v14  ;;  %v7199_v1 = vld [vmem:[#allocation43_spill] sm:$0xff] }
 0x349   :  { %7190 = vst [vmem:[#allocation9_spill] sm:$0xff] %v4539_v18  ;;  %v4559_v20 = vmul.f32 %v4420_v46, %v7199_v1  ;;  %v7201_v18 = vld [vmem:[#allocation44_spill] sm:$0xff] }
 0x34a   :  { %7192 = vst [vmem:[#allocation10_spill] sm:$0xff] %v4543_v28  ;;  %v4563_v42 = vmul.f32 %v4417_v60, %v7201_v18  ;;  %v7203_v28 = vld [vmem:[#allocation47_spill] sm:$0xff] }
 0x34b   :  { %7194 = vst [vmem:[#allocation11_spill] sm:$0xff] %v4547_v7  ;;  %v4567_v52 = vmul.f32 %v4420_v46, %v7203_v28  ;;  %v7205_v7 = vld [vmem:[#allocation48_spill] sm:$0xff] }
 0x34c   :  { %7196 = vst [vmem:[#allocation12_spill] sm:$0xff] %v4551_v62  ;;  %v4571_v8 = vmul.f32 %v4417_v60, %v7205_v7  ;;  %v7207_v62 = vld [vmem:[#allocation51_spill] sm:$0xff] }
 0x34d   :  { %7198 = vst [vmem:[#allocation15_spill] sm:$0xff] %v4555_v40  ;;  %v4575_v14 = vmul.f32 %v4420_v46, %v7207_v62  ;;  %v7209_v40 = vld [vmem:[#allocation52_spill] sm:$0xff] }
 0x34e   :  { %7200 = vst [vmem:[#allocation16_spill] sm:$0xff] %v4559_v20  ;;  %v4579_v1 = vmul.f32 %v4417_v60, %v7209_v40  ;;  %v7211_v20 = vld [vmem:[#allocation55_spill] sm:$0xff] }
 0x34f   :  { %7202 = vst [vmem:[#allocation19_spill] sm:$0xff] %v4563_v42  ;;  %v4583_v18 = vmul.f32 %v4420_v46, %v7211_v20  ;;  %v7213_v42 = vld [vmem:[#allocation56_spill] sm:$0xff] }
 0x350   :  { %7204 = vst [vmem:[#allocation20_spill] sm:$0xff] %v4567_v52  ;;  %v4587_v28 = vmul.f32 %v4417_v60, %v7213_v42  ;;  %v7215_v52 = vld [vmem:[#allocation59_spill] sm:$0xff] }
 0x351   :  { %7206 = vst [vmem:[#allocation23_spill] sm:$0xff] %v4571_v8  ;;  %v4591_v7 = vmul.f32 %v4420_v46, %v7215_v52  ;;  %v7217_v8 = vld [vmem:[#allocation60_spill] sm:$0xff] }
 0x352   :  { %7208 = vst [vmem:[#allocation24_spill] sm:$0xff] %v4575_v14  ;;  %v4595_v62 = vmul.f32 %v4417_v60, %v7217_v8  ;;  %v7219_v14 = vld [vmem:[#allocation63_spill] sm:$0xff] }
 0x353   :  { %7210 = vst [vmem:[#allocation27_spill] sm:$0xff] %v4579_v1  ;;  %v4599_v40 = vmul.f32 %v4420_v46, %v7219_v14  ;;  %v7221_v1 = vld [vmem:[#allocation64_spill] sm:$0xff] }
 0x354   :  { %7212 = vst [vmem:[#allocation28_spill] sm:$0xff] %v4583_v18  ;;  %v4603_v20 = vmul.f32 %v4417_v60, %v7221_v1  ;;  %v7223_v18 = vld [vmem:[#allocation67_spill] sm:$0xff] }
 0x355   :  { %7214 = vst [vmem:[#allocation31_spill] sm:$0xff] %v4587_v28  ;;  %v4607_v42 = vmul.f32 %v4420_v46, %v7223_v18  ;;  %v7225_v28 = vld [vmem:[#allocation68_spill] sm:$0xff] }
 0x356   :  { %7216 = vst [vmem:[#allocation32_spill] sm:$0xff] %v4591_v7  ;;  %v4611_v52 = vmul.f32 %v4417_v60, %v7225_v28  ;;  %v7227_v7 = vld [vmem:[#allocation71_spill] sm:$0xff] }
 0x357   :  { %7218 = vst [vmem:[#allocation35_spill] sm:$0xff] %v4595_v62  ;;  %v4615_v8 = vmul.f32 %v4420_v46, %v7227_v7  ;;  %v7229_v62 = vld [vmem:[#allocation72_spill] sm:$0xff] }
 0x358   :  { %7220 = vst [vmem:[#allocation36_spill] sm:$0xff] %v4599_v40  ;;  %v4619_v14 = vmul.f32 %v4417_v60, %v7229_v62  ;;  %v7231_v40 = vld [vmem:[#allocation75_spill] sm:$0xff] }
 0x359   :  { %7222 = vst [vmem:[#allocation39_spill] sm:$0xff] %v4603_v20  ;;  %v4623_v1 = vmul.f32 %v4420_v46, %v7231_v40  ;;  %v7233_v20 = vld [vmem:[#allocation76_spill] sm:$0xff] }
 0x35a   :  { %7224 = vst [vmem:[#allocation40_spill] sm:$0xff] %v4607_v42  ;;  %v4627_v18 = vmul.f32 %v4417_v60, %v7233_v20  ;;  %v7235_v42 = vld [vmem:[#allocation79_spill] sm:$0xff] }
 0x35b   :  { %7226 = vst [vmem:[#allocation43_spill] sm:$0xff] %v4611_v52  ;;  %v4631_v28 = vmul.f32 %v4420_v46, %v7235_v42  ;;  %v7237_v52 = vld [vmem:[#allocation80_spill] sm:$0xff] }
 0x35c   :  { %7228 = vst [vmem:[#allocation44_spill] sm:$0xff] %v4615_v8  ;;  %v4635_v7 = vmul.f32 %v4417_v60, %v7237_v52  ;;  %v7239_v8 = vld [vmem:[#allocation83_spill] sm:$0xff] }
 0x35d   :  { %7230 = vst [vmem:[#allocation47_spill] sm:$0xff] %v4619_v14  ;;  %v4639_v62 = vmul.f32 %v4420_v46, %v7239_v8  ;;  %v7241_v14 = vld [vmem:[#allocation107_spill] sm:$0xff] }
 0x35e   :  { %7232 = vst [vmem:[#allocation48_spill] sm:$0xff] %v4623_v1  ;;  %v4643_v40 = vmul.f32 %v4420_v46, %v7241_v14  ;;  %v7243_v1 = vld [vmem:[#allocation108_spill] sm:$0xff] }
 0x35f   :  { %7234 = vst [vmem:[#allocation51_spill] sm:$0xff] %v4627_v18  ;;  %v4647_v20 = vmul.f32 %v4417_v60, %v7243_v1  ;;  %v7245_v18 = vld [vmem:[#allocation111_spill] sm:$0xff] }
 0x360   :  { %7236 = vst [vmem:[#allocation52_spill] sm:$0xff] %v4631_v28  ;;  %v4651_v42 = vmul.f32 %v4420_v46, %v7245_v18  ;;  %v7247_v28 = vld [vmem:[#allocation112_spill] sm:$0xff] }
 0x361   :  { %7238 = vst [vmem:[#allocation55_spill] sm:$0xff] %v4635_v7  ;;  %v4655_v52 = vmul.f32 %v4417_v60, %v7247_v28  ;;  %v7249_v7 = vld [vmem:[#allocation115_spill] sm:$0xff] }
 0x362   :  { %7240 = vst [vmem:[#allocation56_spill] sm:$0xff] %v4639_v62  ;;  %v4659_v8 = vmul.f32 %v4420_v46, %v7249_v7  ;;  %v7251_v62 = vld [vmem:[#allocation116_spill] sm:$0xff] }
 0x363   :  { %7242 = vst [vmem:[#allocation59_spill] sm:$0xff] %v4643_v40  ;;  %v4663_v14 = vmul.f32 %v4417_v60, %v7251_v62  ;;  %v7253_v40 = vld [vmem:[#allocation119_spill] sm:$0xff] }
 0x364   :  { %7244 = vst [vmem:[#allocation60_spill] sm:$0xff] %v4647_v20  ;;  %v4667_v1 = vmul.f32 %v4420_v46, %v7253_v40  ;;  %v7255_v20 = vld [vmem:[#allocation120_spill] sm:$0xff] }
 0x365   :  { %7246 = vst [vmem:[#allocation63_spill] sm:$0xff] %v4651_v42  ;;  %v4671_v18 = vmul.f32 %v4417_v60, %v7255_v20  ;;  %v7257_v42 = vld [vmem:[#allocation123_spill] sm:$0xff] }
 0x366   :  { %7248 = vst [vmem:[#allocation64_spill] sm:$0xff] %v4655_v52  ;;  %v4675_v28 = vmul.f32 %v4420_v46, %v7257_v42  ;;  %v7259_v52 = vld [vmem:[#allocation124_spill] sm:$0xff] }
 0x367   :  { %7250 = vst [vmem:[#allocation67_spill] sm:$0xff] %v4659_v8  ;;  %v4679_v7 = vmul.f32 %v4417_v60, %v7259_v52  ;;  %v7261_v8 = vld [vmem:[#allocation127_spill] sm:$0xff] }
 0x368   :  { %7252 = vst [vmem:[#allocation68_spill] sm:$0xff] %v4663_v14  ;;  %v4683_v62 = vmul.f32 %v4420_v46, %v7261_v8  ;;  %v7263_v14 = vld [vmem:[#allocation128_spill] sm:$0xff] }
 0x369   :  { %7254 = vst [vmem:[#allocation71_spill] sm:$0xff] %v4667_v1  ;;  %v4687_v40 = vmul.f32 %v4417_v60, %v7263_v14  ;;  %v7265_v1 = vld [vmem:[#allocation129_spill] sm:$0xff] }
 0x36a   :  { %7256 = vst [vmem:[#allocation72_spill] sm:$0xff] %v4671_v18  ;;  %v4691_v20 = vmul.f32 %v4420_v46, %v7265_v1  ;;  %v7267_v18 = vld [vmem:[#allocation130_spill] sm:$0xff] }
 0x36b   :  { %7258 = vst [vmem:[#allocation75_spill] sm:$0xff] %v4675_v28  ;;  %v4695_v42 = vmul.f32 %v4417_v60, %v7267_v18  ;;  %v7269_v28 = vld [vmem:[#allocation132_spill] sm:$0xff] }
 0x36c   :  { %7260 = vst [vmem:[#allocation76_spill] sm:$0xff] %v4679_v7  ;;  %v4699_v52 = vmul.f32 %v4420_v46, %v7269_v28  ;;  %v7271_v7 = vld [vmem:[#allocation133_spill] sm:$0xff] }
 0x36d   :  { %7262 = vst [vmem:[#allocation79_spill] sm:$0xff] %v4683_v62  ;;  %v4703_v8 = vmul.f32 %v4417_v60, %v7271_v7  ;;  %v7273_v62 = vld [vmem:[#allocation134_spill] sm:$0xff] }
 0x36e   :  { %7264 = vst [vmem:[#allocation80_spill] sm:$0xff] %v4687_v40  ;;  %v4707_v14 = vmul.f32 %v4420_v46, %v7273_v62  ;;  %v7275_v40 = vld [vmem:[#allocation135_spill] sm:$0xff] }
 0x36f   :  { %7266 = vst [vmem:[#allocation83_spill] sm:$0xff] %v4691_v20  ;;  %v4711_v1 = vmul.f32 %v4417_v60, %v7275_v40  ;;  %v7277_v20 = vld [vmem:[#allocation136_spill] sm:$0xff] }
 0x370   :  { %7268 = vst [vmem:[#allocation107_spill] sm:$0xff] %v4695_v42  ;;  %v4715_v18 = vmul.f32 %v4420_v46, %v7277_v20  ;;  %v7279_v42 = vld [vmem:[#allocation137_spill] sm:$0xff] }
 0x371   :  { %7270 = vst [vmem:[#allocation108_spill] sm:$0xff] %v4699_v52  ;;  %v4719_v28 = vmul.f32 %v4417_v60, %v7279_v42  ;;  %v7281_v52 = vld [vmem:[#allocation139_spill] sm:$0xff] }
 0x372   :  { %7272 = vst [vmem:[#allocation111_spill] sm:$0xff] %v4703_v8  ;;  %v4723_v7 = vmul.f32 %v4420_v46, %v7281_v52  ;;  %v7283_v8 = vld [vmem:[#allocation140_spill] sm:$0xff] }
 0x373   :  { %7274 = vst [vmem:[#allocation112_spill] sm:$0xff] %v4707_v14  ;;  %v4727_v62 = vmul.f32 %v4417_v60, %v7283_v8  ;;  %v7285_v14 = vld [vmem:[#allocation141_spill] sm:$0xff] }
 0x374   :  { %7276 = vst [vmem:[#allocation115_spill] sm:$0xff] %v4711_v1  ;;  %v4731_v40 = vmul.f32 %v4420_v46, %v7285_v14  ;;  %v7287_v1 = vld [vmem:[#allocation142_spill] sm:$0xff] }
 0x375   :  { %7278 = vst [vmem:[#allocation116_spill] sm:$0xff] %v4715_v18  ;;  %v4735_v20 = vmul.f32 %v4417_v60, %v7287_v1  ;;  %v7289_v18 = vld [vmem:[#allocation144_spill] sm:$0xff] }
 0x376   :  { %7280 = vst [vmem:[#allocation119_spill] sm:$0xff] %v4719_v28  ;;  %v4739_v42 = vmul.f32 %v4420_v46, %v7289_v18  ;;  %v7291_v28 = vld [vmem:[#allocation145_spill] sm:$0xff] }
 0x377   :  { %7282 = vst [vmem:[#allocation120_spill] sm:$0xff] %v4723_v7  ;;  %v4743_v52 = vmul.f32 %v4417_v60, %v7291_v28  ;;  %v7293_v7 = vld [vmem:[#allocation146_spill] sm:$0xff] }
 0x378   :  { %7284 = vst [vmem:[#allocation123_spill] sm:$0xff] %v4727_v62  ;;  %v4747_v8 = vmul.f32 %v4420_v46, %v7293_v7  ;;  %v7295_v62 = vld [vmem:[#allocation147_spill] sm:$0xff] }
 0x379   :  { %7286 = vst [vmem:[#allocation124_spill] sm:$0xff] %v4731_v40  ;;  %v4751_v14 = vmul.f32 %v4417_v60, %v7295_v62  ;;  %v7297_v40 = vld [vmem:[#allocation148_spill] sm:$0xff] }
 0x37a   :  { %7288 = vst [vmem:[#allocation127_spill] sm:$0xff] %v4735_v20  ;;  %v4755_v1 = vmul.f32 %v4420_v46, %v7297_v40  ;;  %v7299_v20 = vld [vmem:[#allocation149_spill] sm:$0xff] }
 0x37b   :  { %7290 = vst [vmem:[#allocation128_spill] sm:$0xff] %v4739_v42  ;;  %v4759_v18 = vmul.f32 %v4417_v60, %v7299_v20  ;;  %v7301_v42 = vld [vmem:[#allocation150_spill] sm:$0xff] }
 0x37c   :  { %7292 = vst [vmem:[#allocation129_spill] sm:$0xff] %v4743_v52  ;;  %v4763_v28 = vmul.f32 %v4420_v46, %v7301_v42  ;;  %v7303_v52 = vld [vmem:[#allocation151_spill] sm:$0xff] }
 0x37d   :  { %7294 = vst [vmem:[#allocation130_spill] sm:$0xff] %v4747_v8  ;;  %v4767_v7 = vmul.f32 %v4417_v60, %v7303_v52  ;;  %v7305_v8 = vld [vmem:[#allocation152_spill] sm:$0xff] }
 0x37e   :  { %7296 = vst [vmem:[#allocation132_spill] sm:$0xff] %v4751_v14  ;;  %v4771_v62 = vmul.f32 %v4420_v46, %v7305_v8  ;;  %v7307_v14 = vld [vmem:[#allocation153_spill] sm:$0xff] }
 0x37f   :  { %7298 = vst [vmem:[#allocation133_spill] sm:$0xff] %v4755_v1  ;;  %v4775_v40 = vmul.f32 %v4417_v60, %v7307_v14  ;;  %v7309_v1 = vld [vmem:[#allocation13_spill] sm:$0xff] }
 0x380   :  { %7300 = vst [vmem:[#allocation134_spill] sm:$0xff] %v4759_v18  ;;  %v4779_v20 = vmul.f32 %v4420_v46, %v7309_v1  ;;  %v7311_v18 = vld [vmem:[#allocation14_spill] sm:$0xff] }
 0x381   :  { %7302 = vst [vmem:[#allocation135_spill] sm:$0xff] %v4763_v28  ;;  %v4783_v42 = vmul.f32 %v4417_v60, %v7311_v18  ;;  %v7313_v28 = vld [vmem:[#allocation17_spill] sm:$0xff] }
 0x382   :  { %7304 = vst [vmem:[#allocation136_spill] sm:$0xff] %v4767_v7  ;;  %v4787_v52 = vmul.f32 %v4420_v46, %v7313_v28  ;;  %v7315_v7 = vld [vmem:[#allocation18_spill] sm:$0xff] }
 0x383   :  { %7306 = vst [vmem:[#allocation137_spill] sm:$0xff] %v4771_v62  ;;  %v4791_v8 = vmul.f32 %v4417_v60, %v7315_v7  ;;  %v7317_v62 = vld [vmem:[#allocation21_spill] sm:$0xff] }
 0x384   :  { %7308 = vst [vmem:[#allocation139_spill] sm:$0xff] %v4775_v40  ;;  %v4795_v14 = vmul.f32 %v4420_v46, %v7317_v62  ;;  %v7319_v40 = vld [vmem:[#allocation22_spill] sm:$0xff] }
 0x385   :  { %7310 = vst [vmem:[#allocation140_spill] sm:$0xff] %v4779_v20  ;;  %v4799_v1 = vmul.f32 %v4417_v60, %v7319_v40  ;;  %v7321_v20 = vld [vmem:[#allocation25_spill] sm:$0xff] }
 0x386   :  { %7312 = vst [vmem:[#allocation141_spill] sm:$0xff] %v4783_v42  ;;  %v4803_v18 = vmul.f32 %v4420_v46, %v7321_v20  ;;  %v7323_v42 = vld [vmem:[#allocation26_spill] sm:$0xff] }
 0x387   :  { %7314 = vst [vmem:[#allocation142_spill] sm:$0xff] %v4787_v52  ;;  %v4807_v28 = vmul.f32 %v4417_v60, %v7323_v42  ;;  %v7325_v52 = vld [vmem:[#allocation29_spill] sm:$0xff] }
 0x388   :  { %7316 = vst [vmem:[#allocation144_spill] sm:$0xff] %v4791_v8  ;;  %v4811_v7 = vmul.f32 %v4420_v46, %v7325_v52  ;;  %v7327_v8 = vld [vmem:[#allocation30_spill] sm:$0xff] }
 0x389   :  { %7318 = vst [vmem:[#allocation145_spill] sm:$0xff] %v4795_v14  ;;  %v4815_v62 = vmul.f32 %v4417_v60, %v7327_v8  ;;  %v7329_v14 = vld [vmem:[#allocation33_spill] sm:$0xff] }
 0x38a   :  { %7320 = vst [vmem:[#allocation146_spill] sm:$0xff] %v4799_v1  ;;  %v4819_v40 = vmul.f32 %v4420_v46, %v7329_v14  ;;  %v7331_v1 = vld [vmem:[#allocation34_spill] sm:$0xff] }
 0x38b   :  { %7322 = vst [vmem:[#allocation147_spill] sm:$0xff] %v4803_v18  ;;  %v4823_v20 = vmul.f32 %v4417_v60, %v7331_v1  ;;  %v7333_v18 = vld [vmem:[#allocation37_spill] sm:$0xff] }
 0x38c   :  { %7324 = vst [vmem:[#allocation148_spill] sm:$0xff] %v4807_v28  ;;  %v4827_v42 = vmul.f32 %v4420_v46, %v7333_v18  ;;  %v7335_v28 = vld [vmem:[#allocation38_spill] sm:$0xff] }
 0x38d   :  { %7326 = vst [vmem:[#allocation149_spill] sm:$0xff] %v4811_v7  ;;  %v4831_v52 = vmul.f32 %v4417_v60, %v7335_v28  ;;  %v7337_v7 = vld [vmem:[#allocation41_spill] sm:$0xff] }
 0x38e   :  { %7328 = vst [vmem:[#allocation150_spill] sm:$0xff] %v4815_v62  ;;  %v4835_v8 = vmul.f32 %v4420_v46, %v7337_v7  ;;  %v7339_v62 = vld [vmem:[#allocation42_spill] sm:$0xff] }
 0x38f   :  { %7330 = vst [vmem:[#allocation151_spill] sm:$0xff] %v4819_v40  ;;  %v4839_v14 = vmul.f32 %v4417_v60, %v7339_v62  ;;  %v7341_v40 = vld [vmem:[#allocation45_spill] sm:$0xff] }
 0x390   :  { %7332 = vst [vmem:[#allocation152_spill] sm:$0xff] %v4823_v20  ;;  %v4843_v1 = vmul.f32 %v4420_v46, %v7341_v40  ;;  %v7343_v20 = vld [vmem:[#allocation46_spill] sm:$0xff] }
 0x391   :  { %7334 = vst [vmem:[#allocation153_spill] sm:$0xff] %v4827_v42  ;;  %v4847_v18 = vmul.f32 %v4417_v60, %v7343_v20  ;;  %v7345_v42 = vld [vmem:[#allocation49_spill] sm:$0xff] }
 0x392   :  { %7336 = vst [vmem:[#allocation13_spill] sm:$0xff] %v4831_v52  ;;  %v4851_v28 = vmul.f32 %v4420_v46, %v7345_v42  ;;  %v7347_v52 = vld [vmem:[#allocation50_spill] sm:$0xff] }
 0x393   :  { %7338 = vst [vmem:[#allocation14_spill] sm:$0xff] %v4835_v8  ;;  %v4855_v7 = vmul.f32 %v4417_v60, %v7347_v52  ;;  %v7349_v8 = vld [vmem:[#allocation53_spill] sm:$0xff] }
 0x394   :  { %7340 = vst [vmem:[#allocation17_spill] sm:$0xff] %v4839_v14  ;;  %v4859_v62 = vmul.f32 %v4420_v46, %v7349_v8  ;;  %v7351_v14 = vld [vmem:[#allocation54_spill] sm:$0xff] }
 0x395   :  { %7342 = vst [vmem:[#allocation18_spill] sm:$0xff] %v4843_v1  ;;  %v4863_v40 = vmul.f32 %v4417_v60, %v7351_v14  ;;  %v7353_v1 = vld [vmem:[#allocation57_spill] sm:$0xff] }
 0x396   :  { %7344 = vst [vmem:[#allocation21_spill] sm:$0xff] %v4847_v18  ;;  %v4867_v20 = vmul.f32 %v4420_v46, %v7353_v1  ;;  %v7355_v18 = vld [vmem:[#allocation58_spill] sm:$0xff] }
 0x397   :  { %7346 = vst [vmem:[#allocation22_spill] sm:$0xff] %v4851_v28  ;;  %v4871_v42 = vmul.f32 %v4417_v60, %v7355_v18  ;;  %v7357_v28 = vld [vmem:[#allocation61_spill] sm:$0xff] }
 0x398   :  { %7348 = vst [vmem:[#allocation25_spill] sm:$0xff] %v4855_v7  ;;  %v4875_v52 = vmul.f32 %v4420_v46, %v7357_v28  ;;  %v7359_v7 = vld [vmem:[#allocation62_spill] sm:$0xff] }
 0x399   :  { %7350 = vst [vmem:[#allocation26_spill] sm:$0xff] %v4859_v62  ;;  %v4879_v8 = vmul.f32 %v4417_v60, %v7359_v7  ;;  %v7361_v62 = vld [vmem:[#allocation65_spill] sm:$0xff] }
 0x39a   :  { %7352 = vst [vmem:[#allocation29_spill] sm:$0xff] %v4863_v40  ;;  %v4883_v14 = vmul.f32 %v4420_v46, %v7361_v62  ;;  %v7363_v40 = vld [vmem:[#allocation66_spill] sm:$0xff] }
 0x39b   :  { %7354 = vst [vmem:[#allocation30_spill] sm:$0xff] %v4867_v20  ;;  %v4887_v1 = vmul.f32 %v4417_v60, %v7363_v40  ;;  %v7365_v20 = vld [vmem:[#allocation69_spill] sm:$0xff] }
 0x39c   :  { %7356 = vst [vmem:[#allocation33_spill] sm:$0xff] %v4871_v42  ;;  %v4891_v18 = vmul.f32 %v4420_v46, %v7365_v20  ;;  %v7367_v42 = vld [vmem:[#allocation70_spill] sm:$0xff] }
 0x39d   :  { %7358 = vst [vmem:[#allocation34_spill] sm:$0xff] %v4875_v52  ;;  %v4895_v28 = vmul.f32 %v4417_v60, %v7367_v42  ;;  %v7369_v52 = vld [vmem:[#allocation73_spill] sm:$0xff] }
 0x39e   :  { %7360 = vst [vmem:[#allocation37_spill] sm:$0xff] %v4879_v8  ;;  %v4899_v7 = vmul.f32 %v4420_v46, %v7369_v52  ;;  %v7371_v8 = vld [vmem:[#allocation74_spill] sm:$0xff] }
 0x39f   :  { %7362 = vst [vmem:[#allocation38_spill] sm:$0xff] %v4883_v14  ;;  %v4903_v62 = vmul.f32 %v4417_v60, %v7371_v8  ;;  %v7373_v14 = vld [vmem:[#allocation77_spill] sm:$0xff] }
 0x3a0   :  { %7364 = vst [vmem:[#allocation41_spill] sm:$0xff] %v4887_v1  ;;  %v4907_v40 = vmul.f32 %v4420_v46, %v7373_v14  ;;  %v7375_v1 = vld [vmem:[#allocation78_spill] sm:$0xff] }
 0x3a1   :  { %7366 = vst [vmem:[#allocation42_spill] sm:$0xff] %v4891_v18  ;;  %v4911_v20 = vmul.f32 %v4417_v60, %v7375_v1  ;;  %v7377_v18 = vld [vmem:[#allocation81_spill] sm:$0xff] }
 0x3a2   :  { %7368 = vst [vmem:[#allocation45_spill] sm:$0xff] %v4895_v28  ;;  %v4915_v42 = vmul.f32 %v4420_v46, %v7377_v18  ;;  %v7379_v28 = vld [vmem:[#allocation82_spill] sm:$0xff] }
 0x3a3   :  { %7370 = vst [vmem:[#allocation46_spill] sm:$0xff] %v4899_v7  ;;  %v4919_v52 = vmul.f32 %v4417_v60, %v7379_v28  ;;  %v7381_v7 = vld [vmem:[#allocation85_spill] sm:$0xff] }
 0x3a4   :  { %7372 = vst [vmem:[#allocation49_spill] sm:$0xff] %v4903_v62  ;;  %v4923_v8 = vmul.f32 %v4420_v46, %v7381_v7  ;;  %v7383_v62 = vld [vmem:[#allocation86_spill] sm:$0xff] }
 0x3a5   :  { %7374 = vst [vmem:[#allocation50_spill] sm:$0xff] %v4907_v40  ;;  %v4927_v14 = vmul.f32 %v4417_v60, %v7383_v62  ;;  %v7385_v40 = vld [vmem:[#allocation89_spill] sm:$0xff] }
 0x3a6   :  { %7376 = vst [vmem:[#allocation53_spill] sm:$0xff] %v4911_v20  ;;  %v4931_v1 = vmul.f32 %v4420_v46, %v7385_v40  ;;  %v7387_v20 = vld [vmem:[#allocation90_spill] sm:$0xff] }
 0x3a7   :  { %7378 = vst [vmem:[#allocation54_spill] sm:$0xff] %v4915_v42  ;;  %v4935_v18 = vmul.f32 %v4417_v60, %v7387_v20  ;;  %v7389_v42 = vld [vmem:[#allocation93_spill] sm:$0xff] }
 0x3a8   :  { %7380 = vst [vmem:[#allocation57_spill] sm:$0xff] %v4919_v52  ;;  %v4939_v28 = vmul.f32 %v4420_v46, %v7389_v42  ;;  %v7391_v52 = vld [vmem:[#allocation94_spill] sm:$0xff] }
 0x3a9   :  { %7382 = vst [vmem:[#allocation58_spill] sm:$0xff] %v4923_v8  ;;  %v4943_v7 = vmul.f32 %v4417_v60, %v7391_v52  ;;  %v7393_v8 = vld [vmem:[#allocation97_spill] sm:$0xff] }
 0x3aa   :  { %7384 = vst [vmem:[#allocation61_spill] sm:$0xff] %v4927_v14  ;;  %v4947_v62 = vmul.f32 %v4420_v46, %v7393_v8  ;;  %v7395_v14 = vld [vmem:[#allocation98_spill] sm:$0xff] }
 0x3ab   :  { %7386 = vst [vmem:[#allocation62_spill] sm:$0xff] %v4931_v1  ;;  %v4951_v40 = vmul.f32 %v4417_v60, %v7395_v14  ;;  %v7397_v1 = vld [vmem:[#allocation101_spill] sm:$0xff] }
 0x3ac   :  { %7388 = vst [vmem:[#allocation65_spill] sm:$0xff] %v4935_v18  ;;  %v4955_v20 = vmul.f32 %v4420_v46, %v7397_v1  ;;  %v7399_v18 = vld [vmem:[#allocation102_spill] sm:$0xff] }
 0x3ad   :  { %7390 = vst [vmem:[#allocation66_spill] sm:$0xff] %v4939_v28  ;;  %v4959_v42 = vmul.f32 %v4417_v60, %v7399_v18  ;;  %v7401_v28 = vld [vmem:[#allocation105_spill] sm:$0xff] }
 0x3ae   :  { %7392 = vst [vmem:[#allocation69_spill] sm:$0xff] %v4943_v7  ;;  %v4963_v52 = vmul.f32 %v4420_v46, %v7401_v28  ;;  %v7402_v7 = vld [vmem:[#allocation106_spill] sm:$0xff] }
 0x3af   :  { %7394 = vst [vmem:[#allocation70_spill] sm:$0xff] %v4947_v62  ;;  %v4967_v8 = vmul.f32 %v4417_v60, %v7402_v7  ;;  %v7403_v62 = vld [vmem:[#allocation109_spill] sm:$0xff]  ;;  %v4987_v7 = vmul.f32 %v4420_v46, %v7150_v23 }
 0x3b0   :  { %7396 = vst [vmem:[#allocation73_spill] sm:$0xff] %v4951_v40  ;;  %v4971_v14 = vmul.f32 %v4420_v46, %v7403_v62  ;;  %v7404_v40 = vld [vmem:[#allocation110_spill] sm:$0xff]  ;;  %v4991_v62 = vmul.f32 %v4417_v60, %v7151_v17  ;;  %v5011_v17 = vmul.f32 %v4420_v46, %v3733_v37  ;;  %v5031_v37 = vmul.f32 %v4417_v60, %v3807_v29 }
 0x3b1   :  { %7398 = vst [vmem:[#allocation74_spill] sm:$0xff] %v4955_v20  ;;  %v4975_v1 = vmul.f32 %v4417_v60, %v7404_v40  ;;  %v7405_v20 = vld [vmem:[#allocation113_spill] sm:$0xff]  ;;  %v4995_v40 = vmul.f32 %v4420_v46, %v7152_v31  ;;  %v5015_v31 = vmul.f32 %v4417_v60, %v3739_v39  ;;  %v5035_v39 = vmul.f32 %v4420_v46, %v3837_v35 }
 0x3b2   :  { %7400 = vst [vmem:[#allocation77_spill] sm:$0xff] %v4959_v42  ;;  %v4979_v18 = vmul.f32 %v4420_v46, %v7405_v20  ;;  %v7406_v42 = vld [vmem:[#allocation114_spill] sm:$0xff]  ;;  %v4999_v20 = vmul.f32 %v4417_v60, %v7153_v15  ;;  %v5019_v15 = vmul.f32 %v4420_v46, %v3767_v32  ;;  %v5039_v32 = vmul.f32 %v4417_v60, %v3839_v33 }
 0x3b3   :  { %v4983_v28 = vmul.f32 %v4417_v60, %v7406_v42  ;;  %v5003_v42 = vmul.f32 %v4420_v46, %v7154_v63  ;;  %v5051_v29 = vmul.f32 %v4420_v46, %v3901_v13  ;;  %v5055_v35 = vmul.f32 %v4417_v60, %v3903_v25 }
 0x3b4   :  { %7408 = vst [vmem:[#allocation81_spill] sm:$0xff] %v4999_v20  ;;  %v7410_v20 = vld [vmem:[#allocation131_spill] sm:$0xff]  ;;  %v5059_v33 = vmul.f32 %v4420_v46, %v3933_v24  ;;  %v5071_v13 = vmul.f32 %v4417_v60, %v3973_v11  ;;  %v5075_v25 = vmul.f32 %v4420_v46, %v4009_v30  ;;  %v5079_v24 = vmul.f32 %v4417_v60, %v4011_v9 }
 0x3b5   :  { %7407 = vst [vmem:[#allocation78_spill] sm:$0xff] %v4983_v28  ;;  %v7409_v28 = vld [vmem:[#allocation126_spill] sm:$0xff]  ;;  %v5023_v63 = vmul.f32 %v4417_v60, %v7410_v20  ;;  %v5043_v20 = vmul.f32 %v4420_v46, %v3869_v5  ;;  %v5091_v11 = vmul.f32 %v4420_v46, %v4085_v55  ;;  %v5095_v30 = vmul.f32 %v4417_v60, %v4087_v22 }
 0x3b6   :  { %v5007_v23 = vmul.f32 %v4417_v60, %v7409_v28  ;;  %v5027_v28 = vmul.f32 %v4420_v46, %v3805_v56  ;;  %7412 = vst [vmem:[#allocation85_spill] sm:$0xff] %v5039_v32  ;;  %v7414_v32 = vld [vmem:[#allocation143_spill] sm:$0xff]  ;;  %v5099_v9 = vmul.f32 %v4420_v46, %v4119_v43  ;;  %v5113_v55 = vmul.f32 %v4420_v46, %v4153_v27 }
 0x3b7   :  { %7411 = vst [vmem:[#allocation82_spill] sm:$0xff] %v5023_v63  ;;  %v7413_v63 = vld [vmem:[#allocation138_spill] sm:$0xff]  ;;  %v5063_v5 = vmul.f32 %v4417_v60, %v7414_v32  ;;  %v5083_v32 = vmul.f32 %v4420_v46, %v4051_v61  ;;  %v5105_v61 = vperm.slane %v4487_v16, 1  ;;  %v5117_v22 = vmul.f32 %v4417_v60, %v4155_v3  ;;  %v7426_v43 = vld [vmem:[#allocation155_spill] sm:$0xff] }
 0x3b8   :  { %v5047_v56 = vmul.f32 %v4417_v60, %v7413_v63  ;;  %v5067_v63 = vmul.f32 %v4420_v46, %v3971_v26  ;;  %7415 = vst [vmem:[#allocation86_spill] sm:$0xff] %v5075_v25  ;;  %v5087_v26 = vmul.f32 %v4417_v60, %v4053_v59  ;;  %v7422_v59 = vld [vmem:[#allocation154_spill] sm:$0xff]  ;;  %v7478_v25 = vld [vmem:[#allocation40_spill] sm:$0xff] }
 0x3b9   :  { %7416 = vst [vmem:[#allocation89_spill] sm:$0xff] %v5079_v24  ;;  %v5102_v24 = vperm.slane %v4487_v16, 0 }
 0x3ba   :  { %7417 = vst [vmem:[#allocation90_spill] sm:$0xff] %v5083_v32  ;;  %v7475_v32 = vld [vmem:[#allocation36_spill] sm:$0xff] }
 0x3bb   :  { %7418 = vst [vmem:[#allocation93_spill] sm:$0xff] %v5087_v26  ;;  %v5109_v26 = vmul.f32 %v4417_v60, %v7422_v59  ;;  %v2206_v59 = vadd.f32 %v5102_v24, %v4425_v19  ;;  %v2208_v27 = vadd.f32 %v5102_v24, %v4433_v0  ;;  %v2209_v19 = vadd.f32 %v5105_v61, %v4437_v10  ;;  %v7438_v0 = vld [vmem:[#allocation117_spill] sm:$0xff] }
 0x3bc   :  { %7419 = vst [vmem:[#allocation94_spill] sm:$0xff] %v5091_v11  ;;  %v5153_v11 = vmul.f32 %v4420_v46, %v7438_v0  ;;  %v7442_v10 = vld [vmem:[#allocation121_spill] sm:$0xff]  ;;  %v5174_v0 = vmul.f32 %v4420_v46, %v4357_v34  ;;  %v2212_v34 = vadd.f32 %v5102_v24, %v4453_v2  ;;  %v2217_v2 = vadd.f32 %v5105_v61, %v4473_v12 }
 0x3bd   :  { %7420 = vst [vmem:[#allocation97_spill] sm:$0xff] %v5095_v30  ;;  %v7428_v30 = vld [vmem:[#allocation156_spill] sm:$0xff]  ;;  %v2223_v12 = vadd.f32 %v5105_v61, %v4499_v4 }
 0x3be   :  { %7421 = vst [vmem:[#allocation98_spill] sm:$0xff] %v5099_v9  ;;  %v5121_v9 = vmul.f32 %v4420_v46, %v7426_v43  ;;  %v5125_v16 = vmul.f32 %v4417_v60, %v7428_v30  ;;  %v7453_v4 = vld [vmem:[#allocation4_spill] sm:$0xff] }
 0x3bf   :  { %7423 = vst [vmem:[#allocation101_spill] sm:$0xff] %v5109_v26  ;;  %v2207_v26 = vadd.f32 %v5105_v61, %v4429_v54 }
 0x3c0   :  { %7424 = vst [vmem:[#allocation102_spill] sm:$0xff] %v5113_v55  ;;  %v7430_v55 = vld [vmem:[#allocation157_spill] sm:$0xff] }
 0x3c1   :  { %7425 = vst [vmem:[#allocation105_spill] sm:$0xff] %v5117_v22  ;;  %v5135_v3 = vmul.f32 %v4420_v46, %v7430_v55  ;;  %v7432_v22 = vld [vmem:[#allocation158_spill] sm:$0xff] }
 0x3c2   :  { %7427 = vst [vmem:[#allocation106_spill] sm:$0xff] %v5121_v9  ;;  %v5139_v43 = vmul.f32 %v4417_v60, %v7432_v22  ;;  %v7434_v9 = vld [vmem:[#allocation159_spill] sm:$0xff]  ;;  %v7440_v55 = vld [vmem:[#allocation118_spill] sm:$0xff]  ;;  %v2210_v22 = vadd.f32 %v5102_v24, %v4445_v44  ;;  %v5183_v44 = vmul.f32 %v4417_v60, %v4359_v6  ;;  %v2214_v6 = vadd.f32 %v5102_v24, %v4461_v21 }
 0x3c3   :  { %7429 = vst [vmem:[#allocation109_spill] sm:$0xff] %v5125_v16  ;;  %v5143_v30 = vmul.f32 %v4420_v46, %v7434_v9  ;;  %v7436_v16 = vld [vmem:[#allocation160_spill] sm:$0xff]  ;;  %v5166_v9 = vmul.f32 %v4420_v46, %v7442_v10  ;;  %v7449_v10 = vld [vmem:[#allocation125_spill] sm:$0xff]  ;;  %v2220_v21 = vadd.f32 %v5102_v24, %v4485_v58  ;;  %v7451_v58 = vld [vmem:[#allocation2_spill] sm:$0xff] }
 0x3c4   :  { %7431 = vst [vmem:[#allocation110_spill] sm:$0xff] %v5135_v3  ;;  %v5149_v54 = vmul.f32 %v4417_v60, %v7436_v16  ;;  %v5157_v3 = vmul.f32 %v4417_v60, %v7440_v55  ;;  %v7444_v16 = vld [vmem:[#allocation122_spill] sm:$0xff]  ;;  %v2211_v55 = vadd.f32 %v5105_v61, %v4449_v51  ;;  %v2213_v51 = vadd.f32 %v5105_v61, %v4457_v41 }
 0x3c5   :  { %7433 = vst [vmem:[#allocation113_spill] sm:$0xff] %v5139_v43  ;;  %v2219_v41 = vadd.f32 %v5105_v61, %v4481_v57  ;;  %v5235_v57 = vadd.f32 %v5105_v61, %v4507_v36  ;;  %v7473_v43 = vld [vmem:[#allocation35_spill] sm:$0xff] }
 0x3c6   :  { %7435 = vst [vmem:[#allocation114_spill] sm:$0xff] %v5143_v30  ;;  %v7471_v30 = vld [vmem:[#allocation32_spill] sm:$0xff] }
 0x3c7   :  { %7437 = vst [vmem:[#allocation126_spill] sm:$0xff] %v5149_v54  ;;  %v5170_v54 = vmul.f32 %v4417_v60, %v7444_v16  ;;  %v5191_v16 = vmul.f32 %v4417_v60, %v7449_v10  ;;  %v7459_v60 = vld [vmem:[#allocation10_spill] sm:$0xff] }
 0x3c8   :  { %7439 = vst [vmem:[#allocation131_spill] sm:$0xff] %v5153_v11  ;;  %v7469_v11 = vld [vmem:[#allocation28_spill] sm:$0xff] }
 0x3c9   :  { %7441 = vst [vmem:[#allocation138_spill] sm:$0xff] %v5157_v3  ;;  %v7468_v3 = vld [vmem:[#allocation27_spill] sm:$0xff] }
 0x3ca   :  { %2402 = vst [vmem:[%s6666_s5] sm:$0xff] %v2206_v59  ;;  %v5187_v59 = vmul.f32 %v4420_v46, %v4391_v50  ;;  %v2215_v50 = vadd.f32 %v5105_v61, %v4465_v47  ;;  %v2221_v47 = vadd.f32 %v5105_v61, %v4491_v49  ;;  %v5239_v49 = vadd.f32 %v5102_v24, %v7451_v58  ;;  %v7456_v58 = vld [vmem:[#allocation7_spill] sm:$0xff]  ;;  %v7457_v46 = vld [vmem:[#allocation8_spill] sm:$0xff] }
 0x3cb   :  { %7443 = vst [vmem:[#allocation143_spill] sm:$0xff] %v5166_v9  ;;  %v7467_v9 = vld [vmem:[#allocation24_spill] sm:$0xff] }
 0x3cc   :  { %7445 = vst [vmem:[#allocation154_spill] sm:$0xff] %v5170_v54  ;;  %v7465_v54 = vld [vmem:[#allocation20_spill] sm:$0xff] }
 0x3cd   :  { %7446 = vst [vmem:[#allocation155_spill] sm:$0xff] %v5174_v0  ;;  %v7464_v0 = vld [vmem:[#allocation19_spill] sm:$0xff] }
 0x3ce   :  { %2403 = vst [vmem:[%s6666_s5 + $0x8] sm:$0xff] %v2207_v26  ;;  %v2216_v26 = vadd.f32 %v5102_v24, %v4469_v48  ;;  %v2222_v48 = vadd.f32 %v5102_v24, %v4495_v38  ;;  %v7452_v38 = vld [vmem:[#allocation3_spill] sm:$0xff] }
 0x3cf   :  { %7447 = vst [vmem:[#allocation156_spill] sm:$0xff] %v5183_v44  ;;  %v7463_v44 = vld [vmem:[#allocation16_spill] sm:$0xff] }
 0x3d0   :  { %7448 = vst [vmem:[#allocation157_spill] sm:$0xff] %v5187_v59  ;;  %v7461_v59 = vld [vmem:[#allocation12_spill] sm:$0xff] }
 0x3d1   :  { %7450 = vst [vmem:[#allocation158_spill] sm:$0xff] %v5191_v16  ;;  %v7460_v16 = vld [vmem:[#allocation11_spill] sm:$0xff] }
 0x3d2   :  { %2404 = vst [vmem:[%s6666_s5 + $0x10] sm:$0xff] %v2208_v27  ;;  %v2218_v27 = vadd.f32 %v5102_v24, %v4477_v45  ;;  %v5228_v45 = vadd.f32 %v5102_v24, %v4503_v53  ;;  %v5247_v53 = vadd.f32 %v5102_v24, %v7453_v4  ;;  %v5266_v4 = vadd.f32 %v5102_v24, %v7457_v46 }
 0x3d3   :  { %2405 = vst [vmem:[%s6666_s5 + $0x18] sm:$0xff] %v2209_v19  ;;  %v5243_v19 = vadd.f32 %v5105_v61, %v7452_v38  ;;  %v5262_v38 = vadd.f32 %v5105_v61, %v7456_v58  ;;  %v5281_v58 = vadd.f32 %v5105_v61, %v7460_v16  ;;  %v5285_v46 = vadd.f32 %v5102_v24, %v7461_v59 }
 0x3d4   :  { %2406 = vst [vmem:[%s6666_s5 + $0x20] sm:$0xff] %v2210_v22  ;;  %v7454_v22 = vld [vmem:[#allocation5_spill] sm:$0xff]  ;;  %v5300_v16 = vadd.f32 %v5105_v61, %v7464_v0  ;;  %v5304_v59 = vadd.f32 %v5102_v24, %v7465_v54  ;;  %v5319_v0 = vadd.f32 %v5105_v61, %v7468_v3  ;;  %v5323_v54 = vadd.f32 %v5102_v24, %v7469_v11 }
 0x3d5   :  { %2407 = vst [vmem:[%s6666_s5 + $0x28] sm:$0xff] %v2211_v55  ;;  %v5254_v36 = vadd.f32 %v5105_v61, %v7454_v22  ;;  %v7455_v55 = vld [vmem:[#allocation6_spill] sm:$0xff]  ;;  %v5338_v3 = vadd.f32 %v5105_v61, %v7473_v43  ;;  %v5342_v11 = vadd.f32 %v5102_v24, %v7475_v32 }
 0x3d6   :  { %2408 = vst [vmem:[%s6666_s5 + $0x30] sm:$0xff] %v2212_v34  ;;  %v5258_v10 = vadd.f32 %v5102_v24, %v7455_v55  ;;  %v7458_v34 = vld [vmem:[#allocation9_spill] sm:$0xff]  ;;  %v5277_v55 = vadd.f32 %v5102_v24, %v7459_v60  ;;  %v5296_v60 = vadd.f32 %v5102_v24, %v7463_v44  ;;  %v5315_v44 = vadd.f32 %v5102_v24, %v7467_v9 }
 0x3d7   :  { %2409 = vst [vmem:[%s6666_s5 + $0x38] sm:$0xff] %v2213_v51  ;;  %v5273_v22 = vadd.f32 %v5105_v61, %v7458_v34  ;;  %v7462_v51 = vld [vmem:[#allocation15_spill] sm:$0xff]  ;;  %v5334_v9 = vadd.f32 %v5102_v24, %v7471_v30  ;;  %v5353_v30 = vadd.f32 %v5102_v24, %v7478_v25 }
 0x3d8   :  { %2410 = vst [vmem:[%s6666_s5 + $0x40] sm:$0xff] %v2214_v6  ;;  %v5292_v34 = vadd.f32 %v5105_v61, %v7462_v51  ;;  %v7466_v6 = vld [vmem:[#allocation23_spill] sm:$0xff] }
 0x3d9   :  { %2411 = vst [vmem:[%s6666_s5 + $0x48] sm:$0xff] %v2215_v50  ;;  %v5311_v51 = vadd.f32 %v5105_v61, %v7466_v6  ;;  %v7470_v50 = vld [vmem:[#allocation31_spill] sm:$0xff] }
 0x3da   :  { %2412 = vst [vmem:[%s6666_s5 + $0x50] sm:$0xff] %v2216_v26  ;;  %v5330_v6 = vadd.f32 %v5105_v61, %v7470_v50  ;;  %v7476_v26 = vld [vmem:[#allocation39_spill] sm:$0xff] }
 0x3db   :  { %7472 = vst [vmem:[#allocation159_spill] sm:$0xff] %v5334_v9  ;;  %v5349_v50 = vadd.f32 %v5105_v61, %v7476_v26  ;;  %v7480_v9 = vld [vmem:[#allocation43_spill] sm:$0xff] }
 0x3dc   :  { %7474 = vst [vmem:[#allocation160_spill] sm:$0xff] %v5338_v3  ;;  %v5357_v43 = vadd.f32 %v5105_v61, %v7480_v9  ;;  %v7482_v3 = vld [vmem:[#allocation44_spill] sm:$0xff] }
 0x3dd   :  { %2413 = vst [vmem:[%s6666_s5 + $0x58] sm:$0xff] %v2217_v2  ;;  %v5361_v32 = vadd.f32 %v5102_v24, %v7482_v3  ;;  %v7483_v2 = vld [vmem:[#allocation47_spill] sm:$0xff] }
 0x3de   :  { %7477 = vst [vmem:[#allocation117_spill] sm:$0xff] %v5349_v50  ;;  %v5368_v26 = vadd.f32 %v5105_v61, %v7483_v2  ;;  %v7485_v50 = vld [vmem:[#allocation48_spill] sm:$0xff] }
 0x3df   :  { %7479 = vst [vmem:[#allocation118_spill] sm:$0xff] %v5353_v30  ;;  %v5372_v25 = vadd.f32 %v5102_v24, %v7485_v50  ;;  %v7487_v30 = vld [vmem:[#allocation51_spill] sm:$0xff] }
 0x3e0   :  { %7481 = vst [vmem:[#allocation121_spill] sm:$0xff] %v5357_v43  ;;  %v5376_v9 = vadd.f32 %v5105_v61, %v7487_v30  ;;  %v7489_v43 = vld [vmem:[#allocation52_spill] sm:$0xff] }
 0x3e1   :  { %2414 = vst [vmem:[%s6666_s5 + $0x60] sm:$0xff] %v2218_v27  ;;  %v5380_v3 = vadd.f32 %v5102_v24, %v7489_v43  ;;  %v7490_v27 = vld [vmem:[#allocation59_spill] sm:$0xff] }
 0x3e2   :  { %7484 = vst [vmem:[#allocation122_spill] sm:$0xff] %v5368_v26  ;;  %v5387_v2 = vadd.f32 %v5102_v24, %v7490_v27  ;;  %v7492_v26 = vld [vmem:[#allocation60_spill] sm:$0xff] }
 0x3e3   :  { %7486 = vst [vmem:[#allocation125_spill] sm:$0xff] %v5372_v25  ;;  %v5391_v50 = vadd.f32 %v5105_v61, %v7492_v26  ;;  %v7494_v25 = vld [vmem:[#allocation63_spill] sm:$0xff] }
 0x3e4   :  { %7488 = vst [vmem:[#allocation2_spill] sm:$0xff] %v5376_v9  ;;  %v5395_v30 = vadd.f32 %v5102_v24, %v7494_v25  ;;  %v7496_v9 = vld [vmem:[#allocation64_spill] sm:$0xff] }
 0x3e5   :  { %2415 = vst [vmem:[%s6666_s5 + $0x68] sm:$0xff] %v2219_v41  ;;  %v5399_v43 = vadd.f32 %v5105_v61, %v7496_v9  ;;  %v7497_v41 = vld [vmem:[#allocation67_spill] sm:$0xff] }
 0x3e6   :  { %7491 = vst [vmem:[#allocation3_spill] sm:$0xff] %v5387_v2  ;;  %v5406_v27 = vadd.f32 %v5102_v24, %v7497_v41  ;;  %v7499_v2 = vld [vmem:[#allocation68_spill] sm:$0xff] }
 0x3e7   :  { %7493 = vst [vmem:[#allocation4_spill] sm:$0xff] %v5391_v50  ;;  %v5410_v26 = vadd.f32 %v5105_v61, %v7499_v2  ;;  %v7501_v50 = vld [vmem:[#allocation71_spill] sm:$0xff] }
 0x3e8   :  { %7495 = vst [vmem:[#allocation5_spill] sm:$0xff] %v5395_v30  ;;  %v5414_v25 = vadd.f32 %v5102_v24, %v7501_v50  ;;  %v7503_v30 = vld [vmem:[#allocation72_spill] sm:$0xff] }
 0x3e9   :  { %2416 = vst [vmem:[%s6666_s5 + $0x70] sm:$0xff] %v2220_v21  ;;  %v5418_v9 = vadd.f32 %v5105_v61, %v7503_v30  ;;  %v7504_v21 = vld [vmem:[#allocation75_spill] sm:$0xff] }
 0x3ea   :  { %7498 = vst [vmem:[#allocation6_spill] sm:$0xff] %v5406_v27  ;;  %v5425_v41 = vadd.f32 %v5102_v24, %v7504_v21  ;;  %v7506_v27 = vld [vmem:[#allocation76_spill] sm:$0xff] }
 0x3eb   :  { %7500 = vst [vmem:[#allocation7_spill] sm:$0xff] %v5410_v26  ;;  %v5429_v2 = vadd.f32 %v5105_v61, %v7506_v27  ;;  %v7508_v26 = vld [vmem:[#allocation79_spill] sm:$0xff] }
 0x3ec   :  { %7502 = vst [vmem:[#allocation8_spill] sm:$0xff] %v5414_v25  ;;  %v5433_v50 = vadd.f32 %v5102_v24, %v7508_v26  ;;  %v7510_v25 = vld [vmem:[#allocation80_spill] sm:$0xff] }
 0x3ed   :  { %2417 = vst [vmem:[%s6666_s5 + $0x78] sm:$0xff] %v2221_v47  ;;  %v5437_v30 = vadd.f32 %v5105_v61, %v7510_v25  ;;  %v7511_v47 = vld [vmem:[#allocation83_spill] sm:$0xff] }
 0x3ee   :  { %7505 = vst [vmem:[#allocation9_spill] sm:$0xff] %v5425_v41  ;;  %v5444_v21 = vadd.f32 %v5102_v24, %v7511_v47  ;;  %v7513_v41 = vld [vmem:[#allocation107_spill] sm:$0xff] }
 0x3ef   :  { %7507 = vst [vmem:[#allocation10_spill] sm:$0xff] %v5429_v2  ;;  %v5448_v27 = vadd.f32 %v5105_v61, %v7513_v41  ;;  %v7515_v2 = vld [vmem:[#allocation108_spill] sm:$0xff] }
 0x3f0   :  { %7509 = vst [vmem:[#allocation11_spill] sm:$0xff] %v5433_v50  ;;  %v5452_v26 = vadd.f32 %v5102_v24, %v7515_v2  ;;  %v7517_v50 = vld [vmem:[#allocation111_spill] sm:$0xff] }
 0x3f1   :  { %2418 = vst [vmem:[%s6666_s5 + $0x80] sm:$0xff] %v2222_v48  ;;  %v5456_v25 = vadd.f32 %v5105_v61, %v7517_v50  ;;  %v7518_v48 = vld [vmem:[#allocation112_spill] sm:$0xff] }
 0x3f2   :  { %7512 = vst [vmem:[#allocation12_spill] sm:$0xff] %v5444_v21  ;;  %v5463_v47 = vadd.f32 %v5102_v24, %v7518_v48  ;;  %v7520_v21 = vld [vmem:[#allocation115_spill] sm:$0xff] }
 0x3f3   :  { %7514 = vst [vmem:[#allocation15_spill] sm:$0xff] %v5448_v27  ;;  %v5467_v41 = vadd.f32 %v5105_v61, %v7520_v21  ;;  %v7522_v27 = vld [vmem:[#allocation116_spill] sm:$0xff] }
 0x3f4   :  { %7516 = vst [vmem:[#allocation16_spill] sm:$0xff] %v5452_v26  ;;  %v5471_v2 = vadd.f32 %v5102_v24, %v7522_v27  ;;  %v7524_v26 = vld [vmem:[#allocation119_spill] sm:$0xff] }
 0x3f5   :  { %2419 = vst [vmem:[%s6666_s5 + $0x88] sm:$0xff] %v2223_v12  ;;  %v5475_v50 = vadd.f32 %v5105_v61, %v7524_v26  ;;  %v7525_v12 = vld [vmem:[#allocation120_spill] sm:$0xff] }
 0x3f6   :  { %7519 = vst [vmem:[#allocation19_spill] sm:$0xff] %v5463_v47  ;;  %v5483_v48 = vadd.f32 %v5102_v24, %v7525_v12  ;;  %v7527_v47 = vld [vmem:[#allocation123_spill] sm:$0xff] }
 0x3f7   :  { %7521 = vst [vmem:[#allocation20_spill] sm:$0xff] %v5467_v41  ;;  %v5487_v21 = vadd.f32 %v5105_v61, %v7527_v47  ;;  %v7529_v41 = vld [vmem:[#allocation124_spill] sm:$0xff] }
 0x3f8   :  { %7523 = vst [vmem:[#allocation23_spill] sm:$0xff] %v5471_v2  ;;  %v5491_v27 = vadd.f32 %v5102_v24, %v7529_v41  ;;  %v7531_v2 = vld [vmem:[#allocation127_spill] sm:$0xff] }
 0x3f9   :  { %2420 = vst [vmem:[%s6666_s5 + $0x90] sm:$0xff] %v5228_v45  ;;  %v5495_v26 = vadd.f32 %v5105_v61, %v7531_v2  ;;  %v7532_v45 = vld [vmem:[#allocation128_spill] sm:$0xff] }
 0x3fa   :  { %7526 = vst [vmem:[#allocation24_spill] sm:$0xff] %v5483_v48  ;;  %v5503_v12 = vadd.f32 %v5102_v24, %v7532_v45  ;;  %v7534_v48 = vld [vmem:[#allocation129_spill] sm:$0xff] }
 0x3fb   :  { %7528 = vst [vmem:[#allocation27_spill] sm:$0xff] %v5487_v21  ;;  %v5507_v47 = vadd.f32 %v5105_v61, %v7534_v48  ;;  %v7536_v21 = vld [vmem:[#allocation130_spill] sm:$0xff] }
 0x3fc   :  { %7530 = vst [vmem:[#allocation28_spill] sm:$0xff] %v5491_v27  ;;  %v5511_v41 = vadd.f32 %v5102_v24, %v7536_v21  ;;  %v7538_v27 = vld [vmem:[#allocation132_spill] sm:$0xff] }
 0x3fd   :  { %2421 = vst [vmem:[%s6666_s5 + $0x98] sm:$0xff] %v5235_v57  ;;  %v5515_v2 = vadd.f32 %v5105_v61, %v7538_v27  ;;  %v7539_v57 = vld [vmem:[#allocation133_spill] sm:$0xff] }
 0x3fe   :  { %7533 = vst [vmem:[#allocation31_spill] sm:$0xff] %v5503_v12  ;;  %v5523_v45 = vadd.f32 %v5102_v24, %v7539_v57  ;;  %v7541_v12 = vld [vmem:[#allocation134_spill] sm:$0xff] }
 0x3ff   :  { %7535 = vst [vmem:[#allocation32_spill] sm:$0xff] %v5507_v47  ;;  %v5527_v48 = vadd.f32 %v5105_v61, %v7541_v12  ;;  %v7543_v47 = vld [vmem:[#allocation135_spill] sm:$0xff] }
 0x400   :  { %7537 = vst [vmem:[#allocation35_spill] sm:$0xff] %v5511_v41  ;;  %v5531_v21 = vadd.f32 %v5102_v24, %v7543_v47  ;;  %v7545_v41 = vld [vmem:[#allocation136_spill] sm:$0xff] }
 0x401   :  { %2422 = vst [vmem:[%s6666_s5 + $0xa0] sm:$0xff] %v5239_v49  ;;  %v5535_v27 = vadd.f32 %v5105_v61, %v7545_v41  ;;  %v7546_v49 = vld [vmem:[#allocation137_spill] sm:$0xff] }
 0x402   :  { %7540 = vst [vmem:[#allocation36_spill] sm:$0xff] %v5523_v45  ;;  %v5543_v57 = vadd.f32 %v5102_v24, %v7546_v49  ;;  %v7548_v45 = vld [vmem:[#allocation139_spill] sm:$0xff] }
 0x403   :  { %7542 = vst [vmem:[#allocation39_spill] sm:$0xff] %v5527_v48  ;;  %v5547_v12 = vadd.f32 %v5105_v61, %v7548_v45  ;;  %v7550_v48 = vld [vmem:[#allocation140_spill] sm:$0xff] }
 0x404   :  { %7544 = vst [vmem:[#allocation40_spill] sm:$0xff] %v5531_v21  ;;  %v5551_v47 = vadd.f32 %v5102_v24, %v7550_v48  ;;  %v7552_v21 = vld [vmem:[#allocation141_spill] sm:$0xff] }
 0x405   :  { %2423 = vst [vmem:[%s6666_s5 + $0xa8] sm:$0xff] %v5243_v19  ;;  %v5555_v41 = vadd.f32 %v5105_v61, %v7552_v21  ;;  %v7553_v19 = vld [vmem:[#allocation142_spill] sm:$0xff] }
 0x406   :  { %7547 = vst [vmem:[#allocation43_spill] sm:$0xff] %v5543_v57  ;;  %v5563_v49 = vadd.f32 %v5102_v24, %v7553_v19  ;;  %v7555_v57 = vld [vmem:[#allocation144_spill] sm:$0xff] }
 0x407   :  { %7549 = vst [vmem:[#allocation44_spill] sm:$0xff] %v5547_v12  ;;  %v5567_v45 = vadd.f32 %v5105_v61, %v7555_v57  ;;  %v7557_v12 = vld [vmem:[#allocation145_spill] sm:$0xff] }
 0x408   :  { %7551 = vst [vmem:[#allocation47_spill] sm:$0xff] %v5551_v47  ;;  %v5571_v48 = vadd.f32 %v5102_v24, %v7557_v12  ;;  %v7559_v47 = vld [vmem:[#allocation146_spill] sm:$0xff] }
 0x409   :  { %2424 = vst [vmem:[%s6666_s5 + $0xb0] sm:$0xff] %v5247_v53  ;;  %v5575_v21 = vadd.f32 %v5105_v61, %v7559_v47  ;;  %v7560_v53 = vld [vmem:[#allocation147_spill] sm:$0xff] }
 0x40a   :  { %7554 = vst [vmem:[#allocation48_spill] sm:$0xff] %v5563_v49  ;;  %v5583_v19 = vadd.f32 %v5102_v24, %v7560_v53  ;;  %v7562_v49 = vld [vmem:[#allocation148_spill] sm:$0xff] }
 0x40b   :  { %7556 = vst [vmem:[#allocation51_spill] sm:$0xff] %v5567_v45  ;;  %v5587_v57 = vadd.f32 %v5105_v61, %v7562_v49  ;;  %v7564_v45 = vld [vmem:[#allocation149_spill] sm:$0xff] }
 0x40c   :  { %7558 = vst [vmem:[#allocation52_spill] sm:$0xff] %v5571_v48  ;;  %v5591_v12 = vadd.f32 %v5102_v24, %v7564_v45  ;;  %v7566_v48 = vld [vmem:[#allocation150_spill] sm:$0xff] }
 0x40d   :  { %2425 = vst [vmem:[%s6666_s5 + $0xb8] sm:$0xff] %v5254_v36  ;;  %v5595_v47 = vadd.f32 %v5105_v61, %v7566_v48  ;;  %v7567_v36 = vld [vmem:[#allocation151_spill] sm:$0xff] }
 0x40e   :  { %7561 = vst [vmem:[#allocation59_spill] sm:$0xff] %v5583_v19  ;;  %v5603_v53 = vadd.f32 %v5102_v24, %v7567_v36  ;;  %v7569_v19 = vld [vmem:[#allocation152_spill] sm:$0xff] }
 0x40f   :  { %7563 = vst [vmem:[#allocation60_spill] sm:$0xff] %v5587_v57  ;;  %v5607_v49 = vadd.f32 %v5105_v61, %v7569_v19  ;;  %v7571_v57 = vld [vmem:[#allocation153_spill] sm:$0xff] }
 0x410   :  { %7565 = vst [vmem:[#allocation63_spill] sm:$0xff] %v5591_v12  ;;  %v5611_v45 = vadd.f32 %v5102_v24, %v7571_v57  ;;  %v7573_v12 = vld [vmem:[#allocation13_spill] sm:$0xff] }
 0x411   :  { %2426 = vst [vmem:[%s6666_s5 + $0xc0] sm:$0xff] %v5258_v10  ;;  %v5615_v48 = vadd.f32 %v5105_v61, %v7573_v12  ;;  %v7574_v10 = vld [vmem:[#allocation14_spill] sm:$0xff] }
 0x412   :  { %7568 = vst [vmem:[#allocation64_spill] sm:$0xff] %v5603_v53  ;;  %v5623_v36 = vadd.f32 %v5102_v24, %v7574_v10  ;;  %v7576_v53 = vld [vmem:[#allocation17_spill] sm:$0xff] }
 0x413   :  { %7570 = vst [vmem:[#allocation67_spill] sm:$0xff] %v5607_v49  ;;  %v5627_v19 = vadd.f32 %v5105_v61, %v7576_v53  ;;  %v7578_v49 = vld [vmem:[#allocation18_spill] sm:$0xff] }
 0x414   :  { %7572 = vst [vmem:[#allocation68_spill] sm:$0xff] %v5611_v45  ;;  %v5631_v57 = vadd.f32 %v5102_v24, %v7578_v49  ;;  %v7580_v45 = vld [vmem:[#allocation21_spill] sm:$0xff] }
 0x415   :  { %2427 = vst [vmem:[%s6666_s5 + $0xc8] sm:$0xff] %v5262_v38  ;;  %v5635_v12 = vadd.f32 %v5105_v61, %v7580_v45  ;;  %v7581_v38 = vld [vmem:[#allocation22_spill] sm:$0xff] }
 0x416   :  { %7575 = vst [vmem:[#allocation71_spill] sm:$0xff] %v5623_v36  ;;  %v5643_v10 = vadd.f32 %v5102_v24, %v7581_v38  ;;  %v7583_v36 = vld [vmem:[#allocation25_spill] sm:$0xff] }
 0x417   :  { %7577 = vst [vmem:[#allocation72_spill] sm:$0xff] %v5627_v19  ;;  %v5647_v53 = vadd.f32 %v5105_v61, %v7583_v36  ;;  %v7585_v19 = vld [vmem:[#allocation26_spill] sm:$0xff] }
 0x418   :  { %7579 = vst [vmem:[#allocation75_spill] sm:$0xff] %v5631_v57  ;;  %v5651_v49 = vadd.f32 %v5102_v24, %v7585_v19  ;;  %v7587_v57 = vld [vmem:[#allocation29_spill] sm:$0xff] }
 0x419   :  { %2428 = vst [vmem:[%s6666_s5 + $0xd0] sm:$0xff] %v5266_v4  ;;  %v5655_v45 = vadd.f32 %v5105_v61, %v7587_v57  ;;  %v7588_v4 = vld [vmem:[#allocation30_spill] sm:$0xff] }
 0x41a   :  { %7582 = vst [vmem:[#allocation76_spill] sm:$0xff] %v5643_v10  ;;  %v5663_v38 = vadd.f32 %v5102_v24, %v7588_v4  ;;  %v7590_v10 = vld [vmem:[#allocation33_spill] sm:$0xff] }
 0x41b   :  { %7584 = vst [vmem:[#allocation79_spill] sm:$0xff] %v5647_v53  ;;  %v5667_v36 = vadd.f32 %v5105_v61, %v7590_v10  ;;  %v7592_v53 = vld [vmem:[#allocation34_spill] sm:$0xff] }
 0x41c   :  { %7586 = vst [vmem:[#allocation80_spill] sm:$0xff] %v5651_v49  ;;  %v5671_v19 = vadd.f32 %v5102_v24, %v7592_v53  ;;  %v7594_v49 = vld [vmem:[#allocation37_spill] sm:$0xff] }
 0x41d   :  { %2429 = vst [vmem:[%s6666_s5 + $0xd8] sm:$0xff] %v5273_v22  ;;  %v5675_v57 = vadd.f32 %v5105_v61, %v7594_v49  ;;  %v7595_v22 = vld [vmem:[#allocation38_spill] sm:$0xff] }
 0x41e   :  { %7589 = vst [vmem:[#allocation83_spill] sm:$0xff] %v5663_v38  ;;  %v5683_v4 = vadd.f32 %v5102_v24, %v7595_v22  ;;  %v7597_v38 = vld [vmem:[#allocation41_spill] sm:$0xff] }
 0x41f   :  { %7591 = vst [vmem:[#allocation107_spill] sm:$0xff] %v5667_v36  ;;  %v5687_v10 = vadd.f32 %v5105_v61, %v7597_v38  ;;  %v7599_v36 = vld [vmem:[#allocation42_spill] sm:$0xff] }
 0x420   :  { %7593 = vst [vmem:[#allocation108_spill] sm:$0xff] %v5671_v19  ;;  %v5691_v53 = vadd.f32 %v5102_v24, %v7599_v36  ;;  %v7601_v19 = vld [vmem:[#allocation45_spill] sm:$0xff] }
 0x421   :  { %2430 = vst [vmem:[%s6666_s5 + $0xe0] sm:$0xff] %v5277_v55  ;;  %v5695_v49 = vadd.f32 %v5105_v61, %v7601_v19  ;;  %v7602_v55 = vld [vmem:[#allocation46_spill] sm:$0xff] }
 0x422   :  { %7596 = vst [vmem:[#allocation111_spill] sm:$0xff] %v5683_v4  ;;  %v5703_v22 = vadd.f32 %v5102_v24, %v7602_v55  ;;  %v7604_v4 = vld [vmem:[#allocation49_spill] sm:$0xff] }
 0x423   :  { %7598 = vst [vmem:[#allocation112_spill] sm:$0xff] %v5687_v10  ;;  %v5707_v38 = vadd.f32 %v5105_v61, %v7604_v4  ;;  %v7606_v10 = vld [vmem:[#allocation50_spill] sm:$0xff] }
 0x424   :  { %7600 = vst [vmem:[#allocation115_spill] sm:$0xff] %v5691_v53  ;;  %v5711_v36 = vadd.f32 %v5102_v24, %v7606_v10  ;;  %v7608_v53 = vld [vmem:[#allocation53_spill] sm:$0xff] }
 0x425   :  { %2431 = vst [vmem:[%s6666_s5 + $0xe8] sm:$0xff] %v5281_v58  ;;  %v5715_v19 = vadd.f32 %v5105_v61, %v7608_v53  ;;  %v7609_v58 = vld [vmem:[#allocation54_spill] sm:$0xff] }
 0x426   :  { %7603 = vst [vmem:[#allocation116_spill] sm:$0xff] %v5703_v22  ;;  %v5723_v55 = vadd.f32 %v5102_v24, %v7609_v58  ;;  %v7611_v22 = vld [vmem:[#allocation57_spill] sm:$0xff] }
 0x427   :  { %7605 = vst [vmem:[#allocation119_spill] sm:$0xff] %v5707_v38  ;;  %v5727_v4 = vadd.f32 %v5105_v61, %v7611_v22  ;;  %v7613_v38 = vld [vmem:[#allocation58_spill] sm:$0xff] }
 0x428   :  { %7607 = vst [vmem:[#allocation120_spill] sm:$0xff] %v5711_v36  ;;  %v5731_v10 = vadd.f32 %v5102_v24, %v7613_v38  ;;  %v7615_v36 = vld [vmem:[#allocation61_spill] sm:$0xff] }
 0x429   :  { %2432 = vst [vmem:[%s6666_s5 + $0xf0] sm:$0xff] %v5285_v46  ;;  %v5735_v53 = vadd.f32 %v5105_v61, %v7615_v36  ;;  %v7616_v46 = vld [vmem:[#allocation62_spill] sm:$0xff] }
 0x42a   :  { %7610 = vst [vmem:[#allocation123_spill] sm:$0xff] %v5723_v55  ;;  %v5743_v58 = vadd.f32 %v5102_v24, %v7616_v46  ;;  %v7618_v55 = vld [vmem:[#allocation65_spill] sm:$0xff] }
 0x42b   :  { %7612 = vst [vmem:[#allocation124_spill] sm:$0xff] %v5727_v4  ;;  %v5747_v22 = vadd.f32 %v5105_v61, %v7618_v55  ;;  %v7620_v4 = vld [vmem:[#allocation66_spill] sm:$0xff] }
 0x42c   :  { %7614 = vst [vmem:[#allocation127_spill] sm:$0xff] %v5731_v10  ;;  %v5751_v38 = vadd.f32 %v5102_v24, %v7620_v4  ;;  %v7622_v10 = vld [vmem:[#allocation69_spill] sm:$0xff] }
 0x42d   :  { %2433 = vst [vmem:[%s6666_s5 + $0xf8] sm:$0xff] %v5292_v34  ;;  %v5755_v36 = vadd.f32 %v5105_v61, %v7622_v10  ;;  %v7623_v34 = vld [vmem:[#allocation70_spill] sm:$0xff] }
 0x42e   :  { %7617 = vst [vmem:[#allocation128_spill] sm:$0xff] %v5743_v58  ;;  %v5763_v46 = vadd.f32 %v5102_v24, %v7623_v34  ;;  %v7624_v58 = vld [vmem:[#allocation73_spill] sm:$0xff] }
 0x42f   :  { %7619 = vst [vmem:[#allocation129_spill] sm:$0xff] %v5747_v22  ;;  %v5767_v55 = vadd.f32 %v5105_v61, %v7624_v58  ;;  %v7625_v22 = vld [vmem:[#allocation74_spill] sm:$0xff]  ;;  %v5787_v58 = vadd.f32 %v5105_v61, %v4967_v8 }
 0x430   :  { %7621 = vst [vmem:[#allocation130_spill] sm:$0xff] %v5751_v38  ;;  %v5771_v4 = vadd.f32 %v5102_v24, %v7625_v22  ;;  %v7626_v38 = vld [vmem:[#allocation77_spill] sm:$0xff]  ;;  %v5791_v22 = vadd.f32 %v5102_v24, %v4971_v14  ;;  %v5811_v14 = vadd.f32 %v5102_v24, %v4987_v7  ;;  %v5831_v7 = vadd.f32 %v5102_v24, %v5003_v42 }
 0x431   :  { %2434 = vst [vmem:[%s6666_s5 + $0x100] sm:$0xff] %v5296_v60  ;;  %v5775_v10 = vadd.f32 %v5105_v61, %v7626_v38  ;;  %v5783_v60 = vadd.f32 %v5102_v24, %v4963_v52  ;;  %v5795_v38 = vadd.f32 %v5105_v61, %v4975_v1  ;;  %v5803_v52 = vadd.f32 %v5102_v24, %v4979_v18 }
 0x432   :  { %2435 = vst [vmem:[%s6666_s5 + $0x108] sm:$0xff] %v5300_v16  ;;  %v7627_v16 = vld [vmem:[#allocation78_spill] sm:$0xff]  ;;  %v5815_v1 = vadd.f32 %v5105_v61, %v4991_v62  ;;  %v5823_v18 = vadd.f32 %v5102_v24, %v4995_v40  ;;  %v5835_v62 = vadd.f32 %v5105_v61, %v5007_v23  ;;  %v5843_v40 = vadd.f32 %v5102_v24, %v5011_v17 }
 0x433   :  { %2436 = vst [vmem:[%s6666_s5 + $0x110] sm:$0xff] %v5304_v59  ;;  %v5807_v8 = vadd.f32 %v5105_v61, %v7627_v16  ;;  %v7628_v59 = vld [vmem:[#allocation81_spill] sm:$0xff]  ;;  %v5851_v42 = vadd.f32 %v5102_v24, %v5019_v15  ;;  %v7629_v16 = vld [vmem:[#allocation82_spill] sm:$0xff]  ;;  %v5863_v17 = vadd.f32 %v5102_v24, %v5027_v28  ;;  %v5871_v15 = vadd.f32 %v5102_v24, %v5035_v39 }
 0x434   :  { %2437 = vst [vmem:[%s6666_s5 + $0x118] sm:$0xff] %v5311_v51  ;;  %v5827_v34 = vadd.f32 %v5105_v61, %v7628_v59  ;;  %v5847_v51 = vadd.f32 %v5105_v61, %v5015_v31  ;;  %v5855_v23 = vadd.f32 %v5105_v61, %v7629_v16  ;;  %v5867_v31 = vadd.f32 %v5105_v61, %v5031_v37  ;;  %v7639_v16 = vld [vmem:[#allocation89_spill] sm:$0xff] }
 0x435   :  { %2438 = vst [vmem:[%s6666_s5 + $0x120] sm:$0xff] %v5315_v44  ;;  %v7630_v44 = vld [vmem:[#allocation85_spill] sm:$0xff]  ;;  %v5883_v28 = vadd.f32 %v5102_v24, %v5043_v20  ;;  %v5887_v37 = vadd.f32 %v5105_v61, %v5047_v56  ;;  %v5891_v39 = vadd.f32 %v5102_v24, %v5051_v29  ;;  %v5903_v20 = vadd.f32 %v5102_v24, %v5059_v33 }
 0x436   :  { %2439 = vst [vmem:[%s6666_s5 + $0x128] sm:$0xff] %v5319_v0  ;;  %v5875_v59 = vadd.f32 %v5105_v61, %v7630_v44  ;;  %v5895_v0 = vadd.f32 %v5105_v61, %v5055_v35  ;;  %v5907_v56 = vadd.f32 %v5105_v61, %v5063_v5  ;;  %v5911_v29 = vadd.f32 %v5102_v24, %v5067_v63  ;;  %v7641_v44 = vld [vmem:[#allocation90_spill] sm:$0xff] }
 0x437   :  { %2440 = vst [vmem:[%s6666_s5 + $0x130] sm:$0xff] %v5323_v54  ;;  %v5915_v35 = vadd.f32 %v5105_v61, %v5071_v13  ;;  %v7636_v54 = vld [vmem:[#allocation159_spill] sm:$0xff]  ;;  %v5927_v5 = vadd.f32 %v5105_v61, %v7639_v16  ;;  %v5931_v63 = vadd.f32 %v5102_v24, %v7641_v44 }
 0x438   :  { %7631 = vst [vmem:[#allocation132_spill] sm:$0xff] %v5895_v0 }
 0x439   :  { %2441 = vst [vmem:[%s6666_s5 + $0x138] sm:$0xff] %v5330_v6  ;;  %v7637_v6 = vld [vmem:[#allocation86_spill] sm:$0xff] }
 0x43a   :  { %7632 = vst [vmem:[#allocation133_spill] sm:$0xff] %v5903_v20  ;;  %v5923_v33 = vadd.f32 %v5102_v24, %v7637_v6  ;;  %v7698_v20 = vld [vmem:[#allocation2_spill] sm:$0xff] }
 0x43b   :  { %7633 = vst [vmem:[#allocation134_spill] sm:$0xff] %v5907_v56  ;;  %v7696_v56 = vld [vmem:[#allocation125_spill] sm:$0xff] }
 0x43c   :  { %7634 = vst [vmem:[#allocation135_spill] sm:$0xff] %v5911_v29  ;;  %v7643_v29 = vld [vmem:[#allocation93_spill] sm:$0xff] }
 0x43d   :  { %7635 = vst [vmem:[#allocation136_spill] sm:$0xff] %v5915_v35  ;;  %v5935_v13 = vadd.f32 %v5105_v61, %v7643_v29  ;;  %v7645_v35 = vld [vmem:[#allocation160_spill] sm:$0xff] }
 0x43e   :  { %2442 = vst [vmem:[%s6666_s5 + $0x140] sm:$0xff] %v7636_v54  ;;  %v7646_v54 = vld [vmem:[#allocation94_spill] sm:$0xff] }
 0x43f   :  { %7638 = vst [vmem:[#allocation137_spill] sm:$0xff] %v5923_v33  ;;  %v5943_v6 = vadd.f32 %v5102_v24, %v7646_v54  ;;  %v7648_v33 = vld [vmem:[#allocation97_spill] sm:$0xff] }
 0x440   :  { %7640 = vst [vmem:[#allocation139_spill] sm:$0xff] %v5927_v5  ;;  %v5947_v16 = vadd.f32 %v5105_v61, %v7648_v33  ;;  %v7650_v5 = vld [vmem:[#allocation98_spill] sm:$0xff] }
 0x441   :  { %7642 = vst [vmem:[#allocation140_spill] sm:$0xff] %v5931_v63  ;;  %v5951_v44 = vadd.f32 %v5102_v24, %v7650_v5  ;;  %v7652_v63 = vld [vmem:[#allocation101_spill] sm:$0xff] }
 0x442   :  { %7644 = vst [vmem:[#allocation141_spill] sm:$0xff] %v5935_v13  ;;  %v5955_v29 = vadd.f32 %v5105_v61, %v7652_v63 }
 0x443   :  { %2443 = vst [vmem:[%s6666_s5 + $0x148] sm:$0xff] %v7645_v35  ;;  %v7654_v35 = vld [vmem:[#allocation102_spill] sm:$0xff] }
 0x444   :  { %7647 = vst [vmem:[#allocation142_spill] sm:$0xff] %v5943_v6  ;;  %v5963_v54 = vadd.f32 %v5102_v24, %v7654_v35  ;;  %v7656_v6 = vld [vmem:[#allocation105_spill] sm:$0xff] }
 0x445   :  { %7649 = vst [vmem:[#allocation144_spill] sm:$0xff] %v5947_v16  ;;  %v5967_v33 = vadd.f32 %v5105_v61, %v7656_v6  ;;  %v7658_v16 = vld [vmem:[#allocation106_spill] sm:$0xff] }
 0x446   :  { %7651 = vst [vmem:[#allocation145_spill] sm:$0xff] %v5951_v44  ;;  %v5971_v5 = vadd.f32 %v5102_v24, %v7658_v16  ;;  %v7660_v44 = vld [vmem:[#allocation109_spill] sm:$0xff] }
 0x447   :  { %7653 = vst [vmem:[#allocation146_spill] sm:$0xff] %v5955_v29  ;;  %v5975_v63 = vadd.f32 %v5105_v61, %v7660_v44  ;;  %v7662_v29 = vld [vmem:[#allocation117_spill] sm:$0xff] }
 0x448   :  { %2444 = vst [vmem:[%s6666_s5 + $0x150] sm:$0xff] %v5342_v11  ;;  %v7663_v11 = vld [vmem:[#allocation110_spill] sm:$0xff] }
 0x449   :  { %7655 = vst [vmem:[#allocation147_spill] sm:$0xff] %v5963_v54  ;;  %v5983_v35 = vadd.f32 %v5102_v24, %v7663_v11  ;;  %v7665_v54 = vld [vmem:[#allocation113_spill] sm:$0xff] }
 0x44a   :  { %7657 = vst [vmem:[#allocation148_spill] sm:$0xff] %v5967_v33  ;;  %v5987_v6 = vadd.f32 %v5105_v61, %v7665_v54  ;;  %v7667_v33 = vld [vmem:[#allocation114_spill] sm:$0xff] }
 0x44b   :  { %7659 = vst [vmem:[#allocation149_spill] sm:$0xff] %v5971_v5  ;;  %v5991_v16 = vadd.f32 %v5102_v24, %v7667_v33  ;;  %v7669_v5 = vld [vmem:[#allocation126_spill] sm:$0xff] }
 0x44c   :  { %7661 = vst [vmem:[#allocation150_spill] sm:$0xff] %v5975_v63  ;;  %v5995_v44 = vadd.f32 %v5105_v61, %v7669_v5  ;;  %v7671_v63 = vld [vmem:[#allocation118_spill] sm:$0xff] }
 0x44d   :  { %2445 = vst [vmem:[%s6666_s5 + $0x158] sm:$0xff] %v7662_v29  ;;  %v7672_v29 = vld [vmem:[#allocation131_spill] sm:$0xff] }
 0x44e   :  { %7664 = vst [vmem:[#allocation151_spill] sm:$0xff] %v5983_v35  ;;  %v6003_v11 = vadd.f32 %v5102_v24, %v7672_v29  ;;  %v7674_v35 = vld [vmem:[#allocation138_spill] sm:$0xff] }
 0x44f   :  { %7666 = vst [vmem:[#allocation152_spill] sm:$0xff] %v5987_v6  ;;  %v6007_v54 = vadd.f32 %v5105_v61, %v7674_v35  ;;  %v7676_v6 = vld [vmem:[#allocation143_spill] sm:$0xff] }
 0x450   :  { %7668 = vst [vmem:[#allocation153_spill] sm:$0xff] %v5991_v16  ;;  %v6011_v33 = vadd.f32 %v5102_v24, %v7676_v6  ;;  %v7678_v16 = vld [vmem:[#allocation154_spill] sm:$0xff] }
 0x451   :  { %7670 = vst [vmem:[#allocation13_spill] sm:$0xff] %v5995_v44  ;;  %v6015_v5 = vadd.f32 %v5105_v61, %v7678_v16  ;;  %v7680_v44 = vld [vmem:[#allocation121_spill] sm:$0xff] }
 0x452   :  { %2446 = vst [vmem:[%s6666_s5 + $0x160] sm:$0xff] %v7671_v63  ;;  %v7681_v63 = vld [vmem:[#allocation155_spill] sm:$0xff] }
 0x453   :  { %7673 = vst [vmem:[#allocation14_spill] sm:$0xff] %v6003_v11  ;;  %v6023_v29 = vadd.f32 %v5102_v24, %v7681_v63  ;;  %v7683_v11 = vld [vmem:[#allocation156_spill] sm:$0xff]  ;;  %v7690_v63 = vld [vmem:[#allocation161_spill] sm:$0xff] }
 0x454   :  { %7675 = vst [vmem:[#allocation17_spill] sm:$0xff] %v6007_v54  ;;  %v6027_v35 = vadd.f32 %v5105_v61, %v7683_v11  ;;  %v7685_v54 = vld [vmem:[#allocation157_spill] sm:$0xff] }
 0x455   :  { %7677 = vst [vmem:[#allocation18_spill] sm:$0xff] %v6011_v33  ;;  %v6031_v6 = vadd.f32 %v5102_v24, %v7685_v54  ;;  %v7687_v33 = vld [vmem:[#allocation158_spill] sm:$0xff]  ;;  %v7693_v54 = vld [vmem:[#allocation87_spill] sm:$0xff] }
 0x456   :  { %7679 = vst [vmem:[#allocation21_spill] sm:$0xff] %v6015_v5  ;;  %v6035_v16 = vadd.f32 %v5105_v61, %v7687_v33  ;;  %v7691_v5 = vld [vmem:[#allocation55_spill] sm:$0xff] }
 0x457   :  { %2447 = vst [vmem:[%s6666_s5 + $0x168] sm:$0xff] %v7680_v44  ;;  %v7689_v44 = vld [vmem:[#allocation84_spill] sm:$0xff]  ;;  %v2257_v11 = vadd.f32 %v5105_v61, %v7691_v5 }
 0x458   :  { %7682 = vst [vmem:[#allocation22_spill] sm:$0xff] %v6023_v29  ;;  %v2058_v29 = vmul.f32 %v7690_v63, %v7689_v44 }
 0x459   :  { %7684 = vst [vmem:[#allocation25_spill] sm:$0xff] %v6027_v35  ;;  %v7692_v35 = vld [vmem:[#allocation122_spill] sm:$0xff] }
 0x45a   :  { %7686 = vst [vmem:[#allocation26_spill] sm:$0xff] %v6031_v6  ;;  %v7694_v6 = vld [vmem:[#allocation162_spill] sm:$0xff]  ;;  %v2259_v5 = vadd.f32 %v5105_v61, %v2058_v29 }
 0x45b   :  { %7688 = vst [vmem:[#allocation29_spill] sm:$0xff] %v6035_v16  ;;  %v2059_v33 = vmul.f32 %v7694_v6, %v7693_v54  ;;  %v7695_v16 = vld [vmem:[#allocation56_spill] sm:$0xff] }
 0x45c   :  { %2448 = vst [vmem:[%s6666_s5 + $0x170] sm:$0xff] %v5361_v32  ;;  %v2258_v13 = vadd.f32 %v5102_v24, %v7695_v16  ;;  %v7697_v32 = vld [vmem:[#allocation88_spill] sm:$0xff] }
 0x45d   :  { %2449 = vst [vmem:[%s6666_s5 + $0x178] sm:$0xff] %v7692_v35  ;;  %v2060_v44 = vmul.f32 %v7690_v63, %v7697_v32  ;;  %v7699_v35 = vld [vmem:[#allocation91_spill] sm:$0xff]  ;;  %v2260_v16 = vadd.f32 %v5102_v24, %v2059_v33  ;;  %v7702_v33 = vld [vmem:[#allocation96_spill] sm:$0xff] }
 0x45e   :  { %2450 = vst [vmem:[%s6666_s5 + $0x180] sm:$0xff] %v7696_v56  ;;  %v2061_v54 = vmul.f32 %v7694_v6, %v7699_v35  ;;  %v7700_v56 = vld [vmem:[#allocation92_spill] sm:$0xff] }
 0x45f   :  { %2451 = vst [vmem:[%s6666_s5 + $0x188] sm:$0xff] %v7698_v20  ;;  %v2062_v32 = vmul.f32 %v7690_v63, %v7700_v56  ;;  %v2261_v29 = vadd.f32 %v5105_v61, %v2060_v44  ;;  %v7701_v20 = vld [vmem:[#allocation95_spill] sm:$0xff] }
 0x460   :  { %2452 = vst [vmem:[%s6666_s5 + $0x190] sm:$0xff] %v5380_v3  ;;  %v2063_v0 = vmul.f32 %v7694_v6, %v7701_v20  ;;  %v2262_v35 = vadd.f32 %v5102_v24, %v2061_v54  ;;  %v2064_v3 = vmul.f32 %v7690_v63, %v7702_v33  ;;  %v7703_v44 = vld [vmem:[#allocation99_spill] sm:$0xff]  ;;  %v7704_v54 = vld [vmem:[#allocation100_spill] sm:$0xff] }
 0x461   :  { %2453 = vst [vmem:[%s6666_s5 + $0x198] sm:$0xff] %v2257_v11  ;;  %v2263_v56 = vadd.f32 %v5105_v61, %v2062_v32  ;;  %v2065_v11 = vmul.f32 %v7694_v6, %v7703_v44  ;;  %v7705_v32 = vld [vmem:[#allocation103_spill] sm:$0xff] }
 0x462   :  { %2454 = vst [vmem:[%s6666_s5 + $0x1a0] sm:$0xff] %v2258_v13  ;;  %v2264_v20 = vadd.f32 %v5102_v24, %v2063_v0  ;;  %v2066_v13 = vmul.f32 %v7690_v63, %v7704_v54  ;;  %v2265_v33 = vadd.f32 %v5105_v61, %v2064_v3  ;;  %v7706_v0 = vld [vmem:[#allocation104_spill] sm:$0xff]  ;;  %v7711_v3 = vld [vmem:[#allocation7_spill] sm:$0xff] }
 0x463   :  { %2455 = vst [vmem:[%s6666_s5 + $0x1a8] sm:$0xff] %v2259_v5  ;;  %v2067_v5 = vmul.f32 %v7694_v6, %v7705_v32  ;;  %v2266_v44 = vadd.f32 %v5102_v24, %v2065_v11  ;;  %v7714_v11 = vld [vmem:[#allocation10_spill] sm:$0xff]  ;;  %v7720_v32 = vld [vmem:[#allocation20_spill] sm:$0xff] }
 0x464   :  { %2456 = vst [vmem:[%s6666_s5 + $0x1b0] sm:$0xff] %v2260_v16  ;;  %v2068_v16 = vmul.f32 %v7690_v63, %v7706_v0  ;;  %v2267_v54 = vadd.f32 %v5105_v61, %v2066_v13  ;;  %v7709_v63 = vld [vmem:[#allocation5_spill] sm:$0xff]  ;;  %v7717_v13 = vld [vmem:[#allocation15_spill] sm:$0xff]  ;;  %v7724_v0 = vld [vmem:[#allocation28_spill] sm:$0xff] }
 0x465   :  { %2457 = vst [vmem:[%s6666_s5 + $0x1b8] sm:$0xff] %v2261_v29  ;;  %v2268_v29 = vadd.f32 %v5102_v24, %v2067_v5  ;;  %v7707_v24 = vld [vmem:[#allocation3_spill] sm:$0xff] }
 0x466   :  { %2458 = vst [vmem:[%s6666_s5 + $0x1c0] sm:$0xff] %v2262_v35  ;;  %v2269_v6 = vadd.f32 %v5105_v61, %v2068_v16  ;;  %v7708_v61 = vld [vmem:[#allocation4_spill] sm:$0xff]  ;;  %v7710_v35 = vld [vmem:[#allocation6_spill] sm:$0xff]  ;;  %v7721_v5 = vld [vmem:[#allocation23_spill] sm:$0xff] }
 0x467   :  { %2459 = vst [vmem:[%s6666_s5 + $0x1c8] sm:$0xff] %v2263_v56  ;;  %v7712_v56 = vld [vmem:[#allocation8_spill] sm:$0xff] }
 0x468   :  { %2460 = vst [vmem:[%s6666_s5 + $0x1d0] sm:$0xff] %v2264_v20  ;;  %v7715_v20 = vld [vmem:[#allocation11_spill] sm:$0xff]  ;;  %v7726_v16 = vld [vmem:[#allocation32_spill] sm:$0xff] }
 0x469   :  { %2461 = vst [vmem:[%s6666_s5 + $0x1d8] sm:$0xff] %v2265_v33  ;;  %v7718_v33 = vld [vmem:[#allocation16_spill] sm:$0xff] }
 0x46a   :  { %2462 = vst [vmem:[%s6666_s5 + $0x1e0] sm:$0xff] %v2266_v44  ;;  %v7723_v44 = vld [vmem:[#allocation27_spill] sm:$0xff] }
 0x46b   :  { %2463 = vst [vmem:[%s6666_s5 + $0x1e8] sm:$0xff] %v2267_v54  ;;  %v7727_v54 = vld [vmem:[#allocation35_spill] sm:$0xff] }
 0x46c   :  { %2464 = vst [vmem:[%s6666_s5 + $0x1f0] sm:$0xff] %v2268_v29  ;;  %v7729_v29 = vld [vmem:[#allocation39_spill] sm:$0xff] }
 0x46d   :  { %2465 = vst [vmem:[%s6666_s5 + $0x1f8] sm:$0xff] %v2269_v6  ;;  %v7730_v6 = vld [vmem:[#allocation40_spill] sm:$0xff] }
 0x46e   :  { %2466 = vst [vmem:[%s6666_s5 + $0x200] sm:$0xff] %v7707_v24  ;;  %v7732_v24 = vld [vmem:[#allocation44_spill] sm:$0xff] }
 0x46f   :  { %2467 = vst [vmem:[%s6666_s5 + $0x208] sm:$0xff] %v7708_v61  ;;  %v7733_v61 = vld [vmem:[#allocation47_spill] sm:$0xff] }
 0x470   :  { %2468 = vst [vmem:[%s6666_s5 + $0x210] sm:$0xff] %v7709_v63  ;;  %v7735_v63 = vld [vmem:[#allocation51_spill] sm:$0xff] }
 0x471   :  { %2469 = vst [vmem:[%s6666_s5 + $0x218] sm:$0xff] %v5399_v43  ;;  %v7713_v43 = vld [vmem:[#allocation9_spill] sm:$0xff] }
 0x472   :  { %2470 = vst [vmem:[%s6666_s5 + $0x220] sm:$0xff] %v7710_v35  ;;  %v7736_v35 = vld [vmem:[#allocation52_spill] sm:$0xff] }
 0x473   :  { %2471 = vst [vmem:[%s6666_s5 + $0x228] sm:$0xff] %v7711_v3  ;;  %v7738_v3 = vld [vmem:[#allocation60_spill] sm:$0xff] }
 0x474   :  { %2472 = vst [vmem:[%s6666_s5 + $0x230] sm:$0xff] %v7712_v56  ;;  %v7739_v56 = vld [vmem:[#allocation63_spill] sm:$0xff] }
 0x475   :  { %2473 = vst [vmem:[%s6666_s5 + $0x238] sm:$0xff] %v5418_v9  ;;  %v7716_v9 = vld [vmem:[#allocation12_spill] sm:$0xff] }
 0x476   :  { %2474 = vst [vmem:[%s6666_s5 + $0x240] sm:$0xff] %v7713_v43  ;;  %v7741_v43 = vld [vmem:[#allocation67_spill] sm:$0xff] }
 0x477   :  { %2475 = vst [vmem:[%s6666_s5 + $0x248] sm:$0xff] %v7714_v11  ;;  %v7742_v11 = vld [vmem:[#allocation68_spill] sm:$0xff] }
 0x478   :  { %2476 = vst [vmem:[%s6666_s5 + $0x250] sm:$0xff] %v7715_v20  ;;  %v7744_v20 = vld [vmem:[#allocation72_spill] sm:$0xff] }
 0x479   :  { %2477 = vst [vmem:[%s6666_s5 + $0x258] sm:$0xff] %v5437_v30  ;;  %v7719_v30 = vld [vmem:[#allocation19_spill] sm:$0xff] }
 0x47a   :  { %2478 = vst [vmem:[%s6666_s5 + $0x260] sm:$0xff] %v7716_v9  ;;  %v7745_v9 = vld [vmem:[#allocation75_spill] sm:$0xff] }
 0x47b   :  { %2479 = vst [vmem:[%s6666_s5 + $0x268] sm:$0xff] %v7717_v13  ;;  %v7747_v13 = vld [vmem:[#allocation79_spill] sm:$0xff] }
 0x47c   :  { %2480 = vst [vmem:[%s6666_s5 + $0x270] sm:$0xff] %v7718_v33  ;;  %v7748_v33 = vld [vmem:[#allocation80_spill] sm:$0xff] }
 0x47d   :  { %2481 = vst [vmem:[%s6666_s5 + $0x278] sm:$0xff] %v5456_v25  ;;  %v7722_v25 = vld [vmem:[#allocation24_spill] sm:$0xff] }
 0x47e   :  { %2482 = vst [vmem:[%s6666_s5 + $0x280] sm:$0xff] %v7719_v30  ;;  %v7750_v30 = vld [vmem:[#allocation107_spill] sm:$0xff] }
 0x47f   :  { %2483 = vst [vmem:[%s6666_s5 + $0x288] sm:$0xff] %v7720_v32  ;;  %v7751_v32 = vld [vmem:[#allocation108_spill] sm:$0xff] }
 0x480   :  { %2484 = vst [vmem:[%s6666_s5 + $0x290] sm:$0xff] %v7721_v5  ;;  %v7753_v5 = vld [vmem:[#allocation112_spill] sm:$0xff] }
 0x481   :  { %2485 = vst [vmem:[%s6666_s5 + $0x298] sm:$0xff] %v5475_v50  ;;  %v7725_v50 = vld [vmem:[#allocation31_spill] sm:$0xff] }
 0x482   :  { %2486 = vst [vmem:[%s6666_s5 + $0x2a0] sm:$0xff] %v7722_v25  ;;  %v7754_v25 = vld [vmem:[#allocation115_spill] sm:$0xff] }
 0x483   :  { %2487 = vst [vmem:[%s6666_s5 + $0x2a8] sm:$0xff] %v7723_v44  ;;  %v7756_v44 = vld [vmem:[#allocation119_spill] sm:$0xff] }
 0x484   :  { %2488 = vst [vmem:[%s6666_s5 + $0x2b0] sm:$0xff] %v7724_v0  ;;  %v7757_v0 = vld [vmem:[#allocation120_spill] sm:$0xff] }
 0x485   :  { %2489 = vst [vmem:[%s6666_s5 + $0x2b8] sm:$0xff] %v5495_v26  ;;  %v7728_v26 = vld [vmem:[#allocation36_spill] sm:$0xff] }
 0x486   :  { %2490 = vst [vmem:[%s6666_s5 + $0x2c0] sm:$0xff] %v7725_v50  ;;  %v7759_v50 = vld [vmem:[#allocation124_spill] sm:$0xff] }
 0x487   :  { %2491 = vst [vmem:[%s6666_s5 + $0x2c8] sm:$0xff] %v7726_v16  ;;  %v7760_v16 = vld [vmem:[#allocation127_spill] sm:$0xff] }
 0x488   :  { %2492 = vst [vmem:[%s6666_s5 + $0x2d0] sm:$0xff] %v7727_v54  ;;  %v7762_v54 = vld [vmem:[#allocation129_spill] sm:$0xff] }
 0x489   :  { %2493 = vst [vmem:[%s6666_s5 + $0x2d8] sm:$0xff] %v5515_v2  ;;  %v7731_v2 = vld [vmem:[#allocation43_spill] sm:$0xff] }
 0x48a   :  { %2494 = vst [vmem:[%s6666_s5 + $0x2e0] sm:$0xff] %v7728_v26  ;;  %v7763_v26 = vld [vmem:[#allocation130_spill] sm:$0xff] }
 0x48b   :  { %2495 = vst [vmem:[%s6666_s5 + $0x2e8] sm:$0xff] %v7729_v29 }
 0x48c   :  { %2496 = vst [vmem:[%s6666_s5 + $0x2f0] sm:$0xff] %v7730_v6 }
 0x48d   :  { %2497 = vst [vmem:[%s6666_s5 + $0x2f8] sm:$0xff] %v5535_v27  ;;  %v7734_v27 = vld [vmem:[#allocation48_spill] sm:$0xff] }
 0x48e   :  { %2498 = vst [vmem:[%s6666_s5 + $0x300] sm:$0xff] %v7731_v2 }
 0x48f   :  { %2499 = vst [vmem:[%s6666_s5 + $0x308] sm:$0xff] %v7732_v24 }
 0x490   :  { %2500 = vst [vmem:[%s6666_s5 + $0x310] sm:$0xff] %v7733_v61 }
 0x491   :  { %2501 = vst [vmem:[%s6666_s5 + $0x318] sm:$0xff] %v5555_v41  ;;  %v7737_v41 = vld [vmem:[#allocation59_spill] sm:$0xff] }
 0x492   :  { %2502 = vst [vmem:[%s6666_s5 + $0x320] sm:$0xff] %v7734_v27 }
 0x493   :  { %2503 = vst [vmem:[%s6666_s5 + $0x328] sm:$0xff] %v7735_v63 }
 0x494   :  { %2504 = vst [vmem:[%s6666_s5 + $0x330] sm:$0xff] %v7736_v35 }
 0x495   :  { %2505 = vst [vmem:[%s6666_s5 + $0x338] sm:$0xff] %v5575_v21  ;;  %v7740_v21 = vld [vmem:[#allocation64_spill] sm:$0xff] }
 0x496   :  { %2506 = vst [vmem:[%s6666_s5 + $0x340] sm:$0xff] %v7737_v41 }
 0x497   :  { %2507 = vst [vmem:[%s6666_s5 + $0x348] sm:$0xff] %v7738_v3 }
 0x498   :  { %2508 = vst [vmem:[%s6666_s5 + $0x350] sm:$0xff] %v7739_v56 }
 0x499   :  { %2509 = vst [vmem:[%s6666_s5 + $0x358] sm:$0xff] %v5595_v47  ;;  %v7743_v47 = vld [vmem:[#allocation71_spill] sm:$0xff] }
 0x49a   :  { %2510 = vst [vmem:[%s6666_s5 + $0x360] sm:$0xff] %v7740_v21 }
 0x49b   :  { %2511 = vst [vmem:[%s6666_s5 + $0x368] sm:$0xff] %v7741_v43 }
 0x49c   :  { %2512 = vst [vmem:[%s6666_s5 + $0x370] sm:$0xff] %v7742_v11 }
 0x49d   :  { %2513 = vst [vmem:[%s6666_s5 + $0x378] sm:$0xff] %v5615_v48  ;;  %v7746_v48 = vld [vmem:[#allocation76_spill] sm:$0xff] }
 0x49e   :  { %2514 = vst [vmem:[%s6666_s5 + $0x380] sm:$0xff] %v7743_v47 }
 0x49f   :  { %2515 = vst [vmem:[%s6666_s5 + $0x388] sm:$0xff] %v7744_v20 }
 0x4a0   :  { %2516 = vst [vmem:[%s6666_s5 + $0x390] sm:$0xff] %v7745_v9 }
 0x4a1   :  { %2517 = vst [vmem:[%s6666_s5 + $0x398] sm:$0xff] %v5635_v12  ;;  %v7749_v12 = vld [vmem:[#allocation83_spill] sm:$0xff] }
 0x4a2   :  { %2518 = vst [vmem:[%s6666_s5 + $0x3a0] sm:$0xff] %v7746_v48 }
 0x4a3   :  { %2519 = vst [vmem:[%s6666_s5 + $0x3a8] sm:$0xff] %v7747_v13 }
 0x4a4   :  { %2520 = vst [vmem:[%s6666_s5 + $0x3b0] sm:$0xff] %v7748_v33 }
 0x4a5   :  { %2521 = vst [vmem:[%s6666_s5 + $0x3b8] sm:$0xff] %v5655_v45  ;;  %v7752_v45 = vld [vmem:[#allocation111_spill] sm:$0xff] }
 0x4a6   :  { %2522 = vst [vmem:[%s6666_s5 + $0x3c0] sm:$0xff] %v7749_v12 }
 0x4a7   :  { %2523 = vst [vmem:[%s6666_s5 + $0x3c8] sm:$0xff] %v7750_v30 }
 0x4a8   :  { %2524 = vst [vmem:[%s6666_s5 + $0x3d0] sm:$0xff] %v7751_v32 }
 0x4a9   :  { %2525 = vst [vmem:[%s6666_s5 + $0x3d8] sm:$0xff] %v5675_v57  ;;  %v7755_v57 = vld [vmem:[#allocation116_spill] sm:$0xff] }
 0x4aa   :  { %2526 = vst [vmem:[%s6666_s5 + $0x3e0] sm:$0xff] %v7752_v45 }
 0x4ab   :  { %2527 = vst [vmem:[%s6666_s5 + $0x3e8] sm:$0xff] %v7753_v5 }
 0x4ac   :  { %2528 = vst [vmem:[%s6666_s5 + $0x3f0] sm:$0xff] %v7754_v25 }
 0x4ad   :  { %2529 = vst [vmem:[%s6666_s5 + $0x3f8] sm:$0xff] %v5695_v49  ;;  %v7758_v49 = vld [vmem:[#allocation123_spill] sm:$0xff] }
 0x4ae   :  { %2530 = vst [vmem:[%s6666_s5 + $0x400] sm:$0xff] %v7755_v57 }
 0x4af   :  { %2531 = vst [vmem:[%s6666_s5 + $0x408] sm:$0xff] %v7756_v44 }
 0x4b0   :  { %2532 = vst [vmem:[%s6666_s5 + $0x410] sm:$0xff] %v7757_v0 }
 0x4b1   :  { %2533 = vst [vmem:[%s6666_s5 + $0x418] sm:$0xff] %v5715_v19  ;;  %v7761_v19 = vld [vmem:[#allocation128_spill] sm:$0xff] }
 0x4b2   :  { %2534 = vst [vmem:[%s6666_s5 + $0x420] sm:$0xff] %v7758_v49 }
 0x4b3   :  { %2535 = vst [vmem:[%s6666_s5 + $0x428] sm:$0xff] %v7759_v50 }
 0x4b4   :  { %2536 = vst [vmem:[%s6666_s5 + $0x430] sm:$0xff] %v7760_v16 }
 0x4b5   :  { %2537 = vst [vmem:[%s6666_s5 + $0x438] sm:$0xff] %v5735_v53  ;;  %v7764_v53 = vld [vmem:[#allocation132_spill] sm:$0xff] }
 0x4b6   :  { %2538 = vst [vmem:[%s6666_s5 + $0x440] sm:$0xff] %v7761_v19 }
 0x4b7   :  { %2539 = vst [vmem:[%s6666_s5 + $0x448] sm:$0xff] %v7762_v54 }
 0x4b8   :  { %2540 = vst [vmem:[%s6666_s5 + $0x450] sm:$0xff] %v7763_v26 }
 0x4b9   :  { %2541 = vst [vmem:[%s6666_s5 + $0x458] sm:$0xff] %v5755_v36  ;;  %v7765_v36 = vld [vmem:[#allocation133_spill] sm:$0xff] }
 0x4ba   :  { %2542 = vst [vmem:[%s6666_s5 + $0x460] sm:$0xff] %v5763_v46  ;;  %v7766_v46 = vld [vmem:[#allocation134_spill] sm:$0xff] }
 0x4bb   :  { %2543 = vst [vmem:[%s6666_s5 + $0x468] sm:$0xff] %v5767_v55  ;;  %v7767_v55 = vld [vmem:[#allocation135_spill] sm:$0xff] }
 0x4bc   :  { %2544 = vst [vmem:[%s6666_s5 + $0x470] sm:$0xff] %v5771_v4  ;;  %v7768_v4 = vld [vmem:[#allocation136_spill] sm:$0xff] }
 0x4bd   :  { %2545 = vst [vmem:[%s6666_s5 + $0x478] sm:$0xff] %v5775_v10  ;;  %v7769_v10 = vld [vmem:[#allocation137_spill] sm:$0xff] }
 0x4be   :  { %2546 = vst [vmem:[%s6666_s5 + $0x480] sm:$0xff] %v5783_v60  ;;  %v7770_v60 = vld [vmem:[#allocation139_spill] sm:$0xff] }
 0x4bf   :  { %2547 = vst [vmem:[%s6666_s5 + $0x488] sm:$0xff] %v5787_v58  ;;  %v7771_v58 = vld [vmem:[#allocation140_spill] sm:$0xff] }
 0x4c0   :  { %2548 = vst [vmem:[%s6666_s5 + $0x490] sm:$0xff] %v5791_v22  ;;  %v7772_v22 = vld [vmem:[#allocation141_spill] sm:$0xff] }
 0x4c1   :  { %2549 = vst [vmem:[%s6666_s5 + $0x498] sm:$0xff] %v5795_v38  ;;  %v7773_v38 = vld [vmem:[#allocation142_spill] sm:$0xff] }
 0x4c2   :  { %2550 = vst [vmem:[%s6666_s5 + $0x4a0] sm:$0xff] %v5803_v52  ;;  %v7774_v52 = vld [vmem:[#allocation144_spill] sm:$0xff] }
 0x4c3   :  { %2551 = vst [vmem:[%s6666_s5 + $0x4a8] sm:$0xff] %v5807_v8  ;;  %v7775_v8 = vld [vmem:[#allocation145_spill] sm:$0xff] }
 0x4c4   :  { %2552 = vst [vmem:[%s6666_s5 + $0x4b0] sm:$0xff] %v5811_v14  ;;  %v7776_v14 = vld [vmem:[#allocation146_spill] sm:$0xff] }
 0x4c5   :  { %2553 = vst [vmem:[%s6666_s5 + $0x4b8] sm:$0xff] %v5815_v1  ;;  %v7777_v1 = vld [vmem:[#allocation147_spill] sm:$0xff] }
 0x4c6   :  { %2554 = vst [vmem:[%s6666_s5 + $0x4c0] sm:$0xff] %v5823_v18  ;;  %v7778_v18 = vld [vmem:[#allocation148_spill] sm:$0xff] }
 0x4c7   :  { %2555 = vst [vmem:[%s6666_s5 + $0x4c8] sm:$0xff] %v5827_v34  ;;  %v7779_v34 = vld [vmem:[#allocation149_spill] sm:$0xff] }
 0x4c8   :  { %2556 = vst [vmem:[%s6666_s5 + $0x4d0] sm:$0xff] %v5831_v7  ;;  %v7780_v7 = vld [vmem:[#allocation150_spill] sm:$0xff] }
 0x4c9   :  { %2557 = vst [vmem:[%s6666_s5 + $0x4d8] sm:$0xff] %v5835_v62  ;;  %v7781_v62 = vld [vmem:[#allocation151_spill] sm:$0xff] }
 0x4ca   :  { %2558 = vst [vmem:[%s6666_s5 + $0x4e0] sm:$0xff] %v5843_v40  ;;  %v7782_v40 = vld [vmem:[#allocation152_spill] sm:$0xff] }
 0x4cb   :  { %2559 = vst [vmem:[%s6666_s5 + $0x4e8] sm:$0xff] %v5847_v51  ;;  %v7783_v51 = vld [vmem:[#allocation153_spill] sm:$0xff] }
 0x4cc   :  { %2560 = vst [vmem:[%s6666_s5 + $0x4f0] sm:$0xff] %v5851_v42  ;;  %v7784_v42 = vld [vmem:[#allocation13_spill] sm:$0xff] }
 0x4cd   :  { %2561 = vst [vmem:[%s6666_s5 + $0x4f8] sm:$0xff] %v5855_v23  ;;  %v7785_v23 = vld [vmem:[#allocation14_spill] sm:$0xff] }
 0x4ce   :  { %2562 = vst [vmem:[%s6666_s5 + $0x500] sm:$0xff] %v5863_v17  ;;  %v7786_v17 = vld [vmem:[#allocation17_spill] sm:$0xff] }
 0x4cf   :  { %2563 = vst [vmem:[%s6666_s5 + $0x508] sm:$0xff] %v5867_v31  ;;  %v7787_v31 = vld [vmem:[#allocation18_spill] sm:$0xff] }
 0x4d0   :  { %2564 = vst [vmem:[%s6666_s5 + $0x510] sm:$0xff] %v5871_v15  ;;  %v7788_v15 = vld [vmem:[#allocation21_spill] sm:$0xff] }
 0x4d1   :  { %2565 = vst [vmem:[%s6666_s5 + $0x518] sm:$0xff] %v5875_v59  ;;  %v7789_v59 = vld [vmem:[#allocation22_spill] sm:$0xff] }
 0x4d2   :  { %2566 = vst [vmem:[%s6666_s5 + $0x520] sm:$0xff] %v5883_v28  ;;  %v7790_v28 = vld [vmem:[#allocation25_spill] sm:$0xff] }
 0x4d3   :  { %2567 = vst [vmem:[%s6666_s5 + $0x528] sm:$0xff] %v5887_v37  ;;  %v7791_v37 = vld [vmem:[#allocation26_spill] sm:$0xff] }
 0x4d4   :  { %2568 = vst [vmem:[%s6666_s5 + $0x530] sm:$0xff] %v5891_v39  ;;  %v7792_v39 = vld [vmem:[#allocation29_spill] sm:$0xff] }
 0x4d5   :  { %2569 = vst [vmem:[%s6666_s5 + $0x538] sm:$0xff] %v7764_v53 }
 0x4d6   :  { %2570 = vst [vmem:[%s6666_s5 + $0x540] sm:$0xff] %v7765_v36 }
 0x4d7   :  { %2571 = vst [vmem:[%s6666_s5 + $0x548] sm:$0xff] %v7766_v46 }
 0x4d8   :  { %2572 = vst [vmem:[%s6666_s5 + $0x550] sm:$0xff] %v7767_v55 }
 0x4d9   :  { %2573 = vst [vmem:[%s6666_s5 + $0x558] sm:$0xff] %v7768_v4 }
 0x4da   :  { %2574 = vst [vmem:[%s6666_s5 + $0x560] sm:$0xff] %v7769_v10 }
 0x4db   :  { %2575 = vst [vmem:[%s6666_s5 + $0x568] sm:$0xff] %v7770_v60 }
 0x4dc   :  { %2576 = vst [vmem:[%s6666_s5 + $0x570] sm:$0xff] %v7771_v58 }
 0x4dd   :  { %2577 = vst [vmem:[%s6666_s5 + $0x578] sm:$0xff] %v7772_v22 }
 0x4de   :  { %2578 = vst [vmem:[%s6666_s5 + $0x580] sm:$0xff] %v7773_v38 }
 0x4df   :  { %2579 = vst [vmem:[%s6666_s5 + $0x588] sm:$0xff] %v7774_v52 }
 0x4e0   :  { %2580 = vst [vmem:[%s6666_s5 + $0x590] sm:$0xff] %v7775_v8 }
 0x4e1   :  { %2581 = vst [vmem:[%s6666_s5 + $0x598] sm:$0xff] %v7776_v14 }
 0x4e2   :  { %2582 = vst [vmem:[%s6666_s5 + $0x5a0] sm:$0xff] %v7777_v1 }
 0x4e3   :  { %2583 = vst [vmem:[%s6666_s5 + $0x5a8] sm:$0xff] %v7778_v18 }
 0x4e4   :  { %2584 = vst [vmem:[%s6666_s5 + $0x5b0] sm:$0xff] %v7779_v34 }
 0x4e5   :  { %2585 = vst [vmem:[%s6666_s5 + $0x5b8] sm:$0xff] %v7780_v7 }
 0x4e6   :  { %2586 = vst [vmem:[%s6666_s5 + $0x5c0] sm:$0xff] %v7781_v62 }
 0x4e7   :  { %2587 = vst [vmem:[%s6666_s5 + $0x5c8] sm:$0xff] %v7782_v40 }
 0x4e8   :  { %2588 = vst [vmem:[%s6666_s5 + $0x5d0] sm:$0xff] %v7783_v51 }
 0x4e9   :  { %2589 = vst [vmem:[%s6666_s5 + $0x5d8] sm:$0xff] %v7784_v42 }
 0x4ea   :  { %2590 = vst [vmem:[%s6666_s5 + $0x5e0] sm:$0xff] %v7785_v23 }
 0x4eb   :  { %2591 = vst [vmem:[%s6666_s5 + $0x5e8] sm:$0xff] %v7786_v17 }
 0x4ec   :  { %2592 = vst [vmem:[%s6666_s5 + $0x5f0] sm:$0xff] %v7787_v31 }
 0x4ed   :  { %2593 = vst [vmem:[%s6666_s5 + $0x5f8] sm:$0xff] %v7788_v15 }
 0x4ee   :  { %2594 = vst [vmem:[%s6666_s5 + $0x600] sm:$0xff] %v7789_v59 }
 0x4ef   :  { %2595 = vst [vmem:[%s6666_s5 + $0x608] sm:$0xff] %v7790_v28 }
 0x4f0   :  { %2596 = vst [vmem:[%s6666_s5 + $0x610] sm:$0xff] %v7791_v37 }
 0x4f1   :  { %2597 = vst [vmem:[%s6666_s5 + $0x618] sm:$0xff] %v7792_v39 }

</bundles_post_ra>
